<compile_context>
chip_gen: v7x
topology: tpu7x:2x2x1
jax: 0.10.0
libtpu: 0.0.40
codegen_flags: <defaults>
</compile_context>

<pallas_src>
import functools
import numpy as np

import jax
import jax.numpy as jnp
from jax import lax
from jax.experimental import pallas as pl
from jax.experimental.pallas import tpu as pltpu


# ------------------------------------------------------------------
# small helpers shared by all kernels
# ------------------------------------------------------------------
def _bf(x):
    return x.astype(jnp.bfloat16)


def _mm(a, b):
    """MXU matmul, bf16 operands, f32 accumulation."""
    return jnp.dot(_bf(a), _bf(b), preferred_element_type=jnp.float32)


def _mm_nt(a, b):
    """a @ b.T expressed via dot_general (no in-kernel transpose)."""
    return lax.dot_general(_bf(a), _bf(b), (((1,), (1,)), ((), ())),
                           preferred_element_type=jnp.float32)


def _ln(x, g, b, eps=1e-5):
    x = x.astype(jnp.float32)
    mu = jnp.mean(x, axis=-1, keepdims=True)
    var = jnp.mean(jnp.square(x - mu), axis=-1, keepdims=True)
    return (x - mu) * lax.rsqrt(var + eps) * g + b


def _cplx_mm(a, b, wr, wi, ws, br, bi):
    """Gauss/Karatsuba complex linear: 3 matmuls instead of 4.

    out_a = a@Wr - b@Wi + (br - bi) ;  out_b = b@Wr + a@Wi + (br + bi)
    with ws = Wr + Wi precomputed in the wrapper.
    """
    m1 = _mm(a, wr)
    m2 = _mm(b, wi)
    m3 = _mm(a + b, ws)
    return m1 - m2 + (br - bi), m3 - m1 - m2 + (br + bi)


def _row_tile(M, max_tile=256):
    """Biggest row tile <= 256; halve only to keep >=2 parallel steps (v7x dual TC)."""
    if M <= max_tile:
        return M // 2 if (M % 16 == 0 and M >= 16) else M
    for t in range(max_tile, 7, -1):
        if M % t == 0:
            return t
    return M  # fallback: single full block


def _full_spec(a):
    return pl.BlockSpec(a.shape, lambda *_: (0,) * a.ndim)


_PAR = pltpu.CompilerParams(dimension_semantics=("parallel",))


# ------------------------------------------------------------------
# Kernel 1: input embedding  (fc_a/fc_b + complex proj + embed scale + pos-emb)
# ------------------------------------------------------------------
def _embed_kernel(xa_ref, xb_ref, wa_ref, ba_ref, wb_ref, bb_ref,
                  wr_ref, wi_ref, ws_ref, br_ref, bi_ref, pe_ref,
                  oa_ref, ob_ref, *, embed_scale):
    a = _mm(xa_ref[...], wa_ref[...]) + ba_ref[...]
    b = _mm(xb_ref[...], wb_ref[...]) + bb_ref[...]
    pa, pb = _cplx_mm(a, b, wr_ref[...], wi_ref[...], ws_ref[...],
                      br_ref[...], bi_ref[...])
    oa_ref[...] = (pa * embed_scale + pe_ref[...]).astype(oa_ref.dtype)
    ob_ref[...] = (pb * embed_scale + pe_ref[...]).astype(ob_ref.dtype)


def embed_call(xa, xb, ep, *, embed_scale):
    M, D = xa.shape
    E = ep["pe"].shape[1]
    TM = _row_tile(M)
    row_in = pl.BlockSpec((TM, D), lambda i: (i, 0))
    row_e = pl.BlockSpec((TM, E), lambda i: (i, 0))
    fa, fb, pr = ep["fc_a"], ep["fc_b"], ep["proj"]
    args = (xa, xb, fa["w"], fa["b"], fb["w"], fb["b"],
            pr["wr"], pr["wi"], pr["ws"], pr["br"], pr["bi"], ep["pe"])
    in_specs = [row_in, row_in] + [_full_spec(a) for a in args[2:11]] + [row_e]
    return pl.pallas_call(
        functools.partial(_embed_kernel, embed_scale=embed_scale),
        out_shape=(jax.ShapeDtypeStruct((M, E), jnp.float32),) * 2,
        grid=(M // TM,),
        in_specs=in_specs,
        out_specs=(row_e, row_e),
        compiler_params=_PAR,
    )(*args)


# ------------------------------------------------------------------
# Kernel 2: pre-norm + fused QKV complex projection (one call for Q, K and V)
# ------------------------------------------------------------------
def _ln_qkv_kernel(xa_ref, xb_ref, ga_ref, ba_ref, gb_ref, bb_ref,
                   wr_ref, wi_ref, ws_ref, br_ref, bi_ref,
                   qa_ref, qb_ref):
    ya = _ln(xa_ref[...], ga_ref[...], ba_ref[...])
    yb = _ln(xb_ref[...], gb_ref[...], bb_ref[...])
    oa, ob = _cplx_mm(ya, yb, wr_ref[...], wi_ref[...], ws_ref[...],
                      br_ref[...], bi_ref[...])
    qa_ref[...] = oa.astype(qa_ref.dtype)
    qb_ref[...] = ob.astype(qb_ref.dtype)


def ln_qkv_call(xa, xb, ln_a, ln_b, qkv):
    M, E = xa.shape
    N3 = qkv["wr"].shape[1]
    TM = _row_tile(M)
    row_in = pl.BlockSpec((TM, E), lambda i: (i, 0))
    row_out = pl.BlockSpec((TM, N3), lambda i: (i, 0))
    args = (xa, xb, ln_a[0], ln_a[1], ln_b[0], ln_b[1],
            qkv["wr"], qkv["wi"], qkv["ws"], qkv["br"], qkv["bi"])
    in_specs = [row_in, row_in] + [_full_spec(a) for a in args[2:]]
    return pl.pallas_call(
        _ln_qkv_kernel,
        out_shape=(jax.ShapeDtypeStruct((M, N3), jnp.float32),) * 2,
        grid=(M // TM,),
        in_specs=in_specs,
        out_specs=(row_out, row_out),
        compiler_params=_PAR,
    )(*args)


# ------------------------------------------------------------------
# Kernel 3: complex multi-head attention + output projection + residual
# (one grid step per batch element; all heads processed inside the kernel)
# ------------------------------------------------------------------
def _attn_block_kernel(qkv_a_ref, qkv_b_ref, xa_ref, xb_ref,
                       wr_ref, wi_ref, ws_ref, br_ref, bi_ref,
                       oa_ref, ob_ref, *, num_heads, scale):
    L = qkv_a_ref.shape[1]
    E = qkv_a_ref.shape[2] // 3
    dh = E // num_heads

    qkv_a = qkv_a_ref[0]                         # (L, 3E)
    qkv_b = qkv_b_ref[0]
    qa, ka, va = qkv_a[:, :E], qkv_a[:, E:2 * E], qkv_a[:, 2 * E:]
    qb, kb, vb = qkv_b[:, :E], qkv_b[:, E:2 * E], qkv_b[:, 2 * E:]

    def softmax(s):
        m = jnp.max(s, axis=-1, keepdims=True)
        e = jnp.exp(s - m)
        return e * pl.reciprocal(jnp.sum(e, axis=-1, keepdims=True), approx=True)

    outs_a, outs_b = [], []
    for h in range(num_heads):
        lo, hi = h * dh, (h + 1) * dh
        # stacked score matmul:  [qa;qb] @ [ka;kb]^T  -> all 4 score blocks at once
        q_cat = jnp.concatenate([qa[:, lo:hi], qb[:, lo:hi]], axis=0) * scale  # (2L, dh)
        k_cat = jnp.concatenate([ka[:, lo:hi], kb[:, lo:hi]], axis=0)          # (2L, dh)
        s = _mm_nt(q_cat, k_cat)                                               # (2L, 2L)
        p_aa = softmax(s[:L, :L])
        p_ab = softmax(s[:L, L:])
        p_ba = softmax(s[L:, :L])
        p_bb = softmax(s[L:, L:])
        # Ps/Pd factorization: out_a = Ps@va - Pd@vb ; out_b = Ps@vb + Pd@va
        P = jnp.concatenate([p_aa - p_bb, p_ab + p_ba], axis=1)                # (L, 2L)
        va_h, vb_h = va[:, lo:hi], vb[:, lo:hi]
        V = jnp.concatenate(
            [jnp.concatenate([va_h, -vb_h], axis=0),
             jnp.concatenate([vb_h, va_h], axis=0)], axis=1)                   # (2L, 2dh)
        o = _mm(P, V)                                                          # (L, 2dh)
        outs_a.append(o[:, :dh])
        outs_b.append(o[:, dh:])

    attn_a = jnp.concatenate(outs_a, axis=1)     # (L, E) lane-dense
    attn_b = jnp.concatenate(outs_b, axis=1)

    # fused output projection (Gauss) + residual add
    oa, ob = _cplx_mm(attn_a, attn_b, wr_ref[...], wi_ref[...], ws_ref[...],
                      br_ref[...], bi_ref[...])
    oa_ref[...] = (xa_ref[0] + oa)[None].astype(oa_ref.dtype)
    ob_ref[...] = (xb_ref[0] + ob)[None].astype(ob_ref.dtype)


def attn_block_call(qkv_a, qkv_b, xa, xb, cl_out, *, seq_len, batch, num_heads):
    M, E = xa.shape
    L, N = seq_len, batch
    E3 = qkv_a.shape[1]
    dh = E // num_heads
    scale = float(dh) ** -0.5

    qkv_a3 = qkv_a.reshape(N, L, E3)
    qkv_b3 = qkv_b.reshape(N, L, E3)
    xa3 = xa.reshape(N, L, E)
    xb3 = xb.reshape(N, L, E)

    qkv_spec = pl.BlockSpec((1, L, E3), lambda n: (n, 0, 0))
    x_spec = pl.BlockSpec((1, L, E), lambda n: (n, 0, 0))
    args = (qkv_a3, qkv_b3, xa3, xb3,
            cl_out["wr"], cl_out["wi"], cl_out["ws"], cl_out["br"], cl_out["bi"])
    in_specs = [qkv_spec, qkv_spec, x_spec, x_spec] + [_full_spec(a) for a in args[4:]]

    oa, ob = pl.pallas_call(
        functools.partial(_attn_block_kernel, num_heads=num_heads, scale=scale),
        out_shape=(jax.ShapeDtypeStruct((N, L, E), jnp.float32),) * 2,
        grid=(N,),
        in_specs=in_specs,
        out_specs=(x_spec, x_spec),
        compiler_params=_PAR,
    )(*args)
    return oa.reshape(M, E), ob.reshape(M, E)


# ------------------------------------------------------------------
# Kernel 4: pre-norm + complex FFN (fc1 -> CReLU -> fc2) + residual, fully fused
# ------------------------------------------------------------------
def _ln_ffn_kernel(xa_ref, xb_ref, ga_ref, ba_ref, gb_ref, bb_ref,
                   w1r_ref, w1i_ref, w1s_ref, b1r_ref, b1i_ref,
                   w2r_ref, w2i_ref, w2s_ref, b2r_ref, b2i_ref,
                   oa_ref, ob_ref):
    xa = xa_ref[...]
    xb = xb_ref[...]
    ya = _ln(xa, ga_ref[...], ba_ref[...])
    yb = _ln(xb, gb_ref[...], bb_ref[...])
    fa, fb = _cplx_mm(ya, yb, w1r_ref[...], w1i_ref[...], w1s_ref[...],
                      b1r_ref[...], b1i_ref[...])
    fa = jnp.maximum(fa, 0.0)
    fb = jnp.maximum(fb, 0.0)
    oa, ob = _cplx_mm(fa, fb, w2r_ref[...], w2i_ref[...], w2s_ref[...],
                      b2r_ref[...], b2i_ref[...])
    oa_ref[...] = (xa + oa).astype(oa_ref.dtype)
    ob_ref[...] = (xb + ob).astype(ob_ref.dtype)


def ln_ffn_call(xa, xb, ln_a, ln_b, fc1, fc2):
    M, E = xa.shape
    TM = _row_tile(M)
    row = pl.BlockSpec((TM, E), lambda i: (i, 0))
    args = (xa, xb, ln_a[0], ln_a[1], ln_b[0], ln_b[1],
            fc1["wr"], fc1["wi"], fc1["ws"], fc1["br"], fc1["bi"],
            fc2["wr"], fc2["wi"], fc2["ws"], fc2["br"], fc2["bi"])
    in_specs = [row, row] + [_full_spec(a) for a in args[2:]]
    return pl.pallas_call(
        _ln_ffn_kernel,
        out_shape=(jax.ShapeDtypeStruct((M, E), jnp.float32),) * 2,
        grid=(M // TM,),
        in_specs=in_specs,
        out_specs=(row, row),
        compiler_params=_PAR,
    )(*args)


# ------------------------------------------------------------------
# Kernel 5: output head (final LN + out_fc1 + ReLU + out_fc2 + out_fc3 + ReLU)
# ------------------------------------------------------------------
def _head_kernel(ha_ref, hb_ref, g_ref, b_ref,
                 w1a_ref, w1b_ref, b1_ref, w2_ref, b2_ref, w3_ref, b3_ref,
                 o_ref):
    la = _ln(ha_ref[...], g_ref[...], b_ref[...])
    lb = _ln(hb_ref[...], g_ref[...], b_ref[...])
    # concat([la, lb]) @ W1  ==  la @ W1[:E] + lb @ W1[E:]
    h1 = jnp.maximum(_mm(la, w1a_ref[...]) + _mm(lb, w1b_ref[...]) + b1_ref[...], 0.0)
    # TODO(synk): out_dropout omitted (eval mode).
    h2 = _mm(h1, w2_ref[...]) + b2_ref[...]
    out = jnp.maximum(_mm(h2, w3_ref[...]) + b3_ref[...], 0.0)
    o_ref[...] = out.astype(o_ref.dtype)


def head_call(ha_last, hb_last, hp):
    Nb = ha_last.shape[0]
    out_dim = hp["w3"].shape[1]
    args = (ha_last, hb_last, hp["ln_g"], hp["ln_b"],
            hp["w1a"], hp["w1b"], hp["b1"], hp["w2"], hp["b2"], hp["w3"], hp["b3"])
    return pl.pallas_call(
        _head_kernel,
        out_shape=jax.ShapeDtypeStruct((Nb, out_dim), jnp.float32),
        grid=(1,),
        in_specs=[_full_spec(a) for a in args],
        out_specs=pl.BlockSpec((Nb, out_dim), lambda i: (0, 0)),
        compiler_params=pltpu.CompilerParams(dimension_semantics=("arbitrary",)),
    )(*args)


# ------------------------------------------------------------------
# Parameter init (deterministic, PyTorch-Linear-style uniform bounds)
# ------------------------------------------------------------------
def init_linear(key, din, dout):
    kw, kb = jax.random.split(key)
    bound = 1.0 / np.sqrt(din)
    w = jax.random.uniform(kw, (din, dout), jnp.float32, -bound, bound)
    b = jax.random.uniform(kb, (dout,), jnp.float32, -bound, bound)
    return w, b


def init_complex_linear(key, din, dout):
    k1, k2 = jax.random.split(key)
    wr, br = init_linear(k1, din, dout)
    wi, bi = init_linear(k2, din, dout)
    return dict(wr=wr, wi=wi, br=br, bi=bi)


def init_params(key, orig_d, embed_dim, hidden_size, output_dim, n_layers):
    d_model = 512  # fixed in the PyTorch module: self.d_a, self.d_b = (512, 512)
    keys = jax.random.split(key, 6)
    params = {
        "fc_a": init_linear(keys[0], orig_d, d_model),
        "fc_b": init_linear(keys[1], orig_d, d_model),
        "proj": init_complex_linear(keys[2], d_model, embed_dim),
        "out_fc1": init_linear(keys[3], 2 * embed_dim, hidden_size),
        "out_fc2": init_linear(keys[4], hidden_size, output_dim),
        "out_fc3": init_linear(keys[5], output_dim, 1000),
    }
    enc = {"layers": [],
           "ln_f_g": jnp.ones(embed_dim, jnp.float32),
           "ln_f_b": jnp.zeros(embed_dim, jnp.float32)}
    for li in range(n_layers):
        lk = jax.random.split(jax.random.fold_in(key, 100 + li), 6)
        lyr = {
            "q": init_complex_linear(lk[0], embed_dim, embed_dim),
            "k": init_complex_linear(lk[1], embed_dim, embed_dim),
            "v": init_complex_linear(lk[2], embed_dim, embed_dim),
            "out": init_complex_linear(lk[3], embed_dim, embed_dim),
            "fc1": init_complex_linear(lk[4], embed_dim, 4 * embed_dim),
            "fc2": init_complex_linear(lk[5], 4 * embed_dim, embed_dim),
        }
        for name in ("ln0_a", "ln0_b", "ln1_a", "ln1_b"):
            lyr[name + "_g"] = jnp.ones(embed_dim, jnp.float32)
            lyr[name + "_b"] = jnp.zeros(embed_dim, jnp.float32)
        enc["layers"].append(lyr)
    params["enc"] = enc
    return params


def sinusoidal_pos_emb(L, dim):
    half = dim // 2
    freq = np.exp(np.arange(half) * -(np.log(10000.0) / max(half - 1, 1)))
    args = np.arange(L)[:, None] * freq[None, :]
    pe = np.concatenate([np.sin(args), np.cos(args)], axis=1)
    if dim % 2 == 1:
        pe = np.concatenate([pe, np.zeros((L, 1))], axis=1)
    return jnp.asarray(pe, dtype=jnp.float32)


def pack_params(params, *, seq_len, batch, embed_dim):
    """Precompute kernel-friendly params: bf16 weights, Wr+Wi sums, fused QKV, pos-emb rows."""
    E = embed_dim
    bf16 = jnp.bfloat16

    def lin(p):
        w, b = p
        return dict(w=w.astype(bf16), b=b.reshape(1, -1).astype(jnp.float32))

    def cplx(p):
        wr, wi = p["wr"], p["wi"]
        return dict(wr=wr.astype(bf16), wi=wi.astype(bf16), ws=(wr + wi).astype(bf16),
                    br=p["br"].reshape(1, -1), bi=p["bi"].reshape(1, -1))

    def cplx_cat(ps):  # fuse Q,K,V along the output dim
        wr = jnp.concatenate([p["wr"] for p in ps], axis=1)
        wi = jnp.concatenate([p["wi"] for p in ps], axis=1)
        br = jnp.concatenate([p["br"] for p in ps], axis=0)
        bi = jnp.concatenate([p["bi"] for p in ps], axis=0)
        return dict(wr=wr.astype(bf16), wi=wi.astype(bf16), ws=(wr + wi).astype(bf16),
                    br=br.reshape(1, -1), bi=bi.reshape(1, -1))

    def ln(g, b):
        return (g.reshape(1, -1), b.reshape(1, -1))

    pe_rows = jnp.tile(sinusoidal_pos_emb(seq_len, E), (batch, 1))  # row = n*L + l -> pe[l]

    fp = {
        "embed": dict(fc_a=lin(params["fc_a"]), fc_b=lin(params["fc_b"]),
                      proj=cplx(params["proj"]), pe=pe_rows),
        "layers": [],
        "head": dict(
            ln_g=params["enc"]["ln_f_g"].reshape(1, -1),
            ln_b=params["enc"]["ln_f_b"].reshape(1, -1),
            w1a=params["out_fc1"][0][:E].astype(bf16),
            w1b=params["out_fc1"][0][E:].astype(bf16),
            b1=params["out_fc1"][1].reshape(1, -1),
            w2=params["out_fc2"][0].astype(bf16),
            b2=params["out_fc2"][1].reshape(1, -1),
            w3=params["out_fc3"][0].astype(bf16),
            b3=params["out_fc3"][1].reshape(1, -1)),
    }
    for lyr in params["enc"]["layers"]:
        fp["layers"].append(dict(
            ln0_a=ln(lyr["ln0_a_g"], lyr["ln0_a_b"]),
            ln0_b=ln(lyr["ln0_b_g"], lyr["ln0_b_b"]),
            ln1_a=ln(lyr["ln1_a_g"], lyr["ln1_a_b"]),
            ln1_b=ln(lyr["ln1_b_g"], lyr["ln1_b_b"]),
            qkv=cplx_cat([lyr["q"], lyr["k"], lyr["v"]]),
            out=cplx(lyr["out"]),
            fc1=cplx(lyr["fc1"]),
            fc2=cplx(lyr["fc2"]),
        ))
    return fp


# ------------------------------------------------------------------
# Model forward
# ------------------------------------------------------------------
def transformer_forward(x, fp, *, embed_dim, num_heads):
    L, N, C = x.shape
    half = C // 2
    E = embed_dim
    M = N * L

    # batch-major rows (row = n*L + l) so attention blocks are pure BlockSpec windows.
    xt = jnp.transpose(x, (1, 0, 2))              # (N, L, C)
    xa = xt[:, :, :half].reshape(M, half)
    xb = xt[:, :, half:].reshape(M, half)

    pa, pb = embed_call(xa, xb, fp["embed"], embed_scale=float(np.sqrt(E)))

    for lyr in fp["layers"]:
        qkv_a, qkv_b = ln_qkv_call(pa, pb, lyr["ln0_a"], lyr["ln0_b"], lyr["qkv"])
        pa, pb = attn_block_call(qkv_a, qkv_b, pa, pb, lyr["out"],
                                 seq_len=L, batch=N, num_heads=num_heads)
        pa, pb = ln_ffn_call(pa, pb, lyr["ln1_a"], lyr["ln1_b"], lyr["fc1"], lyr["fc2"])

    # only the last time step feeds the output head (LayerNorm is per-row, so this is exact)
    ha_last = pa.reshape(N, L, E)[:, L - 1, :]
    hb_last = pb.reshape(N, L, E)[:, L - 1, :]
    return head_call(ha_last, hb_last, fp["head"])


if __name__ == "__main__":
    # Small, forward-consistent hyperparameters.
    time_step, batch = 8, 2
    orig_d = 16                         # input_dims = [16, 16] -> n_features = 32
    hidden_size = 32
    embed_dim = 32
    output_dim = 8
    num_heads = 4
    n_layers = 2

    params = init_params(jax.random.PRNGKey(42), orig_d, embed_dim,
                         hidden_size, output_dim, n_layers)
    fp = pack_params(params, seq_len=time_step, batch=batch, embed_dim=embed_dim)

    x = jax.random.normal(jax.random.PRNGKey(0),
                          (time_step, batch, 2 * orig_d), dtype=jnp.float32)

    fwd = jax.jit(functools.partial(transformer_forward,
                                    embed_dim=embed_dim, num_heads=num_heads))
    out = jax.block_until_ready(fwd(x, fp))
    assert out.shape == (batch, 1000)          # out_fc3 width fixed to 1000 in the module
    assert bool(jnp.all(jnp.isfinite(out)))
    print("KERNEL_OK")
</pallas_src>

<mosaic_0001>
module attributes {stable_mosaic.version = 11 : i64} {
  func.func @_embed_kernel(%arg0: i32, %arg1: memref<8x16xf32, #tpu.memory_space<vmem>>, %arg2: memref<8x16xf32, #tpu.memory_space<vmem>>, %arg3: memref<16x512xbf16, #tpu.memory_space<vmem>>, %arg4: memref<1x512xf32, #tpu.memory_space<vmem>>, %arg5: memref<16x512xbf16, #tpu.memory_space<vmem>>, %arg6: memref<1x512xf32, #tpu.memory_space<vmem>>, %arg7: memref<512x32xbf16, #tpu.memory_space<vmem>>, %arg8: memref<512x32xbf16, #tpu.memory_space<vmem>>, %arg9: memref<512x32xbf16, #tpu.memory_space<vmem>>, %arg10: memref<1x32xf32, #tpu.memory_space<vmem>>, %arg11: memref<1x32xf32, #tpu.memory_space<vmem>>, %arg12: memref<8x32xf32, #tpu.memory_space<vmem>>, %arg13: memref<8x32xf32, #tpu.memory_space<vmem>>, %arg14: memref<8x32xf32, #tpu.memory_space<vmem>>) attributes {dimension_semantics = [#tpu.dimension_semantics<parallel>], iteration_bounds = array<i64: 2>, scalar_prefetch = 0 : i64, scratch_operands = 0 : i64, tpu.core_type = #tpu.core_type<tc>, window_params = [{transform_indices = @transform_0, window_bounds = array<i64: 8, 16>}, {transform_indices = @transform_1, window_bounds = array<i64: 8, 16>}, {pipeline_mode = #tpu.pipeline_mode<synchronous>, transform_indices = @transform_2, window_bounds = array<i64: 16, 512>}, {pipeline_mode = #tpu.pipeline_mode<synchronous>, transform_indices = @transform_3, window_bounds = array<i64: 1, 512>}, {pipeline_mode = #tpu.pipeline_mode<synchronous>, transform_indices = @transform_4, window_bounds = array<i64: 16, 512>}, {pipeline_mode = #tpu.pipeline_mode<synchronous>, transform_indices = @transform_5, window_bounds = array<i64: 1, 512>}, {pipeline_mode = #tpu.pipeline_mode<synchronous>, transform_indices = @transform_6, window_bounds = array<i64: 512, 32>}, {pipeline_mode = #tpu.pipeline_mode<synchronous>, transform_indices = @transform_7, window_bounds = array<i64: 512, 32>}, {pipeline_mode = #tpu.pipeline_mode<synchronous>, transform_indices = @transform_8, window_bounds = array<i64: 512, 32>}, {pipeline_mode = #tpu.pipeline_mode<synchronous>, transform_indices = @transform_9, window_bounds = array<i64: 1, 32>}, {pipeline_mode = #tpu.pipeline_mode<synchronous>, transform_indices = @transform_10, window_bounds = array<i64: 1, 32>}, {transform_indices = @transform_11, window_bounds = array<i64: 8, 32>}, {transform_indices = @transform_12, window_bounds = array<i64: 8, 32>}, {transform_indices = @transform_13, window_bounds = array<i64: 8, 32>}]} {
    %c0 = arith.constant 0 : index
    %c0_0 = arith.constant 0 : index
    %0 = vector.load %arg1[%c0, %c0_0] : memref<8x16xf32, #tpu.memory_space<vmem>>, vector<8x16xf32>
    %c0_1 = arith.constant 0 : index
    %c0_2 = arith.constant 0 : index
    %1 = vector.load %arg3[%c0_1, %c0_2] : memref<16x512xbf16, #tpu.memory_space<vmem>>, vector<16x512xbf16>
    %2 = arith.truncf %0 : vector<8x16xf32> to vector<8x16xbf16>
    %cst = arith.constant dense<0.000000e+00> : vector<8x512xf32>
    %3 = tpu.matmul %2, %1, %cst {dimension_numbers = #tpu.dot_dimension_numbers<[1], [0], [0], [1], [0, 0, 1, 1], [], []>} : vector<8x16xbf16>, vector<16x512xbf16>, vector<8x512xf32> -> vector<8x512xf32>
    %c0_3 = arith.constant 0 : index
    %c0_4 = arith.constant 0 : index
    %4 = vector.load %arg4[%c0_3, %c0_4] : memref<1x512xf32, #tpu.memory_space<vmem>>, vector<1x512xf32>
    %5 = vector.broadcast %4 : vector<1x512xf32> to vector<8x512xf32>
    %6 = arith.addf %3, %5 : vector<8x512xf32>
    %c0_5 = arith.constant 0 : index
    %c0_6 = arith.constant 0 : index
    %7 = vector.load %arg2[%c0_5, %c0_6] : memref<8x16xf32, #tpu.memory_space<vmem>>, vector<8x16xf32>
    %c0_7 = arith.constant 0 : index
    %c0_8 = arith.constant 0 : index
    %8 = vector.load %arg5[%c0_7, %c0_8] : memref<16x512xbf16, #tpu.memory_space<vmem>>, vector<16x512xbf16>
    %9 = arith.truncf %7 : vector<8x16xf32> to vector<8x16xbf16>
    %cst_9 = arith.constant dense<0.000000e+00> : vector<8x512xf32>
    %10 = tpu.matmul %9, %8, %cst_9 {dimension_numbers = #tpu.dot_dimension_numbers<[1], [0], [0], [1], [0, 0, 1, 1], [], []>} : vector<8x16xbf16>, vector<16x512xbf16>, vector<8x512xf32> -> vector<8x512xf32>
    %c0_10 = arith.constant 0 : index
    %c0_11 = arith.constant 0 : index
    %11 = vector.load %arg6[%c0_10, %c0_11] : memref<1x512xf32, #tpu.memory_space<vmem>>, vector<1x512xf32>
    %12 = vector.broadcast %11 : vector<1x512xf32> to vector<8x512xf32>
    %13 = arith.addf %10, %12 : vector<8x512xf32>
    %c0_12 = arith.constant 0 : index
    %c0_13 = arith.constant 0 : index
    %14 = vector.load %arg7[%c0_12, %c0_13] : memref<512x32xbf16, #tpu.memory_space<vmem>>, vector<512x32xbf16>
    %c0_14 = arith.constant 0 : index
    %c0_15 = arith.constant 0 : index
    %15 = vector.load %arg8[%c0_14, %c0_15] : memref<512x32xbf16, #tpu.memory_space<vmem>>, vector<512x32xbf16>
    %c0_16 = arith.constant 0 : index
    %c0_17 = arith.constant 0 : index
    %16 = vector.load %arg9[%c0_16, %c0_17] : memref<512x32xbf16, #tpu.memory_space<vmem>>, vector<512x32xbf16>
    %c0_18 = arith.constant 0 : index
    %c0_19 = arith.constant 0 : index
    %17 = vector.load %arg10[%c0_18, %c0_19] : memref<1x32xf32, #tpu.memory_space<vmem>>, vector<1x32xf32>
    %c0_20 = arith.constant 0 : index
    %c0_21 = arith.constant 0 : index
    %18 = vector.load %arg11[%c0_20, %c0_21] : memref<1x32xf32, #tpu.memory_space<vmem>>, vector<1x32xf32>
    %19 = arith.truncf %6 : vector<8x512xf32> to vector<8x512xbf16>
    %cst_22 = arith.constant dense<0.000000e+00> : vector<8x32xf32>
    %20 = tpu.matmul %19, %14, %cst_22 {dimension_numbers = #tpu.dot_dimension_numbers<[1], [0], [0], [1], [0, 0, 1, 1], [], []>} : vector<8x512xbf16>, vector<512x32xbf16>, vector<8x32xf32> -> vector<8x32xf32>
    %21 = arith.truncf %13 : vector<8x512xf32> to vector<8x512xbf16>
    %cst_23 = arith.constant dense<0.000000e+00> : vector<8x32xf32>
    %22 = tpu.matmul %21, %15, %cst_23 {dimension_numbers = #tpu.dot_dimension_numbers<[1], [0], [0], [1], [0, 0, 1, 1], [], []>} : vector<8x512xbf16>, vector<512x32xbf16>, vector<8x32xf32> -> vector<8x32xf32>
    %23 = arith.addf %6, %13 : vector<8x512xf32>
    %24 = arith.truncf %23 : vector<8x512xf32> to vector<8x512xbf16>
    %cst_24 = arith.constant dense<0.000000e+00> : vector<8x32xf32>
    %25 = tpu.matmul %24, %16, %cst_24 {dimension_numbers = #tpu.dot_dimension_numbers<[1], [0], [0], [1], [0, 0, 1, 1], [], []>} : vector<8x512xbf16>, vector<512x32xbf16>, vector<8x32xf32> -> vector<8x32xf32>
    %26 = arith.subf %20, %22 : vector<8x32xf32>
    %27 = arith.subf %17, %18 : vector<1x32xf32>
    %28 = vector.broadcast %27 : vector<1x32xf32> to vector<8x32xf32>
    %29 = arith.addf %26, %28 : vector<8x32xf32>
    %30 = arith.subf %25, %20 : vector<8x32xf32>
    %31 = arith.subf %30, %22 : vector<8x32xf32>
    %32 = arith.addf %17, %18 : vector<1x32xf32>
    %33 = vector.broadcast %32 : vector<1x32xf32> to vector<8x32xf32>
    %34 = arith.addf %31, %33 : vector<8x32xf32>
    %cst_25 = arith.constant 5.65685415 : f32
    %35 = vector.broadcast %cst_25 : f32 to vector<8x32xf32>
    %36 = arith.mulf %29, %35 : vector<8x32xf32>
    %c0_26 = arith.constant 0 : index
    %c0_27 = arith.constant 0 : index
    %37 = vector.load %arg12[%c0_26, %c0_27] : memref<8x32xf32, #tpu.memory_space<vmem>>, vector<8x32xf32>
    %38 = arith.addf %36, %37 : vector<8x32xf32>
    %c0_28 = arith.constant 0 : index
    %c0_29 = arith.constant 0 : index
    %39 = vector.load %arg13[%c0_28, %c0_29] : memref<8x32xf32, #tpu.memory_space<vmem>>, vector<8x32xf32>
    tpu.vector_store %arg13[%c0_28, %c0_29], %38 {strides = array<i32>} : memref<8x32xf32, #tpu.memory_space<vmem>>, vector<8x32xf32>,
    %cst_30 = arith.constant 5.65685415 : f32
    %40 = vector.broadcast %cst_30 : f32 to vector<8x32xf32>
    %41 = arith.mulf %34, %40 : vector<8x32xf32>
    %c0_31 = arith.constant 0 : index
    %c0_32 = arith.constant 0 : index
    %42 = vector.load %arg12[%c0_31, %c0_32] : memref<8x32xf32, #tpu.memory_space<vmem>>, vector<8x32xf32>
    %43 = arith.addf %41, %42 : vector<8x32xf32>
    %c0_33 = arith.constant 0 : index
    %c0_34 = arith.constant 0 : index
    %44 = vector.load %arg14[%c0_33, %c0_34] : memref<8x32xf32, #tpu.memory_space<vmem>>, vector<8x32xf32>
    tpu.vector_store %arg14[%c0_33, %c0_34], %43 {strides = array<i32>} : memref<8x32xf32, #tpu.memory_space<vmem>>, vector<8x32xf32>,
    return
  }
  func.func @transform_0(%arg0: i32) -> (i32, i32) {
    %c0_i32 = arith.constant 0 : i32
    %c0_i32_0 = arith.constant 0 : i32
    return %arg0, %c0_i32 : i32, i32
  }
  func.func @transform_1(%arg0: i32) -> (i32, i32) {
    %c0_i32 = arith.constant 0 : i32
    %c0_i32_0 = arith.constant 0 : i32
    return %arg0, %c0_i32 : i32, i32
  }
  func.func @transform_2(%arg0: i32) -> (i32, i32) {
    %c0_i32 = arith.constant 0 : i32
    %c0_i32_0 = arith.constant 0 : i32
    %c0_i32_1 = arith.constant 0 : i32
    return %c0_i32, %c0_i32_0 : i32, i32
  }
  func.func @transform_3(%arg0: i32) -> (i32, i32) {
    %c0_i32 = arith.constant 0 : i32
    %c0_i32_0 = arith.constant 0 : i32
    %c0_i32_1 = arith.constant 0 : i32
    return %c0_i32, %c0_i32_0 : i32, i32
  }
  func.func @transform_4(%arg0: i32) -> (i32, i32) {
    %c0_i32 = arith.constant 0 : i32
    %c0_i32_0 = arith.constant 0 : i32
    %c0_i32_1 = arith.constant 0 : i32
    return %c0_i32, %c0_i32_0 : i32, i32
  }
  func.func @transform_5(%arg0: i32) -> (i32, i32) {
    %c0_i32 = arith.constant 0 : i32
    %c0_i32_0 = arith.constant 0 : i32
    %c0_i32_1 = arith.constant 0 : i32
    return %c0_i32, %c0_i32_0 : i32, i32
  }
  func.func @transform_6(%arg0: i32) -> (i32, i32) {
    %c0_i32 = arith.constant 0 : i32
    %c0_i32_0 = arith.constant 0 : i32
    %c0_i32_1 = arith.constant 0 : i32
    return %c0_i32, %c0_i32_0 : i32, i32
  }
  func.func @transform_7(%arg0: i32) -> (i32, i32) {
    %c0_i32 = arith.constant 0 : i32
    %c0_i32_0 = arith.constant 0 : i32
    %c0_i32_1 = arith.constant 0 : i32
    return %c0_i32, %c0_i32_0 : i32, i32
  }
  func.func @transform_8(%arg0: i32) -> (i32, i32) {
    %c0_i32 = arith.constant 0 : i32
    %c0_i32_0 = arith.constant 0 : i32
    %c0_i32_1 = arith.constant 0 : i32
    return %c0_i32, %c0_i32_0 : i32, i32
  }
  func.func @transform_9(%arg0: i32) -> (i32, i32) {
    %c0_i32 = arith.constant 0 : i32
    %c0_i32_0 = arith.constant 0 : i32
    %c0_i32_1 = arith.constant 0 : i32
    return %c0_i32, %c0_i32_0 : i32, i32
  }
  func.func @transform_10(%arg0: i32) -> (i32, i32) {
    %c0_i32 = arith.constant 0 : i32
    %c0_i32_0 = arith.constant 0 : i32
    %c0_i32_1 = arith.constant 0 : i32
    return %c0_i32, %c0_i32_0 : i32, i32
  }
  func.func @transform_11(%arg0: i32) -> (i32, i32) {
    %c0_i32 = arith.constant 0 : i32
    %c0_i32_0 = arith.constant 0 : i32
    return %arg0, %c0_i32 : i32, i32
  }
  func.func @transform_12(%arg0: i32) -> (i32, i32) {
    %c0_i32 = arith.constant 0 : i32
    %c0_i32_0 = arith.constant 0 : i32
    return %arg0, %c0_i32 : i32, i32
  }
  func.func @transform_13(%arg0: i32) -> (i32, i32) {
    %c0_i32 = arith.constant 0 : i32
    %c0_i32_0 = arith.constant 0 : i32
    return %arg0, %c0_i32 : i32, i32
  }
}

module attributes {stable_mosaic.version = 11 : i64} {
  func.func @_ln_qkv_kernel(%arg0: i32, %arg1: memref<8x32xf32, #tpu.memory_space<vmem>>, %arg2: memref<8x32xf32, #tpu.memory_space<vmem>>, %arg3: memref<1x32xf32, #tpu.memory_space<vmem>>, %arg4: memref<1x32xf32, #tpu.memory_space<vmem>>, %arg5: memref<1x32xf32, #tpu.memory_space<vmem>>, %arg6: memref<1x32xf32, #tpu.memory_space<vmem>>, %arg7: memref<32x96xbf16, #tpu.memory_space<vmem>>, %arg8: memref<32x96xbf16, #tpu.memory_space<vmem>>, %arg9: memref<32x96xbf16, #tpu.memory_space<vmem>>, %arg10: memref<1x96xf32, #tpu.memory_space<vmem>>, %arg11: memref<1x96xf32, #tpu.memory_space<vmem>>, %arg12: memref<8x96xf32, #tpu.memory_space<vmem>>, %arg13: memref<8x96xf32, #tpu.memory_space<vmem>>) attributes {dimension_semantics = [#tpu.dimension_semantics<parallel>], iteration_bounds = array<i64: 2>, scalar_prefetch = 0 : i64, scratch_operands = 0 : i64, tpu.core_type = #tpu.core_type<tc>, window_params = [{transform_indices = @transform_0, window_bounds = array<i64: 8, 32>}, {transform_indices = @transform_1, window_bounds = array<i64: 8, 32>}, {pipeline_mode = #tpu.pipeline_mode<synchronous>, transform_indices = @transform_2, window_bounds = array<i64: 1, 32>}, {pipeline_mode = #tpu.pipeline_mode<synchronous>, transform_indices = @transform_3, window_bounds = array<i64: 1, 32>}, {pipeline_mode = #tpu.pipeline_mode<synchronous>, transform_indices = @transform_4, window_bounds = array<i64: 1, 32>}, {pipeline_mode = #tpu.pipeline_mode<synchronous>, transform_indices = @transform_5, window_bounds = array<i64: 1, 32>}, {pipeline_mode = #tpu.pipeline_mode<synchronous>, transform_indices = @transform_6, window_bounds = array<i64: 32, 96>}, {pipeline_mode = #tpu.pipeline_mode<synchronous>, transform_indices = @transform_7, window_bounds = array<i64: 32, 96>}, {pipeline_mode = #tpu.pipeline_mode<synchronous>, transform_indices = @transform_8, window_bounds = array<i64: 32, 96>}, {pipeline_mode = #tpu.pipeline_mode<synchronous>, transform_indices = @transform_9, window_bounds = array<i64: 1, 96>}, {pipeline_mode = #tpu.pipeline_mode<synchronous>, transform_indices = @transform_10, window_bounds = array<i64: 1, 96>}, {transform_indices = @transform_11, window_bounds = array<i64: 8, 96>}, {transform_indices = @transform_12, window_bounds = array<i64: 8, 96>}]} {
    %c0 = arith.constant 0 : index
    %c0_0 = arith.constant 0 : index
    %0 = vector.load %arg1[%c0, %c0_0] : memref<8x32xf32, #tpu.memory_space<vmem>>, vector<8x32xf32>
    %c0_1 = arith.constant 0 : index
    %c0_2 = arith.constant 0 : index
    %1 = vector.load %arg3[%c0_1, %c0_2] : memref<1x32xf32, #tpu.memory_space<vmem>>, vector<1x32xf32>
    %c0_3 = arith.constant 0 : index
    %c0_4 = arith.constant 0 : index
    %2 = vector.load %arg4[%c0_3, %c0_4] : memref<1x32xf32, #tpu.memory_space<vmem>>, vector<1x32xf32>
    %cst = arith.constant dense<0.000000e+00> : vector<8xf32>
    %3 = vector.multi_reduction <add>, %0, %cst [1] : vector<8x32xf32> to vector<8xf32>
    %4 = vector.shape_cast %3 : vector<8xf32> to vector<8x1xf32>
    %cst_5 = arith.constant 3.200000e+01 : f32
    %5 = vector.broadcast %cst_5 : f32 to vector<8x1xf32>
    %6 = arith.divf %4, %5 : vector<8x1xf32>
    %7 = vector.broadcast %6 : vector<8x1xf32> to vector<8x32xf32>
    %8 = arith.subf %0, %7 : vector<8x32xf32>
    %9 = arith.mulf %8, %8 : vector<8x32xf32>
    %cst_6 = arith.constant dense<0.000000e+00> : vector<8xf32>
    %10 = vector.multi_reduction <add>, %9, %cst_6 [1] : vector<8x32xf32> to vector<8xf32>
    %11 = vector.shape_cast %10 : vector<8xf32> to vector<8x1xf32>
    %cst_7 = arith.constant 3.200000e+01 : f32
    %12 = vector.broadcast %cst_7 : f32 to vector<8x1xf32>
    %13 = arith.divf %11, %12 : vector<8x1xf32>
    %14 = vector.broadcast %6 : vector<8x1xf32> to vector<8x32xf32>
    %15 = arith.subf %0, %14 : vector<8x32xf32>
    %cst_8 = arith.constant 9.99999974E-6 : f32
    %16 = vector.broadcast %cst_8 : f32 to vector<8x1xf32>
    %17 = arith.addf %13, %16 : vector<8x1xf32>
    %18 = math.rsqrt %17 : vector<8x1xf32>
    %19 = vector.broadcast %18 : vector<8x1xf32> to vector<8x32xf32>
    %20 = arith.mulf %15, %19 : vector<8x32xf32>
    %21 = vector.broadcast %1 : vector<1x32xf32> to vector<8x32xf32>
    %22 = arith.mulf %20, %21 : vector<8x32xf32>
    %23 = vector.broadcast %2 : vector<1x32xf32> to vector<8x32xf32>
    %24 = arith.addf %22, %23 : vector<8x32xf32>
    %c0_9 = arith.constant 0 : index
    %c0_10 = arith.constant 0 : index
    %25 = vector.load %arg2[%c0_9, %c0_10] : memref<8x32xf32, #tpu.memory_space<vmem>>, vector<8x32xf32>
    %c0_11 = arith.constant 0 : index
    %c0_12 = arith.constant 0 : index
    %26 = vector.load %arg5[%c0_11, %c0_12] : memref<1x32xf32, #tpu.memory_space<vmem>>, vector<1x32xf32>
    %c0_13 = arith.constant 0 : index
    %c0_14 = arith.constant 0 : index
    %27 = vector.load %arg6[%c0_13, %c0_14] : memref<1x32xf32, #tpu.memory_space<vmem>>, vector<1x32xf32>
    %cst_15 = arith.constant dense<0.000000e+00> : vector<8xf32>
    %28 = vector.multi_reduction <add>, %25, %cst_15 [1] : vector<8x32xf32> to vector<8xf32>
    %29 = vector.shape_cast %28 : vector<8xf32> to vector<8x1xf32>
    %cst_16 = arith.constant 3.200000e+01 : f32
    %30 = vector.broadcast %cst_16 : f32 to vector<8x1xf32>
    %31 = arith.divf %29, %30 : vector<8x1xf32>
    %32 = vector.broadcast %31 : vector<8x1xf32> to vector<8x32xf32>
    %33 = arith.subf %25, %32 : vector<8x32xf32>
    %34 = arith.mulf %33, %33 : vector<8x32xf32>
    %cst_17 = arith.constant dense<0.000000e+00> : vector<8xf32>
    %35 = vector.multi_reduction <add>, %34, %cst_17 [1] : vector<8x32xf32> to vector<8xf32>
    %36 = vector.shape_cast %35 : vector<8xf32> to vector<8x1xf32>
    %cst_18 = arith.constant 3.200000e+01 : f32
    %37 = vector.broadcast %cst_18 : f32 to vector<8x1xf32>
    %38 = arith.divf %36, %37 : vector<8x1xf32>
    %39 = vector.broadcast %31 : vector<8x1xf32> to vector<8x32xf32>
    %40 = arith.subf %25, %39 : vector<8x32xf32>
    %cst_19 = arith.constant 9.99999974E-6 : f32
    %41 = vector.broadcast %cst_19 : f32 to vector<8x1xf32>
    %42 = arith.addf %38, %41 : vector<8x1xf32>
    %43 = math.rsqrt %42 : vector<8x1xf32>
    %44 = vector.broadcast %43 : vector<8x1xf32> to vector<8x32xf32>
    %45 = arith.mulf %40, %44 : vector<8x32xf32>
    %46 = vector.broadcast %26 : vector<1x32xf32> to vector<8x32xf32>
    %47 = arith.mulf %45, %46 : vector<8x32xf32>
    %48 = vector.broadcast %27 : vector<1x32xf32> to vector<8x32xf32>
    %49 = arith.addf %47, %48 : vector<8x32xf32>
    %c0_20 = arith.constant 0 : index
    %c0_21 = arith.constant 0 : index
    %50 = vector.load %arg7[%c0_20, %c0_21] : memref<32x96xbf16, #tpu.memory_space<vmem>>, vector<32x96xbf16>
    %c0_22 = arith.constant 0 : index
    %c0_23 = arith.constant 0 : index
    %51 = vector.load %arg8[%c0_22, %c0_23] : memref<32x96xbf16, #tpu.memory_space<vmem>>, vector<32x96xbf16>
    %c0_24 = arith.constant 0 : index
    %c0_25 = arith.constant 0 : index
    %52 = vector.load %arg9[%c0_24, %c0_25] : memref<32x96xbf16, #tpu.memory_space<vmem>>, vector<32x96xbf16>
    %c0_26 = arith.constant 0 : index
    %c0_27 = arith.constant 0 : index
    %53 = vector.load %arg10[%c0_26, %c0_27] : memref<1x96xf32, #tpu.memory_space<vmem>>, vector<1x96xf32>
    %c0_28 = arith.constant 0 : index
    %c0_29 = arith.constant 0 : index
    %54 = vector.load %arg11[%c0_28, %c0_29] : memref<1x96xf32, #tpu.memory_space<vmem>>, vector<1x96xf32>
    %55 = arith.truncf %24 : vector<8x32xf32> to vector<8x32xbf16>
    %cst_30 = arith.constant dense<0.000000e+00> : vector<8x96xf32>
    %56 = tpu.matmul %55, %50, %cst_30 {dimension_numbers = #tpu.dot_dimension_numbers<[1], [0], [0], [1], [0, 0, 1, 1], [], []>} : vector<8x32xbf16>, vector<32x96xbf16>, vector<8x96xf32> -> vector<8x96xf32>
    %57 = arith.truncf %49 : vector<8x32xf32> to vector<8x32xbf16>
    %cst_31 = arith.constant dense<0.000000e+00> : vector<8x96xf32>
    %58 = tpu.matmul %57, %51, %cst_31 {dimension_numbers = #tpu.dot_dimension_numbers<[1], [0], [0], [1], [0, 0, 1, 1], [], []>} : vector<8x32xbf16>, vector<32x96xbf16>, vector<8x96xf32> -> vector<8x96xf32>
    %59 = arith.addf %24, %49 : vector<8x32xf32>
    %60 = arith.truncf %59 : vector<8x32xf32> to vector<8x32xbf16>
    %cst_32 = arith.constant dense<0.000000e+00> : vector<8x96xf32>
    %61 = tpu.matmul %60, %52, %cst_32 {dimension_numbers = #tpu.dot_dimension_numbers<[1], [0], [0], [1], [0, 0, 1, 1], [], []>} : vector<8x32xbf16>, vector<32x96xbf16>, vector<8x96xf32> -> vector<8x96xf32>
    %62 = arith.subf %56, %58 : vector<8x96xf32>
    %63 = arith.subf %53, %54 : vector<1x96xf32>
    %64 = vector.broadcast %63 : vector<1x96xf32> to vector<8x96xf32>
    %65 = arith.addf %62, %64 : vector<8x96xf32>
    %66 = arith.subf %61, %56 : vector<8x96xf32>
    %67 = arith.subf %66, %58 : vector<8x96xf32>
    %68 = arith.addf %53, %54 : vector<1x96xf32>
    %69 = vector.broadcast %68 : vector<1x96xf32> to vector<8x96xf32>
    %70 = arith.addf %67, %69 : vector<8x96xf32>
    %c0_33 = arith.constant 0 : index
    %c0_34 = arith.constant 0 : index
    %71 = vector.load %arg12[%c0_33, %c0_34] : memref<8x96xf32, #tpu.memory_space<vmem>>, vector<8x96xf32>
    tpu.vector_store %arg12[%c0_33, %c0_34], %65 {strides = array<i32>} : memref<8x96xf32, #tpu.memory_space<vmem>>, vector<8x96xf32>,
    %c0_35 = arith.constant 0 : index
    %c0_36 = arith.constant 0 : index
    %72 = vector.load %arg13[%c0_35, %c0_36] : memref<8x96xf32, #tpu.memory_space<vmem>>, vector<8x96xf32>
    tpu.vector_store %arg13[%c0_35, %c0_36], %70 {strides = array<i32>} : memref<8x96xf32, #tpu.memory_space<vmem>>, vector<8x96xf32>,
    return
  }
  func.func @transform_0(%arg0: i32) -> (i32, i32) {
    %c0_i32 = arith.constant 0 : i32
    %c0_i32_0 = arith.constant 0 : i32
    return %arg0, %c0_i32 : i32, i32
  }
  func.func @transform_1(%arg0: i32) -> (i32, i32) {
    %c0_i32 = arith.constant 0 : i32
    %c0_i32_0 = arith.constant 0 : i32
    return %arg0, %c0_i32 : i32, i32
  }
  func.func @transform_2(%arg0: i32) -> (i32, i32) {
    %c0_i32 = arith.constant 0 : i32
    %c0_i32_0 = arith.constant 0 : i32
    %c0_i32_1 = arith.constant 0 : i32
    return %c0_i32, %c0_i32_0 : i32, i32
  }
  func.func @transform_3(%arg0: i32) -> (i32, i32) {
    %c0_i32 = arith.constant 0 : i32
    %c0_i32_0 = arith.constant 0 : i32
    %c0_i32_1 = arith.constant 0 : i32
    return %c0_i32, %c0_i32_0 : i32, i32
  }
  func.func @transform_4(%arg0: i32) -> (i32, i32) {
    %c0_i32 = arith.constant 0 : i32
    %c0_i32_0 = arith.constant 0 : i32
    %c0_i32_1 = arith.constant 0 : i32
    return %c0_i32, %c0_i32_0 : i32, i32
  }
  func.func @transform_5(%arg0: i32) -> (i32, i32) {
    %c0_i32 = arith.constant 0 : i32
    %c0_i32_0 = arith.constant 0 : i32
    %c0_i32_1 = arith.constant 0 : i32
    return %c0_i32, %c0_i32_0 : i32, i32
  }
  func.func @transform_6(%arg0: i32) -> (i32, i32) {
    %c0_i32 = arith.constant 0 : i32
    %c0_i32_0 = arith.constant 0 : i32
    %c0_i32_1 = arith.constant 0 : i32
    return %c0_i32, %c0_i32_0 : i32, i32
  }
  func.func @transform_7(%arg0: i32) -> (i32, i32) {
    %c0_i32 = arith.constant 0 : i32
    %c0_i32_0 = arith.constant 0 : i32
    %c0_i32_1 = arith.constant 0 : i32
    return %c0_i32, %c0_i32_0 : i32, i32
  }
  func.func @transform_8(%arg0: i32) -> (i32, i32) {
    %c0_i32 = arith.constant 0 : i32
    %c0_i32_0 = arith.constant 0 : i32
    %c0_i32_1 = arith.constant 0 : i32
    return %c0_i32, %c0_i32_0 : i32, i32
  }
  func.func @transform_9(%arg0: i32) -> (i32, i32) {
    %c0_i32 = arith.constant 0 : i32
    %c0_i32_0 = arith.constant 0 : i32
    %c0_i32_1 = arith.constant 0 : i32
    return %c0_i32, %c0_i32_0 : i32, i32
  }
  func.func @transform_10(%arg0: i32) -> (i32, i32) {
    %c0_i32 = arith.constant 0 : i32
    %c0_i32_0 = arith.constant 0 : i32
    %c0_i32_1 = arith.constant 0 : i32
    return %c0_i32, %c0_i32_0 : i32, i32
  }
  func.func @transform_11(%arg0: i32) -> (i32, i32) {
    %c0_i32 = arith.constant 0 : i32
    %c0_i32_0 = arith.constant 0 : i32
    return %arg0, %c0_i32 : i32, i32
  }
  func.func @transform_12(%arg0: i32) -> (i32, i32) {
    %c0_i32 = arith.constant 0 : i32
    %c0_i32_0 = arith.constant 0 : i32
    return %arg0, %c0_i32 : i32, i32
  }
}

module attributes {stable_mosaic.version = 11 : i64} {
  func.func @_attn_block_kernel(%arg0: i32, %arg1: memref<1x8x96xf32, #tpu.memory_space<vmem>>, %arg2: memref<1x8x96xf32, #tpu.memory_space<vmem>>, %arg3: memref<1x8x32xf32, #tpu.memory_space<vmem>>, %arg4: memref<1x8x32xf32, #tpu.memory_space<vmem>>, %arg5: memref<32x32xbf16, #tpu.memory_space<vmem>>, %arg6: memref<32x32xbf16, #tpu.memory_space<vmem>>, %arg7: memref<32x32xbf16, #tpu.memory_space<vmem>>, %arg8: memref<1x32xf32, #tpu.memory_space<vmem>>, %arg9: memref<1x32xf32, #tpu.memory_space<vmem>>, %arg10: memref<1x8x32xf32, #tpu.memory_space<vmem>>, %arg11: memref<1x8x32xf32, #tpu.memory_space<vmem>>) attributes {dimension_semantics = [#tpu.dimension_semantics<parallel>], iteration_bounds = array<i64: 2>, scalar_prefetch = 0 : i64, scratch_operands = 0 : i64, tpu.core_type = #tpu.core_type<tc>, window_params = [{transform_indices = @transform_0, window_bounds = array<i64: 1, 8, 96>}, {transform_indices = @transform_1, window_bounds = array<i64: 1, 8, 96>}, {transform_indices = @transform_2, window_bounds = array<i64: 1, 8, 32>}, {transform_indices = @transform_3, window_bounds = array<i64: 1, 8, 32>}, {pipeline_mode = #tpu.pipeline_mode<synchronous>, transform_indices = @transform_4, window_bounds = array<i64: 32, 32>}, {pipeline_mode = #tpu.pipeline_mode<synchronous>, transform_indices = @transform_5, window_bounds = array<i64: 32, 32>}, {pipeline_mode = #tpu.pipeline_mode<synchronous>, transform_indices = @transform_6, window_bounds = array<i64: 32, 32>}, {pipeline_mode = #tpu.pipeline_mode<synchronous>, transform_indices = @transform_7, window_bounds = array<i64: 1, 32>}, {pipeline_mode = #tpu.pipeline_mode<synchronous>, transform_indices = @transform_8, window_bounds = array<i64: 1, 32>}, {transform_indices = @transform_9, window_bounds = array<i64: 1, 8, 32>}, {transform_indices = @transform_10, window_bounds = array<i64: 1, 8, 32>}]} {
    %c0 = arith.constant 0 : index
    %c0_0 = arith.constant 0 : index
    %c0_1 = arith.constant 0 : index
    %0 = vector.load %arg1[%c0, %c0_0, %c0_1] : memref<1x8x96xf32, #tpu.memory_space<vmem>>, vector<1x8x96xf32>
    %1 = vector.shape_cast %0 : vector<1x8x96xf32> to vector<8x96xf32>
    %c0_2 = arith.constant 0 : index
    %c0_3 = arith.constant 0 : index
    %c0_4 = arith.constant 0 : index
    %2 = vector.load %arg2[%c0_2, %c0_3, %c0_4] : memref<1x8x96xf32, #tpu.memory_space<vmem>>, vector<1x8x96xf32>
    %3 = vector.shape_cast %2 : vector<1x8x96xf32> to vector<8x96xf32>
    %4 = vector.extract_strided_slice %1 {offsets = [0, 0], sizes = [8, 32], strides = [1, 1]} : vector<8x96xf32> to vector<8x32xf32>
    %5 = vector.extract_strided_slice %1 {offsets = [0, 32], sizes = [8, 32], strides = [1, 1]} : vector<8x96xf32> to vector<8x32xf32>
    %6 = vector.extract_strided_slice %1 {offsets = [0, 64], sizes = [8, 32], strides = [1, 1]} : vector<8x96xf32> to vector<8x32xf32>
    %7 = vector.extract_strided_slice %3 {offsets = [0, 0], sizes = [8, 32], strides = [1, 1]} : vector<8x96xf32> to vector<8x32xf32>
    %8 = vector.extract_strided_slice %3 {offsets = [0, 32], sizes = [8, 32], strides = [1, 1]} : vector<8x96xf32> to vector<8x32xf32>
    %9 = vector.extract_strided_slice %3 {offsets = [0, 64], sizes = [8, 32], strides = [1, 1]} : vector<8x96xf32> to vector<8x32xf32>
    %10 = vector.extract_strided_slice %4 {offsets = [0, 0], sizes = [8, 8], strides = [1, 1]} : vector<8x32xf32> to vector<8x8xf32>
    %11 = vector.extract_strided_slice %7 {offsets = [0, 0], sizes = [8, 8], strides = [1, 1]} : vector<8x32xf32> to vector<8x8xf32>
    %12 = tpu.concatenate %10, %11 in 0 : vector<8x8xf32>, vector<8x8xf32> -> vector<16x8xf32>
    %cst = arith.constant 0.353553385 : f32
    %13 = vector.broadcast %cst : f32 to vector<16x8xf32>
    %14 = arith.mulf %12, %13 : vector<16x8xf32>
    %15 = vector.extract_strided_slice %5 {offsets = [0, 0], sizes = [8, 8], strides = [1, 1]} : vector<8x32xf32> to vector<8x8xf32>
    %16 = vector.extract_strided_slice %8 {offsets = [0, 0], sizes = [8, 8], strides = [1, 1]} : vector<8x32xf32> to vector<8x8xf32>
    %17 = tpu.concatenate %15, %16 in 0 : vector<8x8xf32>, vector<8x8xf32> -> vector<16x8xf32>
    %18 = arith.truncf %14 : vector<16x8xf32> to vector<16x8xbf16>
    %19 = arith.truncf %17 : vector<16x8xf32> to vector<16x8xbf16>
    %cst_5 = arith.constant dense<0.000000e+00> : vector<16x16xf32>
    %20 = tpu.matmul %18, %19, %cst_5 {dimension_numbers = #tpu.dot_dimension_numbers<[1], [1], [0], [0], [0, 0, 1, 0], [], []>} : vector<16x8xbf16>, vector<16x8xbf16>, vector<16x16xf32> -> vector<16x16xf32>
    %21 = vector.extract_strided_slice %20 {offsets = [0, 0], sizes = [8, 8], strides = [1, 1]} : vector<16x16xf32> to vector<8x8xf32>
    %cst_6 = arith.constant dense<0xFF800000> : vector<8xf32>
    %22 = vector.multi_reduction <maximumf>, %21, %cst_6 [1] : vector<8x8xf32> to vector<8xf32>
    %23 = vector.shape_cast %22 : vector<8xf32> to vector<8x1xf32>
    %24 = vector.broadcast %23 : vector<8x1xf32> to vector<8x8xf32>
    %25 = arith.subf %21, %24 : vector<8x8xf32>
    %26 = math.exp %25 : vector<8x8xf32>
    %cst_7 = arith.constant dense<0.000000e+00> : vector<8xf32>
    %27 = vector.multi_reduction <add>, %26, %cst_7 [1] : vector<8x8xf32> to vector<8xf32>
    %28 = vector.shape_cast %27 : vector<8xf32> to vector<8x1xf32>
    %29 = tpu.reciprocal %28 {approx = true} : vector<8x1xf32> -> vector<8x1xf32>
    %30 = vector.broadcast %29 : vector<8x1xf32> to vector<8x8xf32>
    %31 = arith.mulf %26, %30 : vector<8x8xf32>
    %32 = vector.extract_strided_slice %20 {offsets = [0, 8], sizes = [8, 8], strides = [1, 1]} : vector<16x16xf32> to vector<8x8xf32>
    %cst_8 = arith.constant dense<0xFF800000> : vector<8xf32>
    %33 = vector.multi_reduction <maximumf>, %32, %cst_8 [1] : vector<8x8xf32> to vector<8xf32>
    %34 = vector.shape_cast %33 : vector<8xf32> to vector<8x1xf32>
    %35 = vector.broadcast %34 : vector<8x1xf32> to vector<8x8xf32>
    %36 = arith.subf %32, %35 : vector<8x8xf32>
    %37 = math.exp %36 : vector<8x8xf32>
    %cst_9 = arith.constant dense<0.000000e+00> : vector<8xf32>
    %38 = vector.multi_reduction <add>, %37, %cst_9 [1] : vector<8x8xf32> to vector<8xf32>
    %39 = vector.shape_cast %38 : vector<8xf32> to vector<8x1xf32>
    %40 = tpu.reciprocal %39 {approx = true} : vector<8x1xf32> -> vector<8x1xf32>
    %41 = vector.broadcast %40 : vector<8x1xf32> to vector<8x8xf32>
    %42 = arith.mulf %37, %41 : vector<8x8xf32>
    %43 = vector.extract_strided_slice %20 {offsets = [8, 0], sizes = [8, 8], strides = [1, 1]} : vector<16x16xf32> to vector<8x8xf32>
    %cst_10 = arith.constant dense<0xFF800000> : vector<8xf32>
    %44 = vector.multi_reduction <maximumf>, %43, %cst_10 [1] : vector<8x8xf32> to vector<8xf32>
    %45 = vector.shape_cast %44 : vector<8xf32> to vector<8x1xf32>
    %46 = vector.broadcast %45 : vector<8x1xf32> to vector<8x8xf32>
    %47 = arith.subf %43, %46 : vector<8x8xf32>
    %48 = math.exp %47 : vector<8x8xf32>
    %cst_11 = arith.constant dense<0.000000e+00> : vector<8xf32>
    %49 = vector.multi_reduction <add>, %48, %cst_11 [1] : vector<8x8xf32> to vector<8xf32>
    %50 = vector.shape_cast %49 : vector<8xf32> to vector<8x1xf32>
    %51 = tpu.reciprocal %50 {approx = true} : vector<8x1xf32> -> vector<8x1xf32>
    %52 = vector.broadcast %51 : vector<8x1xf32> to vector<8x8xf32>
    %53 = arith.mulf %48, %52 : vector<8x8xf32>
    %54 = vector.extract_strided_slice %20 {offsets = [8, 8], sizes = [8, 8], strides = [1, 1]} : vector<16x16xf32> to vector<8x8xf32>
    %cst_12 = arith.constant dense<0xFF800000> : vector<8xf32>
    %55 = vector.multi_reduction <maximumf>, %54, %cst_12 [1] : vector<8x8xf32> to vector<8xf32>
    %56 = vector.shape_cast %55 : vector<8xf32> to vector<8x1xf32>
    %57 = vector.broadcast %56 : vector<8x1xf32> to vector<8x8xf32>
    %58 = arith.subf %54, %57 : vector<8x8xf32>
    %59 = math.exp %58 : vector<8x8xf32>
    %cst_13 = arith.constant dense<0.000000e+00> : vector<8xf32>
    %60 = vector.multi_reduction <add>, %59, %cst_13 [1] : vector<8x8xf32> to vector<8xf32>
    %61 = vector.shape_cast %60 : vector<8xf32> to vector<8x1xf32>
    %62 = tpu.reciprocal %61 {approx = true} : vector<8x1xf32> -> vector<8x1xf32>
    %63 = vector.broadcast %62 : vector<8x1xf32> to vector<8x8xf32>
    %64 = arith.mulf %59, %63 : vector<8x8xf32>
    %65 = arith.subf %31, %64 : vector<8x8xf32>
    %66 = arith.addf %42, %53 : vector<8x8xf32>
    %67 = tpu.concatenate %65, %66 in 1 : vector<8x8xf32>, vector<8x8xf32> -> vector<8x16xf32>
    %68 = vector.extract_strided_slice %6 {offsets = [0, 0], sizes = [8, 8], strides = [1, 1]} : vector<8x32xf32> to vector<8x8xf32>
    %69 = vector.extract_strided_slice %9 {offsets = [0, 0], sizes = [8, 8], strides = [1, 1]} : vector<8x32xf32> to vector<8x8xf32>
    %cst_14 = arith.constant 0.000000e+00 : f32
    %70 = vector.broadcast %cst_14 : f32 to vector<8x8xf32>
    %71 = arith.subf %70, %69 : vector<8x8xf32>
    %72 = tpu.concatenate %68, %71 in 0 : vector<8x8xf32>, vector<8x8xf32> -> vector<16x8xf32>
    %73 = tpu.concatenate %69, %68 in 0 : vector<8x8xf32>, vector<8x8xf32> -> vector<16x8xf32>
    %74 = tpu.concatenate %72, %73 in 1 : vector<16x8xf32>, vector<16x8xf32> -> vector<16x16xf32>
    %75 = arith.truncf %67 : vector<8x16xf32> to vector<8x16xbf16>
    %76 = arith.truncf %74 : vector<16x16xf32> to vector<16x16xbf16>
    %cst_15 = arith.constant dense<0.000000e+00> : vector<8x16xf32>
    %77 = tpu.matmul %75, %76, %cst_15 {dimension_numbers = #tpu.dot_dimension_numbers<[1], [0], [0], [1], [0, 0, 1, 1], [], []>} : vector<8x16xbf16>, vector<16x16xbf16>, vector<8x16xf32> -> vector<8x16xf32>
    %78 = vector.extract_strided_slice %77 {offsets = [0, 0], sizes = [8, 8], strides = [1, 1]} : vector<8x16xf32> to vector<8x8xf32>
    %79 = vector.extract_strided_slice %77 {offsets = [0, 8], sizes = [8, 8], strides = [1, 1]} : vector<8x16xf32> to vector<8x8xf32>
    %80 = vector.extract_strided_slice %4 {offsets = [0, 8], sizes = [8, 8], strides = [1, 1]} : vector<8x32xf32> to vector<8x8xf32>
    %81 = vector.extract_strided_slice %7 {offsets = [0, 8], sizes = [8, 8], strides = [1, 1]} : vector<8x32xf32> to vector<8x8xf32>
    %82 = tpu.concatenate %80, %81 in 0 : vector<8x8xf32>, vector<8x8xf32> -> vector<16x8xf32>
    %cst_16 = arith.constant 0.353553385 : f32
    %83 = vector.broadcast %cst_16 : f32 to vector<16x8xf32>
    %84 = arith.mulf %82, %83 : vector<16x8xf32>
    %85 = vector.extract_strided_slice %5 {offsets = [0, 8], sizes = [8, 8], strides = [1, 1]} : vector<8x32xf32> to vector<8x8xf32>
    %86 = vector.extract_strided_slice %8 {offsets = [0, 8], sizes = [8, 8], strides = [1, 1]} : vector<8x32xf32> to vector<8x8xf32>
    %87 = tpu.concatenate %85, %86 in 0 : vector<8x8xf32>, vector<8x8xf32> -> vector<16x8xf32>
    %88 = arith.truncf %84 : vector<16x8xf32> to vector<16x8xbf16>
    %89 = arith.truncf %87 : vector<16x8xf32> to vector<16x8xbf16>
    %cst_17 = arith.constant dense<0.000000e+00> : vector<16x16xf32>
    %90 = tpu.matmul %88, %89, %cst_17 {dimension_numbers = #tpu.dot_dimension_numbers<[1], [1], [0], [0], [0, 0, 1, 0], [], []>} : vector<16x8xbf16>, vector<16x8xbf16>, vector<16x16xf32> -> vector<16x16xf32>
    %91 = vector.extract_strided_slice %90 {offsets = [0, 0], sizes = [8, 8], strides = [1, 1]} : vector<16x16xf32> to vector<8x8xf32>
    %cst_18 = arith.constant dense<0xFF800000> : vector<8xf32>
    %92 = vector.multi_reduction <maximumf>, %91, %cst_18 [1] : vector<8x8xf32> to vector<8xf32>
    %93 = vector.shape_cast %92 : vector<8xf32> to vector<8x1xf32>
    %94 = vector.broadcast %93 : vector<8x1xf32> to vector<8x8xf32>
    %95 = arith.subf %91, %94 : vector<8x8xf32>
    %96 = math.exp %95 : vector<8x8xf32>
    %cst_19 = arith.constant dense<0.000000e+00> : vector<8xf32>
    %97 = vector.multi_reduction <add>, %96, %cst_19 [1] : vector<8x8xf32> to vector<8xf32>
    %98 = vector.shape_cast %97 : vector<8xf32> to vector<8x1xf32>
    %99 = tpu.reciprocal %98 {approx = true} : vector<8x1xf32> -> vector<8x1xf32>
    %100 = vector.broadcast %99 : vector<8x1xf32> to vector<8x8xf32>
    %101 = arith.mulf %96, %100 : vector<8x8xf32>
    %102 = vector.extract_strided_slice %90 {offsets = [0, 8], sizes = [8, 8], strides = [1, 1]} : vector<16x16xf32> to vector<8x8xf32>
    %cst_20 = arith.constant dense<0xFF800000> : vector<8xf32>
    %103 = vector.multi_reduction <maximumf>, %102, %cst_20 [1] : vector<8x8xf32> to vector<8xf32>
    %104 = vector.shape_cast %103 : vector<8xf32> to vector<8x1xf32>
    %105 = vector.broadcast %104 : vector<8x1xf32> to vector<8x8xf32>
    %106 = arith.subf %102, %105 : vector<8x8xf32>
    %107 = math.exp %106 : vector<8x8xf32>
    %cst_21 = arith.constant dense<0.000000e+00> : vector<8xf32>
    %108 = vector.multi_reduction <add>, %107, %cst_21 [1] : vector<8x8xf32> to vector<8xf32>
    %109 = vector.shape_cast %108 : vector<8xf32> to vector<8x1xf32>
    %110 = tpu.reciprocal %109 {approx = true} : vector<8x1xf32> -> vector<8x1xf32>
    %111 = vector.broadcast %110 : vector<8x1xf32> to vector<8x8xf32>
    %112 = arith.mulf %107, %111 : vector<8x8xf32>
    %113 = vector.extract_strided_slice %90 {offsets = [8, 0], sizes = [8, 8], strides = [1, 1]} : vector<16x16xf32> to vector<8x8xf32>
    %cst_22 = arith.constant dense<0xFF800000> : vector<8xf32>
    %114 = vector.multi_reduction <maximumf>, %113, %cst_22 [1] : vector<8x8xf32> to vector<8xf32>
    %115 = vector.shape_cast %114 : vector<8xf32> to vector<8x1xf32>
    %116 = vector.broadcast %115 : vector<8x1xf32> to vector<8x8xf32>
    %117 = arith.subf %113, %116 : vector<8x8xf32>
    %118 = math.exp %117 : vector<8x8xf32>
    %cst_23 = arith.constant dense<0.000000e+00> : vector<8xf32>
    %119 = vector.multi_reduction <add>, %118, %cst_23 [1] : vector<8x8xf32> to vector<8xf32>
    %120 = vector.shape_cast %119 : vector<8xf32> to vector<8x1xf32>
    %121 = tpu.reciprocal %120 {approx = true} : vector<8x1xf32> -> vector<8x1xf32>
    %122 = vector.broadcast %121 : vector<8x1xf32> to vector<8x8xf32>
    %123 = arith.mulf %118, %122 : vector<8x8xf32>
    %124 = vector.extract_strided_slice %90 {offsets = [8, 8], sizes = [8, 8], strides = [1, 1]} : vector<16x16xf32> to vector<8x8xf32>
    %cst_24 = arith.constant dense<0xFF800000> : vector<8xf32>
    %125 = vector.multi_reduction <maximumf>, %124, %cst_24 [1] : vector<8x8xf32> to vector<8xf32>
    %126 = vector.shape_cast %125 : vector<8xf32> to vector<8x1xf32>
    %127 = vector.broadcast %126 : vector<8x1xf32> to vector<8x8xf32>
    %128 = arith.subf %124, %127 : vector<8x8xf32>
    %129 = math.exp %128 : vector<8x8xf32>
    %cst_25 = arith.constant dense<0.000000e+00> : vector<8xf32>
    %130 = vector.multi_reduction <add>, %129, %cst_25 [1] : vector<8x8xf32> to vector<8xf32>
    %131 = vector.shape_cast %130 : vector<8xf32> to vector<8x1xf32>
    %132 = tpu.reciprocal %131 {approx = true} : vector<8x1xf32> -> vector<8x1xf32>
    %133 = vector.broadcast %132 : vector<8x1xf32> to vector<8x8xf32>
    %134 = arith.mulf %129, %133 : vector<8x8xf32>
    %135 = arith.subf %101, %134 : vector<8x8xf32>
    %136 = arith.addf %112, %123 : vector<8x8xf32>
    %137 = tpu.concatenate %135, %136 in 1 : vector<8x8xf32>, vector<8x8xf32> -> vector<8x16xf32>
    %138 = vector.extract_strided_slice %6 {offsets = [0, 8], sizes = [8, 8], strides = [1, 1]} : vector<8x32xf32> to vector<8x8xf32>
    %139 = vector.extract_strided_slice %9 {offsets = [0, 8], sizes = [8, 8], strides = [1, 1]} : vector<8x32xf32> to vector<8x8xf32>
    %cst_26 = arith.constant 0.000000e+00 : f32
    %140 = vector.broadcast %cst_26 : f32 to vector<8x8xf32>
    %141 = arith.subf %140, %139 : vector<8x8xf32>
    %142 = tpu.concatenate %138, %141 in 0 : vector<8x8xf32>, vector<8x8xf32> -> vector<16x8xf32>
    %143 = tpu.concatenate %139, %138 in 0 : vector<8x8xf32>, vector<8x8xf32> -> vector<16x8xf32>
    %144 = tpu.concatenate %142, %143 in 1 : vector<16x8xf32>, vector<16x8xf32> -> vector<16x16xf32>
    %145 = arith.truncf %137 : vector<8x16xf32> to vector<8x16xbf16>
    %146 = arith.truncf %144 : vector<16x16xf32> to vector<16x16xbf16>
    %cst_27 = arith.constant dense<0.000000e+00> : vector<8x16xf32>
    %147 = tpu.matmul %145, %146, %cst_27 {dimension_numbers = #tpu.dot_dimension_numbers<[1], [0], [0], [1], [0, 0, 1, 1], [], []>} : vector<8x16xbf16>, vector<16x16xbf16>, vector<8x16xf32> -> vector<8x16xf32>
    %148 = vector.extract_strided_slice %147 {offsets = [0, 0], sizes = [8, 8], strides = [1, 1]} : vector<8x16xf32> to vector<8x8xf32>
    %149 = vector.extract_strided_slice %147 {offsets = [0, 8], sizes = [8, 8], strides = [1, 1]} : vector<8x16xf32> to vector<8x8xf32>
    %150 = vector.extract_strided_slice %4 {offsets = [0, 16], sizes = [8, 8], strides = [1, 1]} : vector<8x32xf32> to vector<8x8xf32>
    %151 = vector.extract_strided_slice %7 {offsets = [0, 16], sizes = [8, 8], strides = [1, 1]} : vector<8x32xf32> to vector<8x8xf32>
    %152 = tpu.concatenate %150, %151 in 0 : vector<8x8xf32>, vector<8x8xf32> -> vector<16x8xf32>
    %cst_28 = arith.constant 0.353553385 : f32
    %153 = vector.broadcast %cst_28 : f32 to vector<16x8xf32>
    %154 = arith.mulf %152, %153 : vector<16x8xf32>
    %155 = vector.extract_strided_slice %5 {offsets = [0, 16], sizes = [8, 8], strides = [1, 1]} : vector<8x32xf32> to vector<8x8xf32>
    %156 = vector.extract_strided_slice %8 {offsets = [0, 16], sizes = [8, 8], strides = [1, 1]} : vector<8x32xf32> to vector<8x8xf32>
    %157 = tpu.concatenate %155, %156 in 0 : vector<8x8xf32>, vector<8x8xf32> -> vector<16x8xf32>
    %158 = arith.truncf %154 : vector<16x8xf32> to vector<16x8xbf16>
    %159 = arith.truncf %157 : vector<16x8xf32> to vector<16x8xbf16>
    %cst_29 = arith.constant dense<0.000000e+00> : vector<16x16xf32>
    %160 = tpu.matmul %158, %159, %cst_29 {dimension_numbers = #tpu.dot_dimension_numbers<[1], [1], [0], [0], [0, 0, 1, 0], [], []>} : vector<16x8xbf16>, vector<16x8xbf16>, vector<16x16xf32> -> vector<16x16xf32>
    %161 = vector.extract_strided_slice %160 {offsets = [0, 0], sizes = [8, 8], strides = [1, 1]} : vector<16x16xf32> to vector<8x8xf32>
    %cst_30 = arith.constant dense<0xFF800000> : vector<8xf32>
    %162 = vector.multi_reduction <maximumf>, %161, %cst_30 [1] : vector<8x8xf32> to vector<8xf32>
    %163 = vector.shape_cast %162 : vector<8xf32> to vector<8x1xf32>
    %164 = vector.broadcast %163 : vector<8x1xf32> to vector<8x8xf32>
    %165 = arith.subf %161, %164 : vector<8x8xf32>
    %166 = math.exp %165 : vector<8x8xf32>
    %cst_31 = arith.constant dense<0.000000e+00> : vector<8xf32>
    %167 = vector.multi_reduction <add>, %166, %cst_31 [1] : vector<8x8xf32> to vector<8xf32>
    %168 = vector.shape_cast %167 : vector<8xf32> to vector<8x1xf32>
    %169 = tpu.reciprocal %168 {approx = true} : vector<8x1xf32> -> vector<8x1xf32>
    %170 = vector.broadcast %169 : vector<8x1xf32> to vector<8x8xf32>
    %171 = arith.mulf %166, %170 : vector<8x8xf32>
    %172 = vector.extract_strided_slice %160 {offsets = [0, 8], sizes = [8, 8], strides = [1, 1]} : vector<16x16xf32> to vector<8x8xf32>
    %cst_32 = arith.constant dense<0xFF800000> : vector<8xf32>
    %173 = vector.multi_reduction <maximumf>, %172, %cst_32 [1] : vector<8x8xf32> to vector<8xf32>
    %174 = vector.shape_cast %173 : vector<8xf32> to vector<8x1xf32>
    %175 = vector.broadcast %174 : vector<8x1xf32> to vector<8x8xf32>
    %176 = arith.subf %172, %175 : vector<8x8xf32>
    %177 = math.exp %176 : vector<8x8xf32>
    %cst_33 = arith.constant dense<0.000000e+00> : vector<8xf32>
    %178 = vector.multi_reduction <add>, %177, %cst_33 [1] : vector<8x8xf32> to vector<8xf32>
    %179 = vector.shape_cast %178 : vector<8xf32> to vector<8x1xf32>
    %180 = tpu.reciprocal %179 {approx = true} : vector<8x1xf32> -> vector<8x1xf32>
    %181 = vector.broadcast %180 : vector<8x1xf32> to vector<8x8xf32>
    %182 = arith.mulf %177, %181 : vector<8x8xf32>
    %183 = vector.extract_strided_slice %160 {offsets = [8, 0], sizes = [8, 8], strides = [1, 1]} : vector<16x16xf32> to vector<8x8xf32>
    %cst_34 = arith.constant dense<0xFF800000> : vector<8xf32>
    %184 = vector.multi_reduction <maximumf>, %183, %cst_34 [1] : vector<8x8xf32> to vector<8xf32>
    %185 = vector.shape_cast %184 : vector<8xf32> to vector<8x1xf32>
    %186 = vector.broadcast %185 : vector<8x1xf32> to vector<8x8xf32>
    %187 = arith.subf %183, %186 : vector<8x8xf32>
    %188 = math.exp %187 : vector<8x8xf32>
    %cst_35 = arith.constant dense<0.000000e+00> : vector<8xf32>
    %189 = vector.multi_reduction <add>, %188, %cst_35 [1] : vector<8x8xf32> to vector<8xf32>
    %190 = vector.shape_cast %189 : vector<8xf32> to vector<8x1xf32>
    %191 = tpu.reciprocal %190 {approx = true} : vector<8x1xf32> -> vector<8x1xf32>
    %192 = vector.broadcast %191 : vector<8x1xf32> to vector<8x8xf32>
    %193 = arith.mulf %188, %192 : vector<8x8xf32>
    %194 = vector.extract_strided_slice %160 {offsets = [8, 8], sizes = [8, 8], strides = [1, 1]} : vector<16x16xf32> to vector<8x8xf32>
    %cst_36 = arith.constant dense<0xFF800000> : vector<8xf32>
    %195 = vector.multi_reduction <maximumf>, %194, %cst_36 [1] : vector<8x8xf32> to vector<8xf32>
    %196 = vector.shape_cast %195 : vector<8xf32> to vector<8x1xf32>
    %197 = vector.broadcast %196 : vector<8x1xf32> to vector<8x8xf32>
    %198 = arith.subf %194, %197 : vector<8x8xf32>
    %199 = math.exp %198 : vector<8x8xf32>
    %cst_37 = arith.constant dense<0.000000e+00> : vector<8xf32>
    %200 = vector.multi_reduction <add>, %199, %cst_37 [1] : vector<8x8xf32> to vector<8xf32>
    %201 = vector.shape_cast %200 : vector<8xf32> to vector<8x1xf32>
    %202 = tpu.reciprocal %201 {approx = true} : vector<8x1xf32> -> vector<8x1xf32>
    %203 = vector.broadcast %202 : vector<8x1xf32> to vector<8x8xf32>
    %204 = arith.mulf %199, %203 : vector<8x8xf32>
    %205 = arith.subf %171, %204 : vector<8x8xf32>
    %206 = arith.addf %182, %193 : vector<8x8xf32>
    %207 = tpu.concatenate %205, %206 in 1 : vector<8x8xf32>, vector<8x8xf32> -> vector<8x16xf32>
    %208 = vector.extract_strided_slice %6 {offsets = [0, 16], sizes = [8, 8], strides = [1, 1]} : vector<8x32xf32> to vector<8x8xf32>
    %209 = vector.extract_strided_slice %9 {offsets = [0, 16], sizes = [8, 8], strides = [1, 1]} : vector<8x32xf32> to vector<8x8xf32>
    %cst_38 = arith.constant 0.000000e+00 : f32
    %210 = vector.broadcast %cst_38 : f32 to vector<8x8xf32>
    %211 = arith.subf %210, %209 : vector<8x8xf32>
    %212 = tpu.concatenate %208, %211 in 0 : vector<8x8xf32>, vector<8x8xf32> -> vector<16x8xf32>
    %213 = tpu.concatenate %209, %208 in 0 : vector<8x8xf32>, vector<8x8xf32> -> vector<16x8xf32>
    %214 = tpu.concatenate %212, %213 in 1 : vector<16x8xf32>, vector<16x8xf32> -> vector<16x16xf32>
    %215 = arith.truncf %207 : vector<8x16xf32> to vector<8x16xbf16>
    %216 = arith.truncf %214 : vector<16x16xf32> to vector<16x16xbf16>
    %cst_39 = arith.constant dense<0.000000e+00> : vector<8x16xf32>
    %217 = tpu.matmul %215, %216, %cst_39 {dimension_numbers = #tpu.dot_dimension_numbers<[1], [0], [0], [1], [0, 0, 1, 1], [], []>} : vector<8x16xbf16>, vector<16x16xbf16>, vector<8x16xf32> -> vector<8x16xf32>
    %218 = vector.extract_strided_slice %217 {offsets = [0, 0], sizes = [8, 8], strides = [1, 1]} : vector<8x16xf32> to vector<8x8xf32>
    %219 = vector.extract_strided_slice %217 {offsets = [0, 8], sizes = [8, 8], strides = [1, 1]} : vector<8x16xf32> to vector<8x8xf32>
    %220 = vector.extract_strided_slice %4 {offsets = [0, 24], sizes = [8, 8], strides = [1, 1]} : vector<8x32xf32> to vector<8x8xf32>
    %221 = vector.extract_strided_slice %7 {offsets = [0, 24], sizes = [8, 8], strides = [1, 1]} : vector<8x32xf32> to vector<8x8xf32>
    %222 = tpu.concatenate %220, %221 in 0 : vector<8x8xf32>, vector<8x8xf32> -> vector<16x8xf32>
    %cst_40 = arith.constant 0.353553385 : f32
    %223 = vector.broadcast %cst_40 : f32 to vector<16x8xf32>
    %224 = arith.mulf %222, %223 : vector<16x8xf32>
    %225 = vector.extract_strided_slice %5 {offsets = [0, 24], sizes = [8, 8], strides = [1, 1]} : vector<8x32xf32> to vector<8x8xf32>
    %226 = vector.extract_strided_slice %8 {offsets = [0, 24], sizes = [8, 8], strides = [1, 1]} : vector<8x32xf32> to vector<8x8xf32>
    %227 = tpu.concatenate %225, %226 in 0 : vector<8x8xf32>, vector<8x8xf32> -> vector<16x8xf32>
    %228 = arith.truncf %224 : vector<16x8xf32> to vector<16x8xbf16>
    %229 = arith.truncf %227 : vector<16x8xf32> to vector<16x8xbf16>
    %cst_41 = arith.constant dense<0.000000e+00> : vector<16x16xf32>
    %230 = tpu.matmul %228, %229, %cst_41 {dimension_numbers = #tpu.dot_dimension_numbers<[1], [1], [0], [0], [0, 0, 1, 0], [], []>} : vector<16x8xbf16>, vector<16x8xbf16>, vector<16x16xf32> -> vector<16x16xf32>
    %231 = vector.extract_strided_slice %230 {offsets = [0, 0], sizes = [8, 8], strides = [1, 1]} : vector<16x16xf32> to vector<8x8xf32>
    %cst_42 = arith.constant dense<0xFF800000> : vector<8xf32>
    %232 = vector.multi_reduction <maximumf>, %231, %cst_42 [1] : vector<8x8xf32> to vector<8xf32>
    %233 = vector.shape_cast %232 : vector<8xf32> to vector<8x1xf32>
    %234 = vector.broadcast %233 : vector<8x1xf32> to vector<8x8xf32>
    %235 = arith.subf %231, %234 : vector<8x8xf32>
    %236 = math.exp %235 : vector<8x8xf32>
    %cst_43 = arith.constant dense<0.000000e+00> : vector<8xf32>
    %237 = vector.multi_reduction <add>, %236, %cst_43 [1] : vector<8x8xf32> to vector<8xf32>
    %238 = vector.shape_cast %237 : vector<8xf32> to vector<8x1xf32>
    %239 = tpu.reciprocal %238 {approx = true} : vector<8x1xf32> -> vector<8x1xf32>
    %240 = vector.broadcast %239 : vector<8x1xf32> to vector<8x8xf32>
    %241 = arith.mulf %236, %240 : vector<8x8xf32>
    %242 = vector.extract_strided_slice %230 {offsets = [0, 8], sizes = [8, 8], strides = [1, 1]} : vector<16x16xf32> to vector<8x8xf32>
    %cst_44 = arith.constant dense<0xFF800000> : vector<8xf32>
    %243 = vector.multi_reduction <maximumf>, %242, %cst_44 [1] : vector<8x8xf32> to vector<8xf32>
    %244 = vector.shape_cast %243 : vector<8xf32> to vector<8x1xf32>
    %245 = vector.broadcast %244 : vector<8x1xf32> to vector<8x8xf32>
    %246 = arith.subf %242, %245 : vector<8x8xf32>
    %247 = math.exp %246 : vector<8x8xf32>
    %cst_45 = arith.constant dense<0.000000e+00> : vector<8xf32>
    %248 = vector.multi_reduction <add>, %247, %cst_45 [1] : vector<8x8xf32> to vector<8xf32>
    %249 = vector.shape_cast %248 : vector<8xf32> to vector<8x1xf32>
    %250 = tpu.reciprocal %249 {approx = true} : vector<8x1xf32> -> vector<8x1xf32>
    %251 = vector.broadcast %250 : vector<8x1xf32> to vector<8x8xf32>
    %252 = arith.mulf %247, %251 : vector<8x8xf32>
    %253 = vector.extract_strided_slice %230 {offsets = [8, 0], sizes = [8, 8], strides = [1, 1]} : vector<16x16xf32> to vector<8x8xf32>
    %cst_46 = arith.constant dense<0xFF800000> : vector<8xf32>
    %254 = vector.multi_reduction <maximumf>, %253, %cst_46 [1] : vector<8x8xf32> to vector<8xf32>
    %255 = vector.shape_cast %254 : vector<8xf32> to vector<8x1xf32>
    %256 = vector.broadcast %255 : vector<8x1xf32> to vector<8x8xf32>
    %257 = arith.subf %253, %256 : vector<8x8xf32>
    %258 = math.exp %257 : vector<8x8xf32>
    %cst_47 = arith.constant dense<0.000000e+00> : vector<8xf32>
    %259 = vector.multi_reduction <add>, %258, %cst_47 [1] : vector<8x8xf32> to vector<8xf32>
    %260 = vector.shape_cast %259 : vector<8xf32> to vector<8x1xf32>
    %261 = tpu.reciprocal %260 {approx = true} : vector<8x1xf32> -> vector<8x1xf32>
    %262 = vector.broadcast %261 : vector<8x1xf32> to vector<8x8xf32>
    %263 = arith.mulf %258, %262 : vector<8x8xf32>
    %264 = vector.extract_strided_slice %230 {offsets = [8, 8], sizes = [8, 8], strides = [1, 1]} : vector<16x16xf32> to vector<8x8xf32>
    %cst_48 = arith.constant dense<0xFF800000> : vector<8xf32>
    %265 = vector.multi_reduction <maximumf>, %264, %cst_48 [1] : vector<8x8xf32> to vector<8xf32>
    %266 = vector.shape_cast %265 : vector<8xf32> to vector<8x1xf32>
    %267 = vector.broadcast %266 : vector<8x1xf32> to vector<8x8xf32>
    %268 = arith.subf %264, %267 : vector<8x8xf32>
    %269 = math.exp %268 : vector<8x8xf32>
    %cst_49 = arith.constant dense<0.000000e+00> : vector<8xf32>
    %270 = vector.multi_reduction <add>, %269, %cst_49 [1] : vector<8x8xf32> to vector<8xf32>
    %271 = vector.shape_cast %270 : vector<8xf32> to vector<8x1xf32>
    %272 = tpu.reciprocal %271 {approx = true} : vector<8x1xf32> -> vector<8x1xf32>
    %273 = vector.broadcast %272 : vector<8x1xf32> to vector<8x8xf32>
    %274 = arith.mulf %269, %273 : vector<8x8xf32>
    %275 = arith.subf %241, %274 : vector<8x8xf32>
    %276 = arith.addf %252, %263 : vector<8x8xf32>
    %277 = tpu.concatenate %275, %276 in 1 : vector<8x8xf32>, vector<8x8xf32> -> vector<8x16xf32>
    %278 = vector.extract_strided_slice %6 {offsets = [0, 24], sizes = [8, 8], strides = [1, 1]} : vector<8x32xf32> to vector<8x8xf32>
    %279 = vector.extract_strided_slice %9 {offsets = [0, 24], sizes = [8, 8], strides = [1, 1]} : vector<8x32xf32> to vector<8x8xf32>
    %cst_50 = arith.constant 0.000000e+00 : f32
    %280 = vector.broadcast %cst_50 : f32 to vector<8x8xf32>
    %281 = arith.subf %280, %279 : vector<8x8xf32>
    %282 = tpu.concatenate %278, %281 in 0 : vector<8x8xf32>, vector<8x8xf32> -> vector<16x8xf32>
    %283 = tpu.concatenate %279, %278 in 0 : vector<8x8xf32>, vector<8x8xf32> -> vector<16x8xf32>
    %284 = tpu.concatenate %282, %283 in 1 : vector<16x8xf32>, vector<16x8xf32> -> vector<16x16xf32>
    %285 = arith.truncf %277 : vector<8x16xf32> to vector<8x16xbf16>
    %286 = arith.truncf %284 : vector<16x16xf32> to vector<16x16xbf16>
    %cst_51 = arith.constant dense<0.000000e+00> : vector<8x16xf32>
    %287 = tpu.matmul %285, %286, %cst_51 {dimension_numbers = #tpu.dot_dimension_numbers<[1], [0], [0], [1], [0, 0, 1, 1], [], []>} : vector<8x16xbf16>, vector<16x16xbf16>, vector<8x16xf32> -> vector<8x16xf32>
    %288 = vector.extract_strided_slice %287 {offsets = [0, 0], sizes = [8, 8], strides = [1, 1]} : vector<8x16xf32> to vector<8x8xf32>
    %289 = vector.extract_strided_slice %287 {offsets = [0, 8], sizes = [8, 8], strides = [1, 1]} : vector<8x16xf32> to vector<8x8xf32>
    %290 = tpu.concatenate %78, %148, %218, %288 in 1 : vector<8x8xf32>, vector<8x8xf32>, vector<8x8xf32>, vector<8x8xf32> -> vector<8x32xf32>
    %291 = tpu.concatenate %79, %149, %219, %289 in 1 : vector<8x8xf32>, vector<8x8xf32>, vector<8x8xf32>, vector<8x8xf32> -> vector<8x32xf32>
    %c0_52 = arith.constant 0 : index
    %c0_53 = arith.constant 0 : index
    %292 = vector.load %arg5[%c0_52, %c0_53] : memref<32x32xbf16, #tpu.memory_space<vmem>>, vector<32x32xbf16>
    %c0_54 = arith.constant 0 : index
    %c0_55 = arith.constant 0 : index
    %293 = vector.load %arg6[%c0_54, %c0_55] : memref<32x32xbf16, #tpu.memory_space<vmem>>, vector<32x32xbf16>
    %c0_56 = arith.constant 0 : index
    %c0_57 = arith.constant 0 : index
    %294 = vector.load %arg7[%c0_56, %c0_57] : memref<32x32xbf16, #tpu.memory_space<vmem>>, vector<32x32xbf16>
    %c0_58 = arith.constant 0 : index
    %c0_59 = arith.constant 0 : index
    %295 = vector.load %arg8[%c0_58, %c0_59] : memref<1x32xf32, #tpu.memory_space<vmem>>, vector<1x32xf32>
    %c0_60 = arith.constant 0 : index
    %c0_61 = arith.constant 0 : index
    %296 = vector.load %arg9[%c0_60, %c0_61] : memref<1x32xf32, #tpu.memory_space<vmem>>, vector<1x32xf32>
    %297 = arith.truncf %290 : vector<8x32xf32> to vector<8x32xbf16>
    %cst_62 = arith.constant dense<0.000000e+00> : vector<8x32xf32>
    %298 = tpu.matmul %297, %292, %cst_62 {dimension_numbers = #tpu.dot_dimension_numbers<[1], [0], [0], [1], [0, 0, 1, 1], [], []>} : vector<8x32xbf16>, vector<32x32xbf16>, vector<8x32xf32> -> vector<8x32xf32>
    %299 = arith.truncf %291 : vector<8x32xf32> to vector<8x32xbf16>
    %cst_63 = arith.constant dense<0.000000e+00> : vector<8x32xf32>
    %300 = tpu.matmul %299, %293, %cst_63 {dimension_numbers = #tpu.dot_dimension_numbers<[1], [0], [0], [1], [0, 0, 1, 1], [], []>} : vector<8x32xbf16>, vector<32x32xbf16>, vector<8x32xf32> -> vector<8x32xf32>
    %301 = arith.addf %290, %291 : vector<8x32xf32>
    %302 = arith.truncf %301 : vector<8x32xf32> to vector<8x32xbf16>
    %cst_64 = arith.constant dense<0.000000e+00> : vector<8x32xf32>
    %303 = tpu.matmul %302, %294, %cst_64 {dimension_numbers = #tpu.dot_dimension_numbers<[1], [0], [0], [1], [0, 0, 1, 1], [], []>} : vector<8x32xbf16>, vector<32x32xbf16>, vector<8x32xf32> -> vector<8x32xf32>
    %304 = arith.subf %298, %300 : vector<8x32xf32>
    %305 = arith.subf %295, %296 : vector<1x32xf32>
    %306 = vector.broadcast %305 : vector<1x32xf32> to vector<8x32xf32>
    %307 = arith.addf %304, %306 : vector<8x32xf32>
    %308 = arith.subf %303, %298 : vector<8x32xf32>
    %309 = arith.subf %308, %300 : vector<8x32xf32>
    %310 = arith.addf %295, %296 : vector<1x32xf32>
    %311 = vector.broadcast %310 : vector<1x32xf32> to vector<8x32xf32>
    %312 = arith.addf %309, %311 : vector<8x32xf32>
    %c0_65 = arith.constant 0 : index
    %c0_66 = arith.constant 0 : index
    %c0_67 = arith.constant 0 : index
    %313 = vector.load %arg3[%c0_65, %c0_66, %c0_67] : memref<1x8x32xf32, #tpu.memory_space<vmem>>, vector<1x8x32xf32>
    %314 = vector.shape_cast %313 : vector<1x8x32xf32> to vector<8x32xf32>
    %315 = arith.addf %314, %307 : vector<8x32xf32>
    %316 = vector.shape_cast %315 : vector<8x32xf32> to vector<1x8x32xf32>
    %c0_68 = arith.constant 0 : index
    %c0_69 = arith.constant 0 : index
    %c0_70 = arith.constant 0 : index
    %317 = vector.load %arg10[%c0_68, %c0_69, %c0_70] : memref<1x8x32xf32, #tpu.memory_space<vmem>>, vector<1x8x32xf32>
    tpu.vector_store %arg10[%c0_68, %c0_69, %c0_70], %316 {strides = array<i32>} : memref<1x8x32xf32, #tpu.memory_space<vmem>>, vector<1x8x32xf32>,
    %c0_71 = arith.constant 0 : index
    %c0_72 = arith.constant 0 : index
    %c0_73 = arith.constant 0 : index
    %318 = vector.load %arg4[%c0_71, %c0_72, %c0_73] : memref<1x8x32xf32, #tpu.memory_space<vmem>>, vector<1x8x32xf32>
    %319 = vector.shape_cast %318 : vector<1x8x32xf32> to vector<8x32xf32>
    %320 = arith.addf %319, %312 : vector<8x32xf32>
    %321 = vector.shape_cast %320 : vector<8x32xf32> to vector<1x8x32xf32>
    %c0_74 = arith.constant 0 : index
    %c0_75 = arith.constant 0 : index
    %c0_76 = arith.constant 0 : index
    %322 = vector.load %arg11[%c0_74, %c0_75, %c0_76] : memref<1x8x32xf32, #tpu.memory_space<vmem>>, vector<1x8x32xf32>
    tpu.vector_store %arg11[%c0_74, %c0_75, %c0_76], %321 {strides = array<i32>} : memref<1x8x32xf32, #tpu.memory_space<vmem>>, vector<1x8x32xf32>,
    return
  }
  func.func @transform_0(%arg0: i32) -> (i32, i32, i32) {
    %c0_i32 = arith.constant 0 : i32
    %c0_i32_0 = arith.constant 0 : i32
    %c0_i32_1 = arith.constant 0 : i32
    return %arg0, %c0_i32, %c0_i32_0 : i32, i32, i32
  }
  func.func @transform_1(%arg0: i32) -> (i32, i32, i32) {
    %c0_i32 = arith.constant 0 : i32
    %c0_i32_0 = arith.constant 0 : i32
    %c0_i32_1 = arith.constant 0 : i32
    return %arg0, %c0_i32, %c0_i32_0 : i32, i32, i32
  }
  func.func @transform_2(%arg0: i32) -> (i32, i32, i32) {
    %c0_i32 = arith.constant 0 : i32
    %c0_i32_0 = arith.constant 0 : i32
    %c0_i32_1 = arith.constant 0 : i32
    return %arg0, %c0_i32, %c0_i32_0 : i32, i32, i32
  }
  func.func @transform_3(%arg0: i32) -> (i32, i32, i32) {
    %c0_i32 = arith.constant 0 : i32
    %c0_i32_0 = arith.constant 0 : i32
    %c0_i32_1 = arith.constant 0 : i32
    return %arg0, %c0_i32, %c0_i32_0 : i32, i32, i32
  }
  func.func @transform_4(%arg0: i32) -> (i32, i32) {
    %c0_i32 = arith.constant 0 : i32
    %c0_i32_0 = arith.constant 0 : i32
    %c0_i32_1 = arith.constant 0 : i32
    return %c0_i32, %c0_i32_0 : i32, i32
  }
  func.func @transform_5(%arg0: i32) -> (i32, i32) {
    %c0_i32 = arith.constant 0 : i32
    %c0_i32_0 = arith.constant 0 : i32
    %c0_i32_1 = arith.constant 0 : i32
    return %c0_i32, %c0_i32_0 : i32, i32
  }
  func.func @transform_6(%arg0: i32) -> (i32, i32) {
    %c0_i32 = arith.constant 0 : i32
    %c0_i32_0 = arith.constant 0 : i32
    %c0_i32_1 = arith.constant 0 : i32
    return %c0_i32, %c0_i32_0 : i32, i32
  }
  func.func @transform_7(%arg0: i32) -> (i32, i32) {
    %c0_i32 = arith.constant 0 : i32
    %c0_i32_0 = arith.constant 0 : i32
    %c0_i32_1 = arith.constant 0 : i32
    return %c0_i32, %c0_i32_0 : i32, i32
  }
  func.func @transform_8(%arg0: i32) -> (i32, i32) {
    %c0_i32 = arith.constant 0 : i32
    %c0_i32_0 = arith.constant 0 : i32
    %c0_i32_1 = arith.constant 0 : i32
    return %c0_i32, %c0_i32_0 : i32, i32
  }
  func.func @transform_9(%arg0: i32) -> (i32, i32, i32) {
    %c0_i32 = arith.constant 0 : i32
    %c0_i32_0 = arith.constant 0 : i32
    %c0_i32_1 = arith.constant 0 : i32
    return %arg0, %c0_i32, %c0_i32_0 : i32, i32, i32
  }
  func.func @transform_10(%arg0: i32) -> (i32, i32, i32) {
    %c0_i32 = arith.constant 0 : i32
    %c0_i32_0 = arith.constant 0 : i32
    %c0_i32_1 = arith.constant 0 : i32
    return %arg0, %c0_i32, %c0_i32_0 : i32, i32, i32
  }
}

module attributes {stable_mosaic.version = 11 : i64} {
  func.func @_ln_ffn_kernel(%arg0: i32, %arg1: memref<8x32xf32, #tpu.memory_space<vmem>>, %arg2: memref<8x32xf32, #tpu.memory_space<vmem>>, %arg3: memref<1x32xf32, #tpu.memory_space<vmem>>, %arg4: memref<1x32xf32, #tpu.memory_space<vmem>>, %arg5: memref<1x32xf32, #tpu.memory_space<vmem>>, %arg6: memref<1x32xf32, #tpu.memory_space<vmem>>, %arg7: memref<32x128xbf16, #tpu.memory_space<vmem>>, %arg8: memref<32x128xbf16, #tpu.memory_space<vmem>>, %arg9: memref<32x128xbf16, #tpu.memory_space<vmem>>, %arg10: memref<1x128xf32, #tpu.memory_space<vmem>>, %arg11: memref<1x128xf32, #tpu.memory_space<vmem>>, %arg12: memref<128x32xbf16, #tpu.memory_space<vmem>>, %arg13: memref<128x32xbf16, #tpu.memory_space<vmem>>, %arg14: memref<128x32xbf16, #tpu.memory_space<vmem>>, %arg15: memref<1x32xf32, #tpu.memory_space<vmem>>, %arg16: memref<1x32xf32, #tpu.memory_space<vmem>>, %arg17: memref<8x32xf32, #tpu.memory_space<vmem>>, %arg18: memref<8x32xf32, #tpu.memory_space<vmem>>) attributes {dimension_semantics = [#tpu.dimension_semantics<parallel>], iteration_bounds = array<i64: 2>, scalar_prefetch = 0 : i64, scratch_operands = 0 : i64, tpu.core_type = #tpu.core_type<tc>, window_params = [{transform_indices = @transform_0, window_bounds = array<i64: 8, 32>}, {transform_indices = @transform_1, window_bounds = array<i64: 8, 32>}, {pipeline_mode = #tpu.pipeline_mode<synchronous>, transform_indices = @transform_2, window_bounds = array<i64: 1, 32>}, {pipeline_mode = #tpu.pipeline_mode<synchronous>, transform_indices = @transform_3, window_bounds = array<i64: 1, 32>}, {pipeline_mode = #tpu.pipeline_mode<synchronous>, transform_indices = @transform_4, window_bounds = array<i64: 1, 32>}, {pipeline_mode = #tpu.pipeline_mode<synchronous>, transform_indices = @transform_5, window_bounds = array<i64: 1, 32>}, {pipeline_mode = #tpu.pipeline_mode<synchronous>, transform_indices = @transform_6, window_bounds = array<i64: 32, 128>}, {pipeline_mode = #tpu.pipeline_mode<synchronous>, transform_indices = @transform_7, window_bounds = array<i64: 32, 128>}, {pipeline_mode = #tpu.pipeline_mode<synchronous>, transform_indices = @transform_8, window_bounds = array<i64: 32, 128>}, {pipeline_mode = #tpu.pipeline_mode<synchronous>, transform_indices = @transform_9, window_bounds = array<i64: 1, 128>}, {pipeline_mode = #tpu.pipeline_mode<synchronous>, transform_indices = @transform_10, window_bounds = array<i64: 1, 128>}, {pipeline_mode = #tpu.pipeline_mode<synchronous>, transform_indices = @transform_11, window_bounds = array<i64: 128, 32>}, {pipeline_mode = #tpu.pipeline_mode<synchronous>, transform_indices = @transform_12, window_bounds = array<i64: 128, 32>}, {pipeline_mode = #tpu.pipeline_mode<synchronous>, transform_indices = @transform_13, window_bounds = array<i64: 128, 32>}, {pipeline_mode = #tpu.pipeline_mode<synchronous>, transform_indices = @transform_14, window_bounds = array<i64: 1, 32>}, {pipeline_mode = #tpu.pipeline_mode<synchronous>, transform_indices = @transform_15, window_bounds = array<i64: 1, 32>}, {transform_indices = @transform_16, window_bounds = array<i64: 8, 32>}, {transform_indices = @transform_17, window_bounds = array<i64: 8, 32>}]} {
    %c0 = arith.constant 0 : index
    %c0_0 = arith.constant 0 : index
    %0 = vector.load %arg1[%c0, %c0_0] : memref<8x32xf32, #tpu.memory_space<vmem>>, vector<8x32xf32>
    %c0_1 = arith.constant 0 : index
    %c0_2 = arith.constant 0 : index
    %1 = vector.load %arg2[%c0_1, %c0_2] : memref<8x32xf32, #tpu.memory_space<vmem>>, vector<8x32xf32>
    %c0_3 = arith.constant 0 : index
    %c0_4 = arith.constant 0 : index
    %2 = vector.load %arg3[%c0_3, %c0_4] : memref<1x32xf32, #tpu.memory_space<vmem>>, vector<1x32xf32>
    %c0_5 = arith.constant 0 : index
    %c0_6 = arith.constant 0 : index
    %3 = vector.load %arg4[%c0_5, %c0_6] : memref<1x32xf32, #tpu.memory_space<vmem>>, vector<1x32xf32>
    %cst = arith.constant dense<0.000000e+00> : vector<8xf32>
    %4 = vector.multi_reduction <add>, %0, %cst [1] : vector<8x32xf32> to vector<8xf32>
    %5 = vector.shape_cast %4 : vector<8xf32> to vector<8x1xf32>
    %cst_7 = arith.constant 3.200000e+01 : f32
    %6 = vector.broadcast %cst_7 : f32 to vector<8x1xf32>
    %7 = arith.divf %5, %6 : vector<8x1xf32>
    %8 = vector.broadcast %7 : vector<8x1xf32> to vector<8x32xf32>
    %9 = arith.subf %0, %8 : vector<8x32xf32>
    %10 = arith.mulf %9, %9 : vector<8x32xf32>
    %cst_8 = arith.constant dense<0.000000e+00> : vector<8xf32>
    %11 = vector.multi_reduction <add>, %10, %cst_8 [1] : vector<8x32xf32> to vector<8xf32>
    %12 = vector.shape_cast %11 : vector<8xf32> to vector<8x1xf32>
    %cst_9 = arith.constant 3.200000e+01 : f32
    %13 = vector.broadcast %cst_9 : f32 to vector<8x1xf32>
    %14 = arith.divf %12, %13 : vector<8x1xf32>
    %15 = vector.broadcast %7 : vector<8x1xf32> to vector<8x32xf32>
    %16 = arith.subf %0, %15 : vector<8x32xf32>
    %cst_10 = arith.constant 9.99999974E-6 : f32
    %17 = vector.broadcast %cst_10 : f32 to vector<8x1xf32>
    %18 = arith.addf %14, %17 : vector<8x1xf32>
    %19 = math.rsqrt %18 : vector<8x1xf32>
    %20 = vector.broadcast %19 : vector<8x1xf32> to vector<8x32xf32>
    %21 = arith.mulf %16, %20 : vector<8x32xf32>
    %22 = vector.broadcast %2 : vector<1x32xf32> to vector<8x32xf32>
    %23 = arith.mulf %21, %22 : vector<8x32xf32>
    %24 = vector.broadcast %3 : vector<1x32xf32> to vector<8x32xf32>
    %25 = arith.addf %23, %24 : vector<8x32xf32>
    %c0_11 = arith.constant 0 : index
    %c0_12 = arith.constant 0 : index
    %26 = vector.load %arg5[%c0_11, %c0_12] : memref<1x32xf32, #tpu.memory_space<vmem>>, vector<1x32xf32>
    %c0_13 = arith.constant 0 : index
    %c0_14 = arith.constant 0 : index
    %27 = vector.load %arg6[%c0_13, %c0_14] : memref<1x32xf32, #tpu.memory_space<vmem>>, vector<1x32xf32>
    %cst_15 = arith.constant dense<0.000000e+00> : vector<8xf32>
    %28 = vector.multi_reduction <add>, %1, %cst_15 [1] : vector<8x32xf32> to vector<8xf32>
    %29 = vector.shape_cast %28 : vector<8xf32> to vector<8x1xf32>
    %cst_16 = arith.constant 3.200000e+01 : f32
    %30 = vector.broadcast %cst_16 : f32 to vector<8x1xf32>
    %31 = arith.divf %29, %30 : vector<8x1xf32>
    %32 = vector.broadcast %31 : vector<8x1xf32> to vector<8x32xf32>
    %33 = arith.subf %1, %32 : vector<8x32xf32>
    %34 = arith.mulf %33, %33 : vector<8x32xf32>
    %cst_17 = arith.constant dense<0.000000e+00> : vector<8xf32>
    %35 = vector.multi_reduction <add>, %34, %cst_17 [1] : vector<8x32xf32> to vector<8xf32>
    %36 = vector.shape_cast %35 : vector<8xf32> to vector<8x1xf32>
    %cst_18 = arith.constant 3.200000e+01 : f32
    %37 = vector.broadcast %cst_18 : f32 to vector<8x1xf32>
    %38 = arith.divf %36, %37 : vector<8x1xf32>
    %39 = vector.broadcast %31 : vector<8x1xf32> to vector<8x32xf32>
    %40 = arith.subf %1, %39 : vector<8x32xf32>
    %cst_19 = arith.constant 9.99999974E-6 : f32
    %41 = vector.broadcast %cst_19 : f32 to vector<8x1xf32>
    %42 = arith.addf %38, %41 : vector<8x1xf32>
    %43 = math.rsqrt %42 : vector<8x1xf32>
    %44 = vector.broadcast %43 : vector<8x1xf32> to vector<8x32xf32>
    %45 = arith.mulf %40, %44 : vector<8x32xf32>
    %46 = vector.broadcast %26 : vector<1x32xf32> to vector<8x32xf32>
    %47 = arith.mulf %45, %46 : vector<8x32xf32>
    %48 = vector.broadcast %27 : vector<1x32xf32> to vector<8x32xf32>
    %49 = arith.addf %47, %48 : vector<8x32xf32>
    %c0_20 = arith.constant 0 : index
    %c0_21 = arith.constant 0 : index
    %50 = vector.load %arg7[%c0_20, %c0_21] : memref<32x128xbf16, #tpu.memory_space<vmem>>, vector<32x128xbf16>
    %c0_22 = arith.constant 0 : index
    %c0_23 = arith.constant 0 : index
    %51 = vector.load %arg8[%c0_22, %c0_23] : memref<32x128xbf16, #tpu.memory_space<vmem>>, vector<32x128xbf16>
    %c0_24 = arith.constant 0 : index
    %c0_25 = arith.constant 0 : index
    %52 = vector.load %arg9[%c0_24, %c0_25] : memref<32x128xbf16, #tpu.memory_space<vmem>>, vector<32x128xbf16>
    %c0_26 = arith.constant 0 : index
    %c0_27 = arith.constant 0 : index
    %53 = vector.load %arg10[%c0_26, %c0_27] : memref<1x128xf32, #tpu.memory_space<vmem>>, vector<1x128xf32>
    %c0_28 = arith.constant 0 : index
    %c0_29 = arith.constant 0 : index
    %54 = vector.load %arg11[%c0_28, %c0_29] : memref<1x128xf32, #tpu.memory_space<vmem>>, vector<1x128xf32>
    %55 = arith.truncf %25 : vector<8x32xf32> to vector<8x32xbf16>
    %cst_30 = arith.constant dense<0.000000e+00> : vector<8x128xf32>
    %56 = tpu.matmul %55, %50, %cst_30 {dimension_numbers = #tpu.dot_dimension_numbers<[1], [0], [0], [1], [0, 0, 1, 1], [], []>} : vector<8x32xbf16>, vector<32x128xbf16>, vector<8x128xf32> -> vector<8x128xf32>
    %57 = arith.truncf %49 : vector<8x32xf32> to vector<8x32xbf16>
    %cst_31 = arith.constant dense<0.000000e+00> : vector<8x128xf32>
    %58 = tpu.matmul %57, %51, %cst_31 {dimension_numbers = #tpu.dot_dimension_numbers<[1], [0], [0], [1], [0, 0, 1, 1], [], []>} : vector<8x32xbf16>, vector<32x128xbf16>, vector<8x128xf32> -> vector<8x128xf32>
    %59 = arith.addf %25, %49 : vector<8x32xf32>
    %60 = arith.truncf %59 : vector<8x32xf32> to vector<8x32xbf16>
    %cst_32 = arith.constant dense<0.000000e+00> : vector<8x128xf32>
    %61 = tpu.matmul %60, %52, %cst_32 {dimension_numbers = #tpu.dot_dimension_numbers<[1], [0], [0], [1], [0, 0, 1, 1], [], []>} : vector<8x32xbf16>, vector<32x128xbf16>, vector<8x128xf32> -> vector<8x128xf32>
    %62 = arith.subf %56, %58 : vector<8x128xf32>
    %63 = arith.subf %53, %54 : vector<1x128xf32>
    %64 = vector.broadcast %63 : vector<1x128xf32> to vector<8x128xf32>
    %65 = arith.addf %62, %64 : vector<8x128xf32>
    %66 = arith.subf %61, %56 : vector<8x128xf32>
    %67 = arith.subf %66, %58 : vector<8x128xf32>
    %68 = arith.addf %53, %54 : vector<1x128xf32>
    %69 = vector.broadcast %68 : vector<1x128xf32> to vector<8x128xf32>
    %70 = arith.addf %67, %69 : vector<8x128xf32>
    %cst_33 = arith.constant 0.000000e+00 : f32
    %71 = vector.broadcast %cst_33 : f32 to vector<8x128xf32>
    %72 = arith.maximumf %65, %71 : vector<8x128xf32>
    %cst_34 = arith.constant 0.000000e+00 : f32
    %73 = vector.broadcast %cst_34 : f32 to vector<8x128xf32>
    %74 = arith.maximumf %70, %73 : vector<8x128xf32>
    %c0_35 = arith.constant 0 : index
    %c0_36 = arith.constant 0 : index
    %75 = vector.load %arg12[%c0_35, %c0_36] : memref<128x32xbf16, #tpu.memory_space<vmem>>, vector<128x32xbf16>
    %c0_37 = arith.constant 0 : index
    %c0_38 = arith.constant 0 : index
    %76 = vector.load %arg13[%c0_37, %c0_38] : memref<128x32xbf16, #tpu.memory_space<vmem>>, vector<128x32xbf16>
    %c0_39 = arith.constant 0 : index
    %c0_40 = arith.constant 0 : index
    %77 = vector.load %arg14[%c0_39, %c0_40] : memref<128x32xbf16, #tpu.memory_space<vmem>>, vector<128x32xbf16>
    %c0_41 = arith.constant 0 : index
    %c0_42 = arith.constant 0 : index
    %78 = vector.load %arg15[%c0_41, %c0_42] : memref<1x32xf32, #tpu.memory_space<vmem>>, vector<1x32xf32>
    %c0_43 = arith.constant 0 : index
    %c0_44 = arith.constant 0 : index
    %79 = vector.load %arg16[%c0_43, %c0_44] : memref<1x32xf32, #tpu.memory_space<vmem>>, vector<1x32xf32>
    %80 = arith.truncf %72 : vector<8x128xf32> to vector<8x128xbf16>
    %cst_45 = arith.constant dense<0.000000e+00> : vector<8x32xf32>
    %81 = tpu.matmul %80, %75, %cst_45 {dimension_numbers = #tpu.dot_dimension_numbers<[1], [0], [0], [1], [0, 0, 1, 1], [], []>} : vector<8x128xbf16>, vector<128x32xbf16>, vector<8x32xf32> -> vector<8x32xf32>
    %82 = arith.truncf %74 : vector<8x128xf32> to vector<8x128xbf16>
    %cst_46 = arith.constant dense<0.000000e+00> : vector<8x32xf32>
    %83 = tpu.matmul %82, %76, %cst_46 {dimension_numbers = #tpu.dot_dimension_numbers<[1], [0], [0], [1], [0, 0, 1, 1], [], []>} : vector<8x128xbf16>, vector<128x32xbf16>, vector<8x32xf32> -> vector<8x32xf32>
    %84 = arith.addf %72, %74 : vector<8x128xf32>
    %85 = arith.truncf %84 : vector<8x128xf32> to vector<8x128xbf16>
    %cst_47 = arith.constant dense<0.000000e+00> : vector<8x32xf32>
    %86 = tpu.matmul %85, %77, %cst_47 {dimension_numbers = #tpu.dot_dimension_numbers<[1], [0], [0], [1], [0, 0, 1, 1], [], []>} : vector<8x128xbf16>, vector<128x32xbf16>, vector<8x32xf32> -> vector<8x32xf32>
    %87 = arith.subf %81, %83 : vector<8x32xf32>
    %88 = arith.subf %78, %79 : vector<1x32xf32>
    %89 = vector.broadcast %88 : vector<1x32xf32> to vector<8x32xf32>
    %90 = arith.addf %87, %89 : vector<8x32xf32>
    %91 = arith.subf %86, %81 : vector<8x32xf32>
    %92 = arith.subf %91, %83 : vector<8x32xf32>
    %93 = arith.addf %78, %79 : vector<1x32xf32>
    %94 = vector.broadcast %93 : vector<1x32xf32> to vector<8x32xf32>
    %95 = arith.addf %92, %94 : vector<8x32xf32>
    %96 = arith.addf %0, %90 : vector<8x32xf32>
    %c0_48 = arith.constant 0 : index
    %c0_49 = arith.constant 0 : index
    %97 = vector.load %arg17[%c0_48, %c0_49] : memref<8x32xf32, #tpu.memory_space<vmem>>, vector<8x32xf32>
    tpu.vector_store %arg17[%c0_48, %c0_49], %96 {strides = array<i32>} : memref<8x32xf32, #tpu.memory_space<vmem>>, vector<8x32xf32>,
    %98 = arith.addf %1, %95 : vector<8x32xf32>
    %c0_50 = arith.constant 0 : index
    %c0_51 = arith.constant 0 : index
    %99 = vector.load %arg18[%c0_50, %c0_51] : memref<8x32xf32, #tpu.memory_space<vmem>>, vector<8x32xf32>
    tpu.vector_store %arg18[%c0_50, %c0_51], %98 {strides = array<i32>} : memref<8x32xf32, #tpu.memory_space<vmem>>, vector<8x32xf32>,
    return
  }
  func.func @transform_0(%arg0: i32) -> (i32, i32) {
    %c0_i32 = arith.constant 0 : i32
    %c0_i32_0 = arith.constant 0 : i32
    return %arg0, %c0_i32 : i32, i32
  }
  func.func @transform_1(%arg0: i32) -> (i32, i32) {
    %c0_i32 = arith.constant 0 : i32
    %c0_i32_0 = arith.constant 0 : i32
    return %arg0, %c0_i32 : i32, i32
  }
  func.func @transform_2(%arg0: i32) -> (i32, i32) {
    %c0_i32 = arith.constant 0 : i32
    %c0_i32_0 = arith.constant 0 : i32
    %c0_i32_1 = arith.constant 0 : i32
    return %c0_i32, %c0_i32_0 : i32, i32
  }
  func.func @transform_3(%arg0: i32) -> (i32, i32) {
    %c0_i32 = arith.constant 0 : i32
    %c0_i32_0 = arith.constant 0 : i32
    %c0_i32_1 = arith.constant 0 : i32
    return %c0_i32, %c0_i32_0 : i32, i32
  }
  func.func @transform_4(%arg0: i32) -> (i32, i32) {
    %c0_i32 = arith.constant 0 : i32
    %c0_i32_0 = arith.constant 0 : i32
    %c0_i32_1 = arith.constant 0 : i32
    return %c0_i32, %c0_i32_0 : i32, i32
  }
  func.func @transform_5(%arg0: i32) -> (i32, i32) {
    %c0_i32 = arith.constant 0 : i32
    %c0_i32_0 = arith.constant 0 : i32
    %c0_i32_1 = arith.constant 0 : i32
    return %c0_i32, %c0_i32_0 : i32, i32
  }
  func.func @transform_6(%arg0: i32) -> (i32, i32) {
    %c0_i32 = arith.constant 0 : i32
    %c0_i32_0 = arith.constant 0 : i32
    %c0_i32_1 = arith.constant 0 : i32
    return %c0_i32, %c0_i32_0 : i32, i32
  }
  func.func @transform_7(%arg0: i32) -> (i32, i32) {
    %c0_i32 = arith.constant 0 : i32
    %c0_i32_0 = arith.constant 0 : i32
    %c0_i32_1 = arith.constant 0 : i32
    return %c0_i32, %c0_i32_0 : i32, i32
  }
  func.func @transform_8(%arg0: i32) -> (i32, i32) {
    %c0_i32 = arith.constant 0 : i32
    %c0_i32_0 = arith.constant 0 : i32
    %c0_i32_1 = arith.constant 0 : i32
    return %c0_i32, %c0_i32_0 : i32, i32
  }
  func.func @transform_9(%arg0: i32) -> (i32, i32) {
    %c0_i32 = arith.constant 0 : i32
    %c0_i32_0 = arith.constant 0 : i32
    %c0_i32_1 = arith.constant 0 : i32
    return %c0_i32, %c0_i32_0 : i32, i32
  }
  func.func @transform_10(%arg0: i32) -> (i32, i32) {
    %c0_i32 = arith.constant 0 : i32
    %c0_i32_0 = arith.constant 0 : i32
    %c0_i32_1 = arith.constant 0 : i32
    return %c0_i32, %c0_i32_0 : i32, i32
  }
  func.func @transform_11(%arg0: i32) -> (i32, i32) {
    %c0_i32 = arith.constant 0 : i32
    %c0_i32_0 = arith.constant 0 : i32
    %c0_i32_1 = arith.constant 0 : i32
    return %c0_i32, %c0_i32_0 : i32, i32
  }
  func.func @transform_12(%arg0: i32) -> (i32, i32) {
    %c0_i32 = arith.constant 0 : i32
    %c0_i32_0 = arith.constant 0 : i32
    %c0_i32_1 = arith.constant 0 : i32
    return %c0_i32, %c0_i32_0 : i32, i32
  }
  func.func @transform_13(%arg0: i32) -> (i32, i32) {
    %c0_i32 = arith.constant 0 : i32
    %c0_i32_0 = arith.constant 0 : i32
    %c0_i32_1 = arith.constant 0 : i32
    return %c0_i32, %c0_i32_0 : i32, i32
  }
  func.func @transform_14(%arg0: i32) -> (i32, i32) {
    %c0_i32 = arith.constant 0 : i32
    %c0_i32_0 = arith.constant 0 : i32
    %c0_i32_1 = arith.constant 0 : i32
    return %c0_i32, %c0_i32_0 : i32, i32
  }
  func.func @transform_15(%arg0: i32) -> (i32, i32) {
    %c0_i32 = arith.constant 0 : i32
    %c0_i32_0 = arith.constant 0 : i32
    %c0_i32_1 = arith.constant 0 : i32
    return %c0_i32, %c0_i32_0 : i32, i32
  }
  func.func @transform_16(%arg0: i32) -> (i32, i32) {
    %c0_i32 = arith.constant 0 : i32
    %c0_i32_0 = arith.constant 0 : i32
    return %arg0, %c0_i32 : i32, i32
  }
  func.func @transform_17(%arg0: i32) -> (i32, i32) {
    %c0_i32 = arith.constant 0 : i32
    %c0_i32_0 = arith.constant 0 : i32
    return %arg0, %c0_i32 : i32, i32
  }
}

module attributes {stable_mosaic.version = 11 : i64} {
  func.func @_head_kernel(%arg0: i32, %arg1: memref<2x32xf32, #tpu.memory_space<vmem>>, %arg2: memref<2x32xf32, #tpu.memory_space<vmem>>, %arg3: memref<1x32xf32, #tpu.memory_space<vmem>>, %arg4: memref<1x32xf32, #tpu.memory_space<vmem>>, %arg5: memref<32x32xbf16, #tpu.memory_space<vmem>>, %arg6: memref<32x32xbf16, #tpu.memory_space<vmem>>, %arg7: memref<1x32xf32, #tpu.memory_space<vmem>>, %arg8: memref<32x8xbf16, #tpu.memory_space<vmem>>, %arg9: memref<1x8xf32, #tpu.memory_space<vmem>>, %arg10: memref<8x1000xbf16, #tpu.memory_space<vmem>>, %arg11: memref<1x1000xf32, #tpu.memory_space<vmem>>, %arg12: memref<2x1000xf32, #tpu.memory_space<vmem>>) attributes {dimension_semantics = [#tpu.dimension_semantics<arbitrary>], iteration_bounds = array<i64: 1>, scalar_prefetch = 0 : i64, scratch_operands = 0 : i64, tpu.core_type = #tpu.core_type<tc>, window_params = [{pipeline_mode = #tpu.pipeline_mode<synchronous>, transform_indices = @transform_0, window_bounds = array<i64: 2, 32>}, {pipeline_mode = #tpu.pipeline_mode<synchronous>, transform_indices = @transform_1, window_bounds = array<i64: 2, 32>}, {pipeline_mode = #tpu.pipeline_mode<synchronous>, transform_indices = @transform_2, window_bounds = array<i64: 1, 32>}, {pipeline_mode = #tpu.pipeline_mode<synchronous>, transform_indices = @transform_3, window_bounds = array<i64: 1, 32>}, {pipeline_mode = #tpu.pipeline_mode<synchronous>, transform_indices = @transform_4, window_bounds = array<i64: 32, 32>}, {pipeline_mode = #tpu.pipeline_mode<synchronous>, transform_indices = @transform_5, window_bounds = array<i64: 32, 32>}, {pipeline_mode = #tpu.pipeline_mode<synchronous>, transform_indices = @transform_6, window_bounds = array<i64: 1, 32>}, {pipeline_mode = #tpu.pipeline_mode<synchronous>, transform_indices = @transform_7, window_bounds = array<i64: 32, 8>}, {pipeline_mode = #tpu.pipeline_mode<synchronous>, transform_indices = @transform_8, window_bounds = array<i64: 1, 8>}, {pipeline_mode = #tpu.pipeline_mode<synchronous>, transform_indices = @transform_9, window_bounds = array<i64: 8, 1000>}, {pipeline_mode = #tpu.pipeline_mode<synchronous>, transform_indices = @transform_10, window_bounds = array<i64: 1, 1000>}, {pipeline_mode = #tpu.pipeline_mode<synchronous>, transform_indices = @transform_11, window_bounds = array<i64: 2, 1000>}]} {
    %c0 = arith.constant 0 : index
    %c0_0 = arith.constant 0 : index
    %0 = vector.load %arg1[%c0, %c0_0] : memref<2x32xf32, #tpu.memory_space<vmem>>, vector<2x32xf32>
    %c0_1 = arith.constant 0 : index
    %c0_2 = arith.constant 0 : index
    %1 = vector.load %arg3[%c0_1, %c0_2] : memref<1x32xf32, #tpu.memory_space<vmem>>, vector<1x32xf32>
    %c0_3 = arith.constant 0 : index
    %c0_4 = arith.constant 0 : index
    %2 = vector.load %arg4[%c0_3, %c0_4] : memref<1x32xf32, #tpu.memory_space<vmem>>, vector<1x32xf32>
    %cst = arith.constant dense<0.000000e+00> : vector<2xf32>
    %3 = vector.multi_reduction <add>, %0, %cst [1] : vector<2x32xf32> to vector<2xf32>
    %4 = vector.shape_cast %3 : vector<2xf32> to vector<2x1xf32>
    %cst_5 = arith.constant 3.200000e+01 : f32
    %5 = vector.broadcast %cst_5 : f32 to vector<2x1xf32>
    %6 = arith.divf %4, %5 : vector<2x1xf32>
    %7 = vector.broadcast %6 : vector<2x1xf32> to vector<2x32xf32>
    %8 = arith.subf %0, %7 : vector<2x32xf32>
    %9 = arith.mulf %8, %8 : vector<2x32xf32>
    %cst_6 = arith.constant dense<0.000000e+00> : vector<2xf32>
    %10 = vector.multi_reduction <add>, %9, %cst_6 [1] : vector<2x32xf32> to vector<2xf32>
    %11 = vector.shape_cast %10 : vector<2xf32> to vector<2x1xf32>
    %cst_7 = arith.constant 3.200000e+01 : f32
    %12 = vector.broadcast %cst_7 : f32 to vector<2x1xf32>
    %13 = arith.divf %11, %12 : vector<2x1xf32>
    %14 = vector.broadcast %6 : vector<2x1xf32> to vector<2x32xf32>
    %15 = arith.subf %0, %14 : vector<2x32xf32>
    %cst_8 = arith.constant 9.99999974E-6 : f32
    %16 = vector.broadcast %cst_8 : f32 to vector<2x1xf32>
    %17 = arith.addf %13, %16 : vector<2x1xf32>
    %18 = math.rsqrt %17 : vector<2x1xf32>
    %19 = vector.broadcast %18 : vector<2x1xf32> to vector<2x32xf32>
    %20 = arith.mulf %15, %19 : vector<2x32xf32>
    %21 = vector.broadcast %1 : vector<1x32xf32> to vector<2x32xf32>
    %22 = arith.mulf %20, %21 : vector<2x32xf32>
    %23 = vector.broadcast %2 : vector<1x32xf32> to vector<2x32xf32>
    %24 = arith.addf %22, %23 : vector<2x32xf32>
    %c0_9 = arith.constant 0 : index
    %c0_10 = arith.constant 0 : index
    %25 = vector.load %arg2[%c0_9, %c0_10] : memref<2x32xf32, #tpu.memory_space<vmem>>, vector<2x32xf32>
    %c0_11 = arith.constant 0 : index
    %c0_12 = arith.constant 0 : index
    %26 = vector.load %arg3[%c0_11, %c0_12] : memref<1x32xf32, #tpu.memory_space<vmem>>, vector<1x32xf32>
    %c0_13 = arith.constant 0 : index
    %c0_14 = arith.constant 0 : index
    %27 = vector.load %arg4[%c0_13, %c0_14] : memref<1x32xf32, #tpu.memory_space<vmem>>, vector<1x32xf32>
    %cst_15 = arith.constant dense<0.000000e+00> : vector<2xf32>
    %28 = vector.multi_reduction <add>, %25, %cst_15 [1] : vector<2x32xf32> to vector<2xf32>
    %29 = vector.shape_cast %28 : vector<2xf32> to vector<2x1xf32>
    %cst_16 = arith.constant 3.200000e+01 : f32
    %30 = vector.broadcast %cst_16 : f32 to vector<2x1xf32>
    %31 = arith.divf %29, %30 : vector<2x1xf32>
    %32 = vector.broadcast %31 : vector<2x1xf32> to vector<2x32xf32>
    %33 = arith.subf %25, %32 : vector<2x32xf32>
    %34 = arith.mulf %33, %33 : vector<2x32xf32>
    %cst_17 = arith.constant dense<0.000000e+00> : vector<2xf32>
    %35 = vector.multi_reduction <add>, %34, %cst_17 [1] : vector<2x32xf32> to vector<2xf32>
    %36 = vector.shape_cast %35 : vector<2xf32> to vector<2x1xf32>
    %cst_18 = arith.constant 3.200000e+01 : f32
    %37 = vector.broadcast %cst_18 : f32 to vector<2x1xf32>
    %38 = arith.divf %36, %37 : vector<2x1xf32>
    %39 = vector.broadcast %31 : vector<2x1xf32> to vector<2x32xf32>
    %40 = arith.subf %25, %39 : vector<2x32xf32>
    %cst_19 = arith.constant 9.99999974E-6 : f32
    %41 = vector.broadcast %cst_19 : f32 to vector<2x1xf32>
    %42 = arith.addf %38, %41 : vector<2x1xf32>
    %43 = math.rsqrt %42 : vector<2x1xf32>
    %44 = vector.broadcast %43 : vector<2x1xf32> to vector<2x32xf32>
    %45 = arith.mulf %40, %44 : vector<2x32xf32>
    %46 = vector.broadcast %26 : vector<1x32xf32> to vector<2x32xf32>
    %47 = arith.mulf %45, %46 : vector<2x32xf32>
    %48 = vector.broadcast %27 : vector<1x32xf32> to vector<2x32xf32>
    %49 = arith.addf %47, %48 : vector<2x32xf32>
    %c0_20 = arith.constant 0 : index
    %c0_21 = arith.constant 0 : index
    %50 = vector.load %arg5[%c0_20, %c0_21] : memref<32x32xbf16, #tpu.memory_space<vmem>>, vector<32x32xbf16>
    %51 = arith.truncf %24 : vector<2x32xf32> to vector<2x32xbf16>
    %cst_22 = arith.constant dense<0.000000e+00> : vector<2x32xf32>
    %52 = tpu.matmul %51, %50, %cst_22 {dimension_numbers = #tpu.dot_dimension_numbers<[1], [0], [0], [1], [0, 0, 1, 1], [], []>} : vector<2x32xbf16>, vector<32x32xbf16>, vector<2x32xf32> -> vector<2x32xf32>
    %c0_23 = arith.constant 0 : index
    %c0_24 = arith.constant 0 : index
    %53 = vector.load %arg6[%c0_23, %c0_24] : memref<32x32xbf16, #tpu.memory_space<vmem>>, vector<32x32xbf16>
    %54 = arith.truncf %49 : vector<2x32xf32> to vector<2x32xbf16>
    %cst_25 = arith.constant dense<0.000000e+00> : vector<2x32xf32>
    %55 = tpu.matmul %54, %53, %cst_25 {dimension_numbers = #tpu.dot_dimension_numbers<[1], [0], [0], [1], [0, 0, 1, 1], [], []>} : vector<2x32xbf16>, vector<32x32xbf16>, vector<2x32xf32> -> vector<2x32xf32>
    %56 = arith.addf %52, %55 : vector<2x32xf32>
    %c0_26 = arith.constant 0 : index
    %c0_27 = arith.constant 0 : index
    %57 = vector.load %arg7[%c0_26, %c0_27] : memref<1x32xf32, #tpu.memory_space<vmem>>, vector<1x32xf32>
    %58 = vector.broadcast %57 : vector<1x32xf32> to vector<2x32xf32>
    %59 = arith.addf %56, %58 : vector<2x32xf32>
    %cst_28 = arith.constant 0.000000e+00 : f32
    %60 = vector.broadcast %cst_28 : f32 to vector<2x32xf32>
    %61 = arith.maximumf %59, %60 : vector<2x32xf32>
    %c0_29 = arith.constant 0 : index
    %c0_30 = arith.constant 0 : index
    %62 = vector.load %arg8[%c0_29, %c0_30] : memref<32x8xbf16, #tpu.memory_space<vmem>>, vector<32x8xbf16>
    %63 = arith.truncf %61 : vector<2x32xf32> to vector<2x32xbf16>
    %cst_31 = arith.constant dense<0.000000e+00> : vector<2x8xf32>
    %64 = tpu.matmul %63, %62, %cst_31 {dimension_numbers = #tpu.dot_dimension_numbers<[1], [0], [0], [1], [0, 0, 1, 1], [], []>} : vector<2x32xbf16>, vector<32x8xbf16>, vector<2x8xf32> -> vector<2x8xf32>
    %c0_32 = arith.constant 0 : index
    %c0_33 = arith.constant 0 : index
    %65 = vector.load %arg9[%c0_32, %c0_33] : memref<1x8xf32, #tpu.memory_space<vmem>>, vector<1x8xf32>
    %66 = vector.broadcast %65 : vector<1x8xf32> to vector<2x8xf32>
    %67 = arith.addf %64, %66 : vector<2x8xf32>
    %c0_34 = arith.constant 0 : index
    %c0_35 = arith.constant 0 : index
    %68 = vector.load %arg10[%c0_34, %c0_35] : memref<8x1000xbf16, #tpu.memory_space<vmem>>, vector<8x1000xbf16>
    %69 = arith.truncf %67 : vector<2x8xf32> to vector<2x8xbf16>
    %cst_36 = arith.constant dense<0.000000e+00> : vector<2x1000xf32>
    %70 = tpu.matmul %69, %68, %cst_36 {dimension_numbers = #tpu.dot_dimension_numbers<[1], [0], [0], [1], [0, 0, 1, 1], [], []>} : vector<2x8xbf16>, vector<8x1000xbf16>, vector<2x1000xf32> -> vector<2x1000xf32>
    %c0_37 = arith.constant 0 : index
    %c0_38 = arith.constant 0 : index
    %71 = vector.load %arg11[%c0_37, %c0_38] : memref<1x1000xf32, #tpu.memory_space<vmem>>, vector<1x1000xf32>
    %72 = vector.broadcast %71 : vector<1x1000xf32> to vector<2x1000xf32>
    %73 = arith.addf %70, %72 : vector<2x1000xf32>
    %cst_39 = arith.constant 0.000000e+00 : f32
    %74 = vector.broadcast %cst_39 : f32 to vector<2x1000xf32>
    %75 = arith.maximumf %73, %74 : vector<2x1000xf32>
    %c0_40 = arith.constant 0 : index
    %c0_41 = arith.constant 0 : index
    %76 = vector.load %arg12[%c0_40, %c0_41] : memref<2x1000xf32, #tpu.memory_space<vmem>>, vector<2x1000xf32>
    tpu.vector_store %arg12[%c0_40, %c0_41], %75 {strides = array<i32>} : memref<2x1000xf32, #tpu.memory_space<vmem>>, vector<2x1000xf32>,
    return
  }
  func.func @transform_0(%arg0: i32) -> (i32, i32) {
    %c0_i32 = arith.constant 0 : i32
    %c0_i32_0 = arith.constant 0 : i32
    %c0_i32_1 = arith.constant 0 : i32
    return %c0_i32, %c0_i32_0 : i32, i32
  }
  func.func @transform_1(%arg0: i32) -> (i32, i32) {
    %c0_i32 = arith.constant 0 : i32
    %c0_i32_0 = arith.constant 0 : i32
    %c0_i32_1 = arith.constant 0 : i32
    return %c0_i32, %c0_i32_0 : i32, i32
  }
  func.func @transform_2(%arg0: i32) -> (i32, i32) {
    %c0_i32 = arith.constant 0 : i32
    %c0_i32_0 = arith.constant 0 : i32
    %c0_i32_1 = arith.constant 0 : i32
    return %c0_i32, %c0_i32_0 : i32, i32
  }
  func.func @transform_3(%arg0: i32) -> (i32, i32) {
    %c0_i32 = arith.constant 0 : i32
    %c0_i32_0 = arith.constant 0 : i32
    %c0_i32_1 = arith.constant 0 : i32
    return %c0_i32, %c0_i32_0 : i32, i32
  }
  func.func @transform_4(%arg0: i32) -> (i32, i32) {
    %c0_i32 = arith.constant 0 : i32
    %c0_i32_0 = arith.constant 0 : i32
    %c0_i32_1 = arith.constant 0 : i32
    return %c0_i32, %c0_i32_0 : i32, i32
  }
  func.func @transform_5(%arg0: i32) -> (i32, i32) {
    %c0_i32 = arith.constant 0 : i32
    %c0_i32_0 = arith.constant 0 : i32
    %c0_i32_1 = arith.constant 0 : i32
    return %c0_i32, %c0_i32_0 : i32, i32
  }
  func.func @transform_6(%arg0: i32) -> (i32, i32) {
    %c0_i32 = arith.constant 0 : i32
    %c0_i32_0 = arith.constant 0 : i32
    %c0_i32_1 = arith.constant 0 : i32
    return %c0_i32, %c0_i32_0 : i32, i32
  }
  func.func @transform_7(%arg0: i32) -> (i32, i32) {
    %c0_i32 = arith.constant 0 : i32
    %c0_i32_0 = arith.constant 0 : i32
    %c0_i32_1 = arith.constant 0 : i32
    return %c0_i32, %c0_i32_0 : i32, i32
  }
  func.func @transform_8(%arg0: i32) -> (i32, i32) {
    %c0_i32 = arith.constant 0 : i32
    %c0_i32_0 = arith.constant 0 : i32
    %c0_i32_1 = arith.constant 0 : i32
    return %c0_i32, %c0_i32_0 : i32, i32
  }
  func.func @transform_9(%arg0: i32) -> (i32, i32) {
    %c0_i32 = arith.constant 0 : i32
    %c0_i32_0 = arith.constant 0 : i32
    %c0_i32_1 = arith.constant 0 : i32
    return %c0_i32, %c0_i32_0 : i32, i32
  }
  func.func @transform_10(%arg0: i32) -> (i32, i32) {
    %c0_i32 = arith.constant 0 : i32
    %c0_i32_0 = arith.constant 0 : i32
    %c0_i32_1 = arith.constant 0 : i32
    return %c0_i32, %c0_i32_0 : i32, i32
  }
  func.func @transform_11(%arg0: i32) -> (i32, i32) {
    %c0_i32 = arith.constant 0 : i32
    %c0_i32_0 = arith.constant 0 : i32
    %c0_i32_1 = arith.constant 0 : i32
    return %c0_i32, %c0_i32_0 : i32, i32
  }
}

</mosaic_0001>

<bundles_post_ra>
// kernel: transformer_forward.9
= control target key start
LH: loop header
LB: loop body
LE: loop exit
PB: predicated region body
PF: predicated region fallthrough
CT: control target
= control target key end

     0   :  { %s953_s21 = smov 0   ;;  %s1028_s0 = inlined_call_operand.vmem [shape: f32[16,32], index: 0, kind: input, shape index: {}]   ;;  %s1029_s1 = inlined_call_operand.vmem [shape: f32[16,32], index: 1, kind: input, shape index: {}]   ;;  %s1030_s2 = inlined_call_operand.vmem [shape: f32[1,32], index: 2, kind: input, shape index: {}]   ;;  %s1031_s3 = inlined_call_operand.vmem [shape: f32[1,32], index: 3, kind: input, shape index: {}]   ;;  %s1032_s4 = inlined_call_operand.vmem [shape: f32[1,32], index: 4, kind: input, shape index: {}]   ;;  %s1033_s5 = inlined_call_operand.vmem [shape: f32[1,32], index: 5, kind: input, shape index: {}]   ;;  %s1034_s6 = inlined_call_operand.vmem [shape: bf16[32,96], index: 6, kind: input, shape index: {}]   ;;  %s1035_s7 = inlined_call_operand.vmem [shape: bf16[32,96], index: 7, kind: input, shape index: {}]   ;;  %s1036_s8 = inlined_call_operand.vmem [shape: bf16[32,96], index: 8, kind: input, shape index: {}]   ;;  %s1037_s9 = inlined_call_operand.vmem [shape: f32[1,96], index: 9, kind: input, shape index: {}]   ;;  %s1038_s10 = inlined_call_operand.vmem [shape: f32[1,96], index: 10, kind: input, shape index: {}]   ;;  %s1039_s11 = inlined_call_operand.vmem [shape: f32[16,96], index: 11, kind: output, shape index: {0}]   ;;  %s1040_s12 = inlined_call_operand.vmem [shape: f32[16,96], index: 12, kind: output, shape index: {1}]  }
   0x1 LB: > { %s801_s22 = sadd.s32 4294967295, %s884_s21   ;;  %p805_p0 = scmp.ge.s32.totalorder %s884_s21, 1  ;;  %s884_s21 = sphi %s953_s21, %s23_s21  }
   0x2   : > { %p373_p1 = scmp.lt.s32.totalorder %s884_s21, 3 }
   0x4   : > { %p374_p2 = pnand %p805_p0, %p373_p1 }
   0x5   : > { %p421_p3 = scmp.lt.s32.totalorder (!%p374_p2), %s801_s22, 1  ;;  %vm441_vm0 = vcmask (!%p374_p2), 261120   ;;  %v868_v14 = vld [vmem:[%s1034_s6] sm:$0xff] (!%p374_p2)   ;;  %v886_v15 = vmov (!%p374_p2), 0.0   ;;  %v869_v16 = vld [vmem:[%s1034_s6 + $0x8] sm:$0xff] (!%p374_p2)   ;;  %vm887_vm1 = vmmov (!%p374_p2), 0   ;;  %v686_v43 = vlaneseq (!%p374_p2) }
   0x6   : > { %377 = sbr.rel (%p374_p2) target bundleno = 559 (0x22f), region = 64  ;;  %834 = vmatprep.subr.bf16.mxu0 (!%p374_p2), %v886_v15  ;;  %842 = vmatprep.subr.bf16.mxu1 (!%p374_p2), %v886_v15  ;;  %v870_v17 = vld [vmem:[%s1035_s7] sm:$0xff] (!%p374_p2)   ;;  %v872_v18 = vld [vmem:[%s1035_s7 + $0x8] sm:$0xff] (!%p374_p2)   ;;  %vm702_vm2 = vcmask (!%p374_p2), 785408  }
   0x7   : > { %835 = vmatpush3.bf16.msra.mxu0 (!%p374_p2), %v868_v14  ;;  %843 = vmatpush3.bf16.msra.mxu1 (!%p374_p2), %v870_v17  ;;  %v810_v26 = vld [vmem:[%s1030_s2] ss:$0 sm:$0xff] (!%p374_p2)  ;;  %v873_v39 = vld [vmem:[%s1036_s8 + $0x8] sm:$0xff] (!%p374_p2)   ;;  %v687_v44 = vshrl.u32 (!%p374_p2), %v686_v43, 7 }
   0x8   : > { %836 = vmatprep.subr.bf16.mxu0 (!%p374_p2), %v886_v15  ;;  %838 = vmatprep.mubr.msk.bf16.mxu0 (!%p374_p2), %vm887_vm1, %v886_v15  ;;  %v811_v28 = vld [vmem:[%s1031_s3] ss:$0 sm:$0xff] (!%p374_p2) }
   0x9   : > { %844 = vmatprep.subr.bf16.mxu1 (!%p374_p2), %v886_v15  ;;  %846 = vmatprep.mubr.msk.bf16.mxu1 (!%p374_p2), %vm887_vm1, %v886_v15  ;;  %v812_v31 = vld [vmem:[%s1032_s4] ss:$0 sm:$0xff] (!%p374_p2)  ;;  %v688_v48 = vsub.s32 (!%p374_p2), 0, %v687_v44 }
   0xa   : > { %v871_v34 = vld [vmem:[%s1036_s8] sm:$0xff] (!%p374_p2)  }
   0xb   : > { %837 = vmatpush3.bf16.msra.mxu0 (!%p374_p2), %v869_v16  ;;  %845 = vmatpush3.bf16.msra.mxu1 (!%p374_p2), %v872_v18  ;;  %v813_v35 = vld [vmem:[%s1033_s5] ss:$0 sm:$0xff] (!%p374_p2) }
   0xc   : > { %850 = vmatprep.subr.bf16.mxu0 (!%p374_p2), %v886_v15  ;;  %v512_v45 = vld [vmem:[%s1037_s9] sm:$0x1] (!%p374_p2) }
   0xd   : > { %s1042_s22 = smov (!%p421_p3, %s801_s22), 1  ;;  %v513_v46 = vld [vmem:[%s1038_s10] sm:$0x1] }
   0xe   : > { %s961_s23 = sshll.u32 %s1042_s22, 3  ;;  %v684_v47 = vsub.f32 %v512_v45, %v513_v46  ;;  %v694_v57 = vadd.f32 %v513_v46, %v512_v45 }
   0xf   : > { %s424_s26 = scalar_lea.vmem %s1028_s0, %s961_s23  ;;  %s428_s29 = scalar_lea.vmem %s1029_s1, %s961_s23 }
  0x10   : > { %v438_v0 = vld [vmem:[%s424_s26] sm:$0xff]  ;;  %v689_v53 = vrot.slane %v684_v47, %v688_v48  ;;  %s432_s24 = scalar_lea.vmem %s1039_s11, %s961_s23  ;;  %v699_v63 = vrot.slane %v694_v57, %v688_v48  ;;  %s436_s27 = scalar_lea.vmem %s1040_s12, %s961_s23 }
  0x11   : > { %v442_v1 = vsel %vm441_vm0, %v438_v0, 0.0  ;;  %v470_v2 = vld [vmem:[%s428_s29] sm:$0xff] }
  0x12   : > { %443 = vadd.xlane.f32.xlu0 %v442_v1  ;;  %v473_v3 = vsel %vm441_vm0, %v470_v2, 0.0 }
  0x16   : > { %474 = vadd.xlane.f32.xlu0 %v473_v3 }
  0x9f   : > { %v444_v4 = vpop.xlane.xlu0 %443 }
  0xa0   : > { %v446_v5 = vmul.f32 0.03125, %v444_v4 }
  0xa2   : > { %v447_v6 = vsub.f32 %v438_v0, %v446_v5 }
  0xa3   : > { %v475_v7 = vpop.xlane.xlu0 %474 }
  0xa4   : > { %v476_v8 = vmul.f32 0.03125, %v475_v7  ;;  %v448_v9 = vmul.f32 %v447_v6, %v447_v6 }
  0xa6   : > { %v477_v10 = vsub.f32 %v470_v2, %v476_v8  ;;  %v449_v11 = vsel %vm441_vm0, %v448_v9, 0.0 }
  0xa7   : > { %450 = vadd.xlane.f32.xlu1 %v449_v11 }
  0xa8   : > { %v478_v12 = vmul.f32 %v477_v10, %v477_v10 }
  0xaa   : > { %v479_v13 = vsel %vm441_vm0, %v478_v12, 0.0 }
  0xab   : > { %480 = vadd.xlane.f32.xlu1 %v479_v13 }
 0x134   : > { %v451_v19 = vpop.xlane.xlu1 %450 }
 0x135   : > { %v452_v20 = vmul.f32 0.03125, %v451_v19 }
 0x137   : > { %v453_v21 = vadd.f32 1e-05, %v452_v20 }
 0x138   : > { %v481_v22 = vpop.xlane.xlu1 %480 }
 0x139   : > { %874 = vrsqrt.f32 %v453_v21  ;;  %v482_v23 = vmul.f32 0.03125, %v481_v22 }
 0x13b   : > { %v483_v24 = vadd.f32 1e-05, %v482_v23 }
 0x13d   : > { %876 = vrsqrt.f32 %v483_v24 }
 0x143   : > { %v875_v25 = vpop.eup %874 }
 0x144   : > { %v455_v27 = vmul.f32 %v875_v25, %v447_v6 }
 0x146   : > { %v462_v29 = vmul.f32 %v810_v26, %v455_v27 }
 0x147   : > { %v877_v30 = vpop.eup %876 }
 0x148   : > { %v485_v32 = vmul.f32 %v877_v30, %v477_v10  ;;  %v469_v33 = vadd.f32 %v811_v28, %v462_v29 }
 0x14a   : > { %v514_v36 = vpack.c.bf16 %v469_v33, %v469_v33  ;;  %v492_v37 = vmul.f32 %v812_v31, %v485_v32 }
 0x14c   : > { %839 = vmatmul.mubr.msk.bf16.vlgmr.msra.gmra.mrb[0].mxu0 %vm441_vm0, %v514_v36  ;;  %v499_v38 = vadd.f32 %v813_v35, %v492_v37 }
 0x14d   : > { %851 = vmatpush3.bf16.msra.mxu0 %v871_v34  ;;  %854 = vmatprep.mubr.msk.bf16.mxu0 %vm887_vm1, %v886_v15 }
 0x14e   : > { %852 = vmatprep.subr.bf16.mxu0 %v886_v15  ;;  %v570_v40 = vpack.c.bf16 %v499_v38, %v499_v38  ;;  %v626_v41 = vadd.f32 %v499_v38, %v469_v33 }
 0x150   : > { %847 = vmatmul.mubr.msk.bf16.vlgmr.msra.gmra.mrb[0].mxu1 %vm441_vm0, %v570_v40  ;;  %v627_v42 = vpack.c.bf16 %v626_v41, %v626_v41 }
 0x151   : > { %853 = vmatpush3.bf16.msra.mxu0 %v873_v39 }
 0x154   : > { %855 = vmatmul.mubr.msk.bf16.vlgmr.msra.gmra.mrb[4].mxu0 %vm441_vm0, %v627_v42 }
 0x21f   : > { %v564_v49 = vpop.f32.mrb[0].mxu0 }
 0x220   : > { %v840_v50 = vpop.f32.mrb[1].mxu0 }
 0x221   : > { %v567_v51 = vpop.f32.mrb[2].mxu0 }
 0x222   : > { %v841_v52 = vpop.f32.mrb[3].mxu0 }
 0x223   : > { %v620_v54 = vpop.f32.mrb[0].mxu1 }
 0x224   : > { %v683_v55 = vsub.f32 %v564_v49, %v620_v54  ;;  %v848_v56 = vpop.f32.mrb[1].mxu1 }
 0x225   : > { %v623_v58 = vpop.f32.mrb[2].mxu1 }
 0x226   : > { %v691_v59 = vadd.f32 %v689_v53, %v683_v55  ;;  %v849_v60 = vpop.f32.mrb[3].mxu1 }
 0x227   : > { %v677_v61 = vpop.f32.mrb[4].mxu0 }
 0x228   : > { %703 = vst.msk [vmem:[%s432_s24] sm:$0xff] %vm702_vm2, %v691_v59  ;;  %v692_v62 = vsub.f32 %v677_v61, %v564_v49  ;;  %v856_v0 = vpop.f32.mrb[5].mxu0 }
 0x229   : > { %v680_v1 = vpop.f32.mrb[6].mxu0 }
 0x22a   : > { %v693_v2 = vsub.f32 %v692_v62, %v620_v54  ;;  %v857_v3 = vpop.f32.mrb[7].mxu0 }
 0x22c   : > { %v701_v4 = vadd.f32 %v699_v63, %v693_v2 }
 0x22e   : > { %704 = vst.msk [vmem:[%s436_s27] sm:$0xff] %vm702_vm2, %v701_v4 }
 0x22f PF: > { %s23_s21 = sadd.s32 1, %s884_s21  }
 0x230   : > { %p20_p4 = scmp.ge.s32.totalorder %s23_s21, 4  }
 0x232   :  { %22 = sbr.rel (!%p20_p4) target bundleno = 1 (0x1), region = 109 }

// kernel: transformer_forward.11
= control target key start
LH: loop header
LB: loop body
LE: loop exit
PB: predicated region body
PF: predicated region fallthrough
CT: control target
= control target key end

     0   :  { %s1588_s24 = smov 0   ;;  %s1798_s0 = inlined_call_operand.vmem [shape: f32[16,32], index: 0, kind: input, shape index: {}]   ;;  %s1799_s1 = inlined_call_operand.vmem [shape: f32[16,32], index: 1, kind: input, shape index: {}]   ;;  %s1800_s2 = inlined_call_operand.vmem [shape: f32[1,32], index: 2, kind: input, shape index: {}]   ;;  %s1801_s3 = inlined_call_operand.vmem [shape: f32[1,32], index: 3, kind: input, shape index: {}]   ;;  %s1802_s4 = inlined_call_operand.vmem [shape: f32[1,32], index: 4, kind: input, shape index: {}]   ;;  %s1803_s5 = inlined_call_operand.vmem [shape: f32[1,32], index: 5, kind: input, shape index: {}]   ;;  %s1804_s6 = inlined_call_operand.vmem [shape: bf16[32,128], index: 6, kind: input, shape index: {}]   ;;  %s1805_s7 = inlined_call_operand.vmem [shape: bf16[32,128], index: 7, kind: input, shape index: {}]   ;;  %s1806_s8 = inlined_call_operand.vmem [shape: bf16[32,128], index: 8, kind: input, shape index: {}]   ;;  %s1807_s9 = inlined_call_operand.vmem [shape: f32[1,128], index: 9, kind: input, shape index: {}]   ;;  %s1808_s10 = inlined_call_operand.vmem [shape: f32[1,128], index: 10, kind: input, shape index: {}]   ;;  %s1809_s11 = inlined_call_operand.vmem [shape: bf16[128,32], index: 11, kind: input, shape index: {}]   ;;  %s1810_s12 = inlined_call_operand.vmem [shape: bf16[128,32], index: 12, kind: input, shape index: {}]   ;;  %s1811_s13 = inlined_call_operand.vmem [shape: bf16[128,32], index: 13, kind: input, shape index: {}]   ;;  %s1812_s14 = inlined_call_operand.vmem [shape: f32[1,32], index: 14, kind: input, shape index: {}]   ;;  %s1813_s15 = inlined_call_operand.vmem [shape: f32[1,32], index: 15, kind: input, shape index: {}]   ;;  %s1814_s16 = inlined_call_operand.vmem [shape: f32[16,32], index: 16, kind: output, shape index: {0}]   ;;  %s1815_s17 = inlined_call_operand.vmem [shape: f32[16,32], index: 17, kind: output, shape index: {1}]  }
   0x1   :  { %1816 = sst [smem:[#allocation2_spill]] %s1798_s0 }
   0x2   :  { %1817 = sst [smem:[#allocation3_spill]] %s1799_s1 }
   0x3 LB: > { %s1276_s25 = sadd.s32 4294967295, %s1494_s24   ;;  %p1280_p0 = scmp.ge.s32.totalorder %s1494_s24, 1  ;;  %s1494_s24 = sphi %s1588_s24, %s28_s24  }
   0x4   : > { %p498_p1 = scmp.lt.s32.totalorder %s1494_s24, 3 }
   0x6   : > { %p499_p2 = pnand %p1280_p0, %p498_p1 }
   0x7   : > { %p556_p3 = scmp.lt.s32.totalorder (!%p499_p2), %s1276_s25, 1  ;;  %vm577_vm0 = vcmask (!%p499_p2), 261120   ;;  %s1818_s29 = sld [smem:[#allocation2_spill]] (!%p499_p2)  ;;  %v1454_v14 = vld [vmem:[%s1804_s6] sm:$0xff] (!%p499_p2)   ;;  %v1496_v15 = vmov (!%p499_p2), 0.0   ;;  %v1455_v16 = vld [vmem:[%s1804_s6 + $0x8] sm:$0xff] (!%p499_p2)   ;;  %v821_v59 = vlaneseq (!%p499_p2) }
   0x8   : > { %502 = sbr.rel (%p499_p2) target bundleno = 815 (0x32f), region = 84  ;;  %s1819_s19 = sld [smem:[#allocation3_spill]] (!%p499_p2)  ;;  %1360 = vmatprep.subr.bf16.mxu0 (!%p499_p2), %v1496_v15  ;;  %1384 = vmatprep.subr.bf16.mxu1 (!%p499_p2), %v1496_v15  ;;  %vm1497_vm1 = vmmov (!%p499_p2), 0   ;;  %v1460_v17 = vld [vmem:[%s1809_s11] sm:$0xff] (!%p499_p2)   ;;  %v1461_v18 = vld [vmem:[%s1809_s11 + $0x8] sm:$0xff] (!%p499_p2)   ;;  %v1462_v19 = vld [vmem:[%s1809_s11 + $0x10] sm:$0xff] (!%p499_p2)  }
   0x9   : > { %1361 = vmatpush3.bf16.msra.mxu0 (!%p499_p2), %v1454_v14  ;;  %1364 = vmatprep.mubr.msk.bf16.mxu0 (!%p499_p2), %vm1497_vm1, %v1496_v15  ;;  %v1464_v20 = vld [vmem:[%s1809_s11 + $0x18] sm:$0xff] (!%p499_p2)   ;;  %v1285_v28 = vld [vmem:[%s1800_s2] ss:$0 sm:$0xff] (!%p499_p2)  ;;  %v1457_v40 = vld [vmem:[%s1805_s7 + $0x8] sm:$0xff] (!%p499_p2)   ;;  %v822_v60 = vshrl.u32 (!%p499_p2), %v821_v59, 7 }
   0xa   : > { %1362 = vmatprep.subr.bf16.mxu0 (!%p499_p2), %v1496_v15  ;;  %1400 = vmatprep.mubr.msk.bf16.mxu1 (!%p499_p2), %vm1497_vm1, %v1496_v15  ;;  %v1286_v30 = vld [vmem:[%s1801_s3] ss:$0 sm:$0xff] (!%p499_p2)  ;;  %v1459_v44 = vld [vmem:[%s1806_s8 + $0x8] sm:$0xff] (!%p499_p2)   ;;  %v1467_v50 = vld [vmem:[%s1810_s12 + $0x10] sm:$0xff] (!%p499_p2)  }
   0xb   : > { %1385 = vmatpush3.bf16.msra.mxu1 (!%p499_p2), %v1460_v17  ;;  %v1287_v33 = vld [vmem:[%s1802_s4] ss:$0 sm:$0xff] (!%p499_p2)  ;;  %v1465_v48 = vld [vmem:[%s1810_s12 + $0x8] sm:$0xff] (!%p499_p2)   ;;  %v1469_v52 = vld [vmem:[%s1810_s12 + $0x18] sm:$0xff] (!%p499_p2)  }
   0xc   : > { %1386 = vmatprep.subr.bf16.mxu1 (!%p499_p2), %v1496_v15  ;;  %v1456_v36 = vld [vmem:[%s1805_s7] sm:$0xff] (!%p499_p2)   ;;  %v1468_v51 = vld [vmem:[%s1809_s11 + $0x28] sm:$0xff] (!%p499_p2)   ;;  %v1470_v53 = vld [vmem:[%s1809_s11 + $0x30] sm:$0xff] (!%p499_p2)  }
   0xd   : > { %1363 = vmatpush3.bf16.msra.mxu0 (!%p499_p2), %v1455_v16  ;;  %v1288_v39 = vld [vmem:[%s1803_s5] ss:$0 sm:$0xff] (!%p499_p2)  ;;  %v1472_v55 = vld [vmem:[%s1809_s11 + $0x38] sm:$0xff] (!%p499_p2)   ;;  %v1473_v56 = vld [vmem:[%s1810_s12 + $0x28] sm:$0xff] (!%p499_p2)  }
   0xe   : > { %1368 = vmatprep.subr.bf16.mxu0 (!%p499_p2), %v1496_v15  ;;  %v1458_v42 = vld [vmem:[%s1806_s8] sm:$0xff] (!%p499_p2)   ;;  %v1475_v57 = vld [vmem:[%s1810_s12 + $0x30] sm:$0xff] (!%p499_p2)   ;;  %v1477_v58 = vld [vmem:[%s1810_s12 + $0x38] sm:$0xff] (!%p499_p2)  }
   0xf   : > { %s1821_s25 = smov (!%p556_p3, %s1276_s25), 1  ;;  %1387 = vmatpush3.bf16.msra.mxu1 %v1461_v18  ;;  %v1463_v46 = vld [vmem:[%s1810_s12] sm:$0xff]  }
  0x10   : > { %s1596_s26 = sshll.u32 %s1821_s25, 3  ;;  %1388 = vmatprep.subr.bf16.mxu1 %v1496_v15  ;;  %v1466_v49 = vld [vmem:[%s1809_s11 + $0x20] sm:$0xff]  }
  0x11   : > { %s559_s0 = scalar_lea.vmem %s1818_s29, %s1596_s26  ;;  %s563_s1 = scalar_lea.vmem %s1819_s19, %s1596_s26  ;;  %v1471_v54 = vld [vmem:[%s1810_s12 + $0x20] sm:$0xff]  }
  0x12   : > { %v1602_v0 = vld [vmem:[%s559_s0] sm:$0xff]  ;;  %s567_s20 = scalar_lea.vmem %s1814_s16, %s1596_s26  ;;  %s571_s23 = scalar_lea.vmem %s1815_s17, %s1596_s26 }
  0x13   : > { %v578_v1 = vsel %vm577_vm0, %v1602_v0, 0.0  ;;  %v1610_v2 = vld [vmem:[%s563_s1] sm:$0xff]  ;;  %1389 = vmatpush3.bf16.msra.mxu1 %v1462_v19 }
  0x14   : > { %579 = vadd.xlane.f32.xlu0 %v578_v1  ;;  %v608_v3 = vsel %vm577_vm0, %v1610_v2, 0.0  ;;  %1390 = vmatprep.subr.bf16.mxu1 %v1496_v15  ;;  %v647_v62 = vld [vmem:[%s1807_s9] sm:$0x1] }
  0x15   : > { %v648_v63 = vld [vmem:[%s1808_s10] sm:$0x1] }
  0x16   : > { %v829_v16 = vadd.f32 %v648_v63, %v647_v62  ;;  %v1474_v17 = vld [vmem:[%s1811_s13] sm:$0xff]  }
  0x17   : > { %1391 = vmatpush3.bf16.msra.mxu1 %v1464_v20 }
  0x18   : > { %609 = vadd.xlane.f32.xlu0 %v608_v3  ;;  %1392 = vmatprep.subr.bf16.mxu1 %v1496_v15 }
  0x1b   : > { %1393 = vmatpush3.bf16.msra.mxu1 %v1466_v49 }
  0x1c   : > { %1394 = vmatprep.subr.bf16.mxu1 %v1496_v15 }
  0x1f   : > { %1395 = vmatpush3.bf16.msra.mxu1 %v1468_v51 }
  0x20   : > { %1396 = vmatprep.subr.bf16.mxu1 %v1496_v15 }
  0x23   : > { %1397 = vmatpush3.bf16.msra.mxu1 %v1470_v53 }
  0x24   : > { %1398 = vmatprep.subr.bf16.mxu1 %v1496_v15 }
  0x27   : > { %1399 = vmatpush3.bf16.msra.mxu1 %v1472_v55 }
  0x28   : > { %1424 = vmatprep.subr.bf16.mxu1 %v1496_v15 }
  0xa1   : > { %v580_v4 = vpop.xlane.xlu0 %579 }
  0xa2   : > { %v582_v5 = vmul.f32 0.03125, %v580_v4 }
  0xa4   : > { %v583_v6 = vsub.f32 %v1602_v0, %v582_v5  ;;  %v819_v5 = vsub.f32 %v647_v62, %v648_v63 }
  0xa5   : > { %v610_v7 = vpop.xlane.xlu0 %609 }
  0xa6   : > { %v611_v8 = vmul.f32 0.03125, %v610_v7  ;;  %v584_v9 = vmul.f32 %v583_v6, %v583_v6 }
  0xa8   : > { %v612_v10 = vsub.f32 %v1610_v2, %v611_v8  ;;  %v585_v11 = vsel %vm577_vm0, %v584_v9, 0.0 }
  0xa9   : > { %586 = vadd.xlane.f32.xlu1 %v585_v11 }
  0xaa   : > { %v613_v12 = vmul.f32 %v612_v10, %v612_v10 }
  0xac   : > { %v614_v13 = vsel %vm577_vm0, %v613_v12, 0.0 }
  0xad   : > { %615 = vadd.xlane.f32.xlu1 %v614_v13 }
 0x136   : > { %v587_v21 = vpop.xlane.xlu1 %586 }
 0x137   : > { %v588_v22 = vmul.f32 0.03125, %v587_v21 }
 0x139   : > { %v589_v23 = vadd.f32 1e-05, %v588_v22 }
 0x13a   : > { %v616_v24 = vpop.xlane.xlu1 %615 }
 0x13b   : > { %1484 = vrsqrt.f32 %v589_v23  ;;  %v617_v25 = vmul.f32 0.03125, %v616_v24  ;;  %v1476_v24 = vld [vmem:[%s1811_s13 + $0x8] sm:$0xff]  }
 0x13d   : > { %v618_v26 = vadd.f32 1e-05, %v617_v25 }
 0x13f   : > { %1486 = vrsqrt.f32 %v618_v26 }
 0x145   : > { %v1485_v27 = vpop.eup %1484 }
 0x146   : > { %v591_v29 = vmul.f32 %v1485_v27, %v583_v6  ;;  %v1738_v6 = vsub.s32 0, %v822_v60 }
 0x148   : > { %v598_v31 = vmul.f32 %v1285_v28, %v591_v29  ;;  %v824_v7 = vrot.slane %v819_v5, %v1738_v6  ;;  %v834_v21 = vrot.slane %v829_v16, %v1738_v6  ;;  %v1478_v28 = vld [vmem:[%s1811_s13 + $0x10] sm:$0xff]  }
 0x149   : > { %v1487_v32 = vpop.eup %1486 }
 0x14a   : > { %v620_v34 = vmul.f32 %v1487_v32, %v612_v10  ;;  %v605_v35 = vadd.f32 %v1286_v30, %v598_v31  ;;  %v1479_v32 = vld [vmem:[%s1811_s13 + $0x18] sm:$0xff]  }
 0x14c   : > { %v627_v37 = vmul.f32 %v1287_v33, %v620_v34  ;;  %v649_v38 = vpack.c.bf16 %v605_v35, %v605_v35  ;;  %v1480_v33 = vld [vmem:[%s1811_s13 + $0x20] sm:$0xff]   ;;  %v1481_v34 = vld [vmem:[%s1811_s13 + $0x28] sm:$0xff]  }
 0x14e   : > { %1365 = vmatmul.mubr.msk.bf16.vlgmr.msra.gmra.mrb[0].mxu0 %vm577_vm0, %v649_v38  ;;  %v634_v41 = vadd.f32 %v1288_v39, %v627_v37 }
 0x14f   : > { %1369 = vmatpush3.bf16.msra.mxu0 %v1456_v36  ;;  %1372 = vmatprep.mubr.msk.bf16.mxu0 %vm1497_vm1, %v1496_v15  ;;  %v1483_v36 = vld [vmem:[%s1811_s13 + $0x38] sm:$0xff]  }
 0x150   : > { %1370 = vmatprep.subr.bf16.mxu0 %v1496_v15  ;;  %v705_v43 = vpack.c.bf16 %v634_v41, %v634_v41  ;;  %v761_v45 = vadd.f32 %v634_v41, %v605_v35  ;;  %v1482_v35 = vld [vmem:[%s1811_s13 + $0x30] sm:$0xff]   ;;  %v887_v41 = vld [vmem:[%s1812_s14] sm:$0x1] }
 0x152   : > { %v762_v47 = vpack.c.bf16 %v761_v45, %v761_v45 }
 0x153   : > { %1371 = vmatpush3.bf16.msra.mxu0 %v1457_v40 }
 0x154   : > { %1376 = vmatprep.subr.bf16.mxu0 %v1496_v15 }
 0x156   : > { %1373 = vmatmul.mubr.msk.bf16.vlgmr.msra.gmra.mrb[4].mxu0 %vm577_vm0, %v705_v43 }
 0x157   : > { %1377 = vmatpush3.bf16.msra.mxu0 %v1458_v42  ;;  %1380 = vmatprep.mubr.msk.bf16.mxu0 %vm1497_vm1, %v1496_v15  ;;  %v888_v42 = vld [vmem:[%s1813_s15] sm:$0x1] }
 0x158   : > { %1378 = vmatprep.subr.bf16.mxu0 %v1496_v15 }
 0x15b   : > { %1379 = vmatpush3.bf16.msra.mxu0 %v1459_v44  ;;  %v1158_v44 = vsub.f32 %v887_v41, %v888_v42 }
 0x15c   : > { %1404 = vmatprep.subr.bf16.mxu0 %v1496_v15 }
 0x15d   : > { %v1163_v45 = vrot.slane %v1158_v44, %v1738_v6 }
 0x15e   : > { %1381 = vmatmul.mubr.msk.bf16.vlgmr.msra.gmra.mrb[8].mxu0 %vm577_vm0, %v762_v47 }
 0x15f   : > { %1405 = vmatpush3.bf16.msra.mxu0 %v1463_v46  ;;  %1420 = vmatprep.mubr.msk.bf16.mxu0 %vm1497_vm1, %v1496_v15 }
 0x160   : > { %1406 = vmatprep.subr.bf16.mxu0 %v1496_v15 }
 0x163   : > { %1407 = vmatpush3.bf16.msra.mxu0 %v1465_v48 }
 0x164   : > { %1408 = vmatprep.subr.bf16.mxu0 %v1496_v15 }
 0x167   : > { %1409 = vmatpush3.bf16.msra.mxu0 %v1467_v50 }
 0x168   : > { %1410 = vmatprep.subr.bf16.mxu0 %v1496_v15 }
 0x16b   : > { %1411 = vmatpush3.bf16.msra.mxu0 %v1469_v52  ;;  %v1168_v52 = vadd.f32 %v888_v42, %v887_v41 }
 0x16c   : > { %1412 = vmatprep.subr.bf16.mxu0 %v1496_v15 }
 0x16d   : > { %v1173_v55 = vrot.slane %v1168_v52, %v1738_v6 }
 0x16f   : > { %1413 = vmatpush3.bf16.msra.mxu0 %v1471_v54 }
 0x170   : > { %1414 = vmatprep.subr.bf16.mxu0 %v1496_v15 }
 0x173   : > { %1415 = vmatpush3.bf16.msra.mxu0 %v1473_v56 }
 0x174   : > { %1416 = vmatprep.subr.bf16.mxu0 %v1496_v15 }
 0x177   : > { %1417 = vmatpush3.bf16.msra.mxu0 %v1475_v57 }
 0x178   : > { %1418 = vmatprep.subr.bf16.mxu0 %v1496_v15 }
 0x17b   : > { %1419 = vmatpush3.bf16.msra.mxu0 %v1477_v58 }
 0x221   : > { %v699_v61 = vpop.f32.mrb[0].mxu0 }
 0x222   : > { %v1366_v1 = vpop.f32.mrb[1].mxu0 }
 0x223   : > { %v702_v3 = vpop.f32.mrb[2].mxu0 }
 0x224   : > { %v1367_v4 = vpop.f32.mrb[3].mxu0 }
 0x229   : > { %v755_v8 = vpop.f32.mrb[4].mxu0 }
 0x22a   : > { %v818_v9 = vsub.f32 %v699_v61, %v755_v8  ;;  %v1374_v10 = vpop.f32.mrb[5].mxu0 }
 0x22b   : > { %v758_v11 = vpop.f32.mrb[6].mxu0 }
 0x22c   : > { %v826_v12 = vadd.f32 %v824_v7, %v818_v9  ;;  %v1375_v13 = vpop.f32.mrb[7].mxu0 }
 0x22e   : > { %v837_v14 = vmax.f32 %v826_v12, 0.0 }
 0x230   : > { %v889_v18 = vpack.c.bf16 %v837_v14, %v837_v14 }
 0x231   : > { %v812_v19 = vpop.f32.mrb[8].mxu0 }
 0x232   : > { %v827_v20 = vsub.f32 %v812_v19, %v699_v61  ;;  %v1382_v22 = vpop.f32.mrb[9].mxu0  ;;  %1401 = vmatmul.mubr.bf16.vlgmr.msra.gmra.mrb[0].mxu1 %v889_v18 }
 0x233   : > { %1425 = vmatpush3.bf16.msra.mxu1 %v1474_v17  ;;  %v815_v23 = vpop.f32.mrb[10].mxu0  ;;  %1440 = vmatprep.mubr.msk.bf16.mxu1 %vm1497_vm1, %v1496_v15 }
 0x234   : > { %v828_v25 = vsub.f32 %v827_v20, %v755_v8  ;;  %v1383_v26 = vpop.f32.mrb[11].mxu0  ;;  %1426 = vmatprep.subr.bf16.mxu1 %v1496_v15 }
 0x236   : > { %v836_v27 = vadd.f32 %v834_v21, %v828_v25 }
 0x237   : > { %1427 = vmatpush3.bf16.msra.mxu1 %v1476_v24 }
 0x238   : > { %v838_v29 = vmax.f32 %v836_v27, 0.0  ;;  %1428 = vmatprep.subr.bf16.mxu1 %v1496_v15 }
 0x23a   : > { %v978_v30 = vpack.c.bf16 %v838_v29, %v838_v29  ;;  %v1067_v31 = vadd.f32 %v838_v29, %v837_v14 }
 0x23b   : > { %1429 = vmatpush3.bf16.msra.mxu1 %v1478_v28 }
 0x23c   : > { %1421 = vmatmul.mubr.bf16.vlgmr.msra.gmra.mrb[12].mxu0 %v978_v30  ;;  %1430 = vmatprep.subr.bf16.mxu1 %v1496_v15  ;;  %v1068_v37 = vpack.c.bf16 %v1067_v31, %v1067_v31 }
 0x23f   : > { %1431 = vmatpush3.bf16.msra.mxu1 %v1479_v32 }
 0x240   : > { %1432 = vmatprep.subr.bf16.mxu1 %v1496_v15 }
 0x243   : > { %1433 = vmatpush3.bf16.msra.mxu1 %v1480_v33 }
 0x244   : > { %1434 = vmatprep.subr.bf16.mxu1 %v1496_v15 }
 0x247   : > { %1435 = vmatpush3.bf16.msra.mxu1 %v1481_v34 }
 0x248   : > { %1436 = vmatprep.subr.bf16.mxu1 %v1496_v15 }
 0x24b   : > { %1437 = vmatpush3.bf16.msra.mxu1 %v1482_v35 }
 0x24c   : > { %1438 = vmatprep.subr.bf16.mxu1 %v1496_v15 }
 0x24f   : > { %1439 = vmatpush3.bf16.msra.mxu1 %v1483_v36 }
 0x252   : > { %1441 = vmatmul.mubr.bf16.vlgmr.msra.gmra.mrb[4].mxu1 %v1068_v37 }
 0x305   : > { %v972_v38 = vpop.f32.mrb[0].mxu1 }
 0x306   : > { %v1402_v39 = vpop.f32.mrb[1].mxu1 }
 0x307   : > { %v975_v40 = vpop.f32.mrb[2].mxu1 }
 0x308   : > { %v1403_v43 = vpop.f32.mrb[3].mxu1 }
 0x30f   : > { %v1061_v15 = vpop.f32.mrb[12].mxu0 }
 0x310   : > { %v1157_v46 = vsub.f32 %v972_v38, %v1061_v15  ;;  %v1422_v47 = vpop.f32.mrb[13].mxu0 }
 0x311   : > { %v1064_v48 = vpop.f32.mrb[14].mxu0 }
 0x312   : > { %v1165_v49 = vadd.f32 %v1163_v45, %v1157_v46  ;;  %v1423_v50 = vpop.f32.mrb[15].mxu0 }
 0x314   : > { %v1176_v51 = vadd.f32 %v1165_v49, %v1602_v0 }
 0x316   : > { %1177 = vst.msk [vmem:[%s567_s20] sm:$0xff] %vm577_vm0, %v1176_v51 }
 0x325   : > { %v1151_v53 = vpop.f32.mrb[4].mxu1 }
 0x326   : > { %v1166_v54 = vsub.f32 %v1151_v53, %v972_v38  ;;  %v1442_v56 = vpop.f32.mrb[5].mxu1 }
 0x327   : > { %v1154_v57 = vpop.f32.mrb[6].mxu1 }
 0x328   : > { %v1167_v58 = vsub.f32 %v1166_v54, %v1061_v15  ;;  %v1443_v59 = vpop.f32.mrb[7].mxu1 }
 0x32a   : > { %v1175_v60 = vadd.f32 %v1173_v55, %v1167_v58 }
 0x32c   : > { %v1178_v61 = vadd.f32 %v1175_v60, %v1610_v2 }
 0x32e   : > { %1179 = vst.msk [vmem:[%s571_s23] sm:$0xff] %vm577_vm0, %v1178_v61 }
 0x32f PF: > { %s28_s24 = sadd.s32 1, %s1494_s24  }
 0x330   : > { %p25_p4 = scmp.ge.s32.totalorder %s28_s24, 4  }
 0x332   :  { %27 = sbr.rel (!%p25_p4) target bundleno = 3 (0x3), region = 129 }

// kernel: transformer_forward.8
= control target key start
LH: loop header
LB: loop body
LE: loop exit
PB: predicated region body
PF: predicated region fallthrough
CT: control target
= control target key end

     0   :  { %s2359_s25 = smov 0   ;;  %s2754_s0 = inlined_call_operand.vmem [shape: f32[16,16], index: 0, kind: input, shape index: {}]   ;;  %s2755_s1 = inlined_call_operand.vmem [shape: f32[16,16], index: 1, kind: input, shape index: {}]   ;;  %s2756_s2 = inlined_call_operand.vmem [shape: bf16[16,512], index: 2, kind: input, shape index: {}]   ;;  %s2757_s3 = inlined_call_operand.vmem [shape: f32[1,512], index: 3, kind: input, shape index: {}]   ;;  %s2758_s4 = inlined_call_operand.vmem [shape: bf16[16,512], index: 4, kind: input, shape index: {}]   ;;  %s2759_s5 = inlined_call_operand.vmem [shape: f32[1,512], index: 5, kind: input, shape index: {}]   ;;  %s2760_s6 = inlined_call_operand.vmem [shape: bf16[512,32], index: 6, kind: input, shape index: {}]   ;;  %s2761_s7 = inlined_call_operand.vmem [shape: bf16[512,32], index: 7, kind: input, shape index: {}]   ;;  %s2762_s8 = inlined_call_operand.vmem [shape: bf16[512,32], index: 8, kind: input, shape index: {}]   ;;  %s2763_s9 = inlined_call_operand.vmem [shape: f32[1,32], index: 9, kind: input, shape index: {}]   ;;  %s2764_s10 = inlined_call_operand.vmem [shape: f32[1,32], index: 10, kind: input, shape index: {}]   ;;  %s2765_s11 = inlined_call_operand.vmem [shape: f32[16,32], index: 11, kind: input, shape index: {}]   ;;  %s2766_s12 = inlined_call_operand.vmem [shape: f32[16,32], index: 12, kind: output, shape index: {0}]   ;;  %s2767_s13 = inlined_call_operand.vmem [shape: f32[16,32], index: 13, kind: output, shape index: {1}]  }
   0x1 LB: > { %s1911_s26 = sadd.s32 4294967295, %s2286_s25   ;;  %p1915_p0 = scmp.ge.s32.totalorder %s2286_s25, 1  ;;  %s2286_s25 = sphi %s2359_s25, %s24_s25  }
   0x2   : > { %p407_p1 = scmp.lt.s32.totalorder %s2286_s25, 3 }
   0x4   : > { %p408_p2 = pnand %p1915_p0, %p407_p1 }
   0x5   : > { %v2172_v0 = vld [vmem:[%s2756_s2 + $0x4] ss:$16 sps:$4 sm:$0xff] (!%p408_p2)   ;;  %p461_p3 = scmp.lt.s32.totalorder (!%p408_p2), %s1911_s26, 1  ;;  %v2174_v1 = vld [vmem:[%s2756_s2 + $0xc] ss:$16 sps:$4 sm:$0xff] (!%p408_p2)   ;;  %v2288_v2 = vmov (!%p408_p2), 0   ;;  %v490_v47 = vlaneseq (!%p408_p2) }
   0x6   : > { %411 = sbr.rel (%p408_p2) target bundleno = 530 (0x212), region = 68  ;;  %566 = vmatprep.mubr.bf16.mxu0 (!%p408_p2), %v2288_v2  ;;  %607 = vmatprep.mubr.bf16.mxu1 (!%p408_p2), %v2288_v2  ;;  %v2176_v3 = vld [vmem:[%s2756_s2] ss:$16 sps:$4 sm:$0xff] (!%p408_p2)   ;;  %v2177_v4 = vld [vmem:[%s2756_s2 + $0x8] ss:$16 sps:$4 sm:$0xff] (!%p408_p2)   ;;  %vm530_vm0 = vcmask (!%p408_p2), 130048  }
   0x7   : > { %534 = vmatprep.subr.bf16.mxu0 (!%p408_p2), %v2172_v0  ;;  %575 = vmatprep.subr.bf16.mxu1 (!%p408_p2), %v2174_v1  ;;  %v2180_v5 = vld [vmem:[%s2758_s4 + $0x4] ss:$16 sps:$4 sm:$0xff] (!%p408_p2)   ;;  %v2183_v6 = vld [vmem:[%s2758_s4 + $0xc] ss:$16 sps:$4 sm:$0xff] (!%p408_p2)   ;;  %v2178_v8 = vld [vmem:[%s2758_s4] ss:$16 sps:$4 sm:$0xff] (!%p408_p2)  }
   0x8   : > { %535 = vmatpush1.bf16.msra.mxu0 (!%p408_p2), %v2176_v3  ;;  %576 = vmatpush1.bf16.msra.mxu1 (!%p408_p2), %v2177_v4  ;;  %v2181_v9 = vld [vmem:[%s2758_s4 + $0x8] ss:$16 sps:$4 sm:$0xff] (!%p408_p2)   ;;  %v2184_v11 = vld [vmem:[%s2760_s6 + $0x40] sm:$0xff] (!%p408_p2)   ;;  %v2192_v21 = vld [vmem:[%s2760_s6 + $0x50] sm:$0xff] (!%p408_p2)   ;;  %v491_v48 = vshrl.u32 (!%p408_p2), %v490_v47, 7  ;;  %vm1797_vm1 = vcmask (!%p408_p2), 261120  }
   0x9   : > { %667 = vmatprep.subr.bf16.mxu0 (!%p408_p2), %v2180_v5  ;;  %708 = vmatprep.subr.bf16.mxu1 (!%p408_p2), %v2183_v6  ;;  %v2185_v12 = vld [vmem:[%s2760_s6 + $0xc0] sm:$0xff] (!%p408_p2)   ;;  %v2188_v17 = vld [vmem:[%s2760_s6 + $0x48] sm:$0xff] (!%p408_p2)   ;;  %v2193_v22 = vld [vmem:[%s2760_s6 + $0xd0] sm:$0xff] (!%p408_p2)  }
   0xa   : > { %v2186_v14 = vld [vmem:[%s2760_s6] sm:$0xff] (!%p408_p2)   ;;  %v2189_v18 = vld [vmem:[%s2760_s6 + $0xc8] sm:$0xff] (!%p408_p2)   ;;  %v2194_v23 = vld [vmem:[%s2760_s6 + $0x10] sm:$0xff] (!%p408_p2)   ;;  %v2507_v49 = vsub.s32 (!%p408_p2), 0, %v491_v48  ;;  %v500_v50 = vsub.s32 (!%p408_p2), 2, %v491_v48  ;;  %v496_v52 = vsub.s32 (!%p408_p2), 1, %v491_v48 }
   0xb   : > { %v2187_v16 = vld [vmem:[%s2760_s6 + $0x80] sm:$0xff] (!%p408_p2)   ;;  %v2190_v19 = vld [vmem:[%s2760_s6 + $0x8] sm:$0xff] (!%p408_p2)   ;;  %v2195_v24 = vld [vmem:[%s2760_s6 + $0x90] sm:$0xff] (!%p408_p2)   ;;  %v504_v53 = vsub.s32 (!%p408_p2), 3, %v491_v48 }
   0xc   : > { %v2191_v20 = vld [vmem:[%s2760_s6 + $0x88] sm:$0xff] (!%p408_p2)   ;;  %v2196_v25 = vld [vmem:[%s2760_s6 + $0x58] sm:$0xff] (!%p408_p2)   ;;  %v2200_v29 = vld [vmem:[%s2760_s6 + $0x60] sm:$0xff] (!%p408_p2)  }
   0xd   : > { %s2769_s26 = smov (!%p461_p3, %s1911_s26), 1  ;;  %v2197_v26 = vld [vmem:[%s2760_s6 + $0xd8] sm:$0xff]   ;;  %v2201_v30 = vld [vmem:[%s2760_s6 + $0xe0] sm:$0xff]   ;;  %v2204_v33 = vld [vmem:[%s2760_s6 + $0x68] sm:$0xff]  }
   0xe   : > { %s2382_s20 = sshll.u32 %s2769_s26, 3  ;;  %v2198_v27 = vld [vmem:[%s2760_s6 + $0x18] sm:$0xff]   ;;  %v2202_v31 = vld [vmem:[%s2760_s6 + $0x20] sm:$0xff]   ;;  %v2205_v34 = vld [vmem:[%s2760_s6 + $0xe8] sm:$0xff]  }
   0xf   : > { %s464_s23 = scalar_lea.vmem %s2754_s0, %s2382_s20  ;;  %s468_s16 = scalar_lea.vmem %s2755_s1, %s2382_s20  ;;  %v2199_v28 = vld [vmem:[%s2760_s6 + $0x98] sm:$0xff]   ;;  %v2203_v32 = vld [vmem:[%s2760_s6 + $0xa0] sm:$0xff]   ;;  %v2206_v35 = vld [vmem:[%s2760_s6 + $0x28] sm:$0xff]  }
  0x10   : > { %v482_v7 = vld [vmem:[%s464_s23] sm:$0xff]  ;;  %v2207_v36 = vld [vmem:[%s2760_s6 + $0xa8] sm:$0xff]   ;;  %v2208_v37 = vld [vmem:[%s2760_s6 + $0x70] sm:$0xff]   ;;  %s472_s27 = scalar_lea.vmem %s2765_s11, %s2382_s20  ;;  %s476_s30 = scalar_lea.vmem %s2766_s12, %s2382_s20 }
  0x11   : > { %v487_v10 = vpack.c.bf16 %v482_v7, %v482_v7  ;;  %v616_v13 = vld [vmem:[%s468_s16] sm:$0xff]  ;;  %v2209_v38 = vld [vmem:[%s2760_s6 + $0xf0] sm:$0xff]   ;;  %v2212_v41 = vld [vmem:[%s2760_s6 + $0x78] sm:$0xff]   ;;  %s480_s15 = scalar_lea.vmem %s2767_s13, %s2382_s20 }
  0x12   : > { %v621_v15 = vpack.c.bf16 %v616_v13, %v616_v13  ;;  %v2210_v39 = vld [vmem:[%s2760_s6 + $0x30] sm:$0xff]   ;;  %v2213_v42 = vld [vmem:[%s2760_s6 + $0xf8] sm:$0xff]   ;;  %v2216_v45 = vld [vmem:[%s2761_s7 + $0x40] sm:$0xff]  }
  0x13   : > { %1925 = vmatmul.mubr.msk.bf16.vlgmr.msra.gmra.mrb[0].mxu0 %vm530_vm0, %v487_v10  ;;  %1926 = vmatmul.mubr.msk.bf16.vlgmr.msra.gmra.mrb[0].mxu1 %vm530_vm0, %v487_v10  ;;  %v2211_v40 = vld [vmem:[%s2760_s6 + $0xb0] sm:$0xff]   ;;  %v2214_v43 = vld [vmem:[%s2760_s6 + $0x38] sm:$0xff]   ;;  %v2217_v46 = vld [vmem:[%s2761_s7 + $0xc0] sm:$0xff]  }
  0x14   : > { %668 = vmatpush1.bf16.msra.mxu0 %v2178_v8  ;;  %709 = vmatpush1.bf16.msra.mxu1 %v2181_v9  ;;  %v2215_v44 = vld [vmem:[%s2760_s6 + $0xb8] sm:$0xff]   ;;  %v488_v51 = vld [vmem:[%s2757_s3] sm:$0xf] }
  0x15   : > { %699 = vmatprep.mubr.bf16.mxu0 %v2288_v2  ;;  %740 = vmatprep.mubr.bf16.mxu1 %v2288_v2  ;;  %v493_v54 = vrot.slane %v488_v51, %v2507_v49  ;;  %v501_v55 = vrot.slane %v488_v51, %v500_v50  ;;  %v497_v56 = vrot.slane %v488_v51, %v496_v52  ;;  %v622_v4 = vld [vmem:[%s2759_s5] sm:$0xf] }
  0x16   : > { %2031 = vmatprep.subr.bf16.mxu0 %v2184_v11  ;;  %2053 = vmatprep.subr.bf16.mxu1 %v2185_v12  ;;  %v505_v57 = vrot.slane %v488_v51, %v504_v53  ;;  %v2218_v9 = vld [vmem:[%s2761_s7] sm:$0xff]   ;;  %v627_v13 = vrot.slane %v622_v4, %v2507_v49 }
  0x17   : > { %v2219_v10 = vld [vmem:[%s2761_s7 + $0x80] sm:$0xff]  }
  0x18   : > { %v2232_v47 = vld [vmem:[%s2761_s7 + $0x60] sm:$0xff]  }
  0x19   : > { %v2233_v48 = vld [vmem:[%s2761_s7 + $0xe0] sm:$0xff]  }
  0x1a   : > { %v2235_v51 = vld [vmem:[%s2761_s7 + $0xa0] sm:$0xff]  }
  0x1b   : > { %1931 = vmatmul.mubr.msk.bf16.vlgmr.msra.gmra.mrb[4].mxu0 %vm530_vm0, %v621_v15  ;;  %1932 = vmatmul.mubr.msk.bf16.vlgmr.msra.gmra.mrb[4].mxu1 %vm530_vm0, %v621_v15  ;;  %v2220_v15 = vld [vmem:[%s2761_s7 + $0x48] sm:$0xff]  }
  0x1c   : > { %2032 = vmatpush3.bf16.msra.mxu0 %v2186_v14  ;;  %2054 = vmatpush3.bf16.msra.mxu1 %v2187_v16  ;;  %v635_v14 = vrot.slane %v622_v4, %v500_v50  ;;  %v2221_v16 = vld [vmem:[%s2761_s7 + $0xc8] sm:$0xff]   ;;  %v2234_v50 = vld [vmem:[%s2761_s7 + $0x20] sm:$0xff]  }
  0x1d   : > { %2033 = vmatprep.subr.bf16.mxu0 %v2188_v17  ;;  %2055 = vmatprep.subr.bf16.mxu1 %v2189_v18  ;;  %v631_v17 = vrot.slane %v622_v4, %v496_v52  ;;  %v639_v18 = vrot.slane %v622_v4, %v504_v53  ;;  %v2236_v52 = vld [vmem:[%s2761_s7 + $0x68] sm:$0xff]   ;;  %v2250_v4 = vld [vmem:[%s2762_s8] sm:$0xff]  }
  0x1e   : > { %v2237_v53 = vld [vmem:[%s2761_s7 + $0xe8] sm:$0xff]  }
  0x20   : > { %2034 = vmatpush3.bf16.msra.mxu0 %v2190_v19  ;;  %2056 = vmatpush3.bf16.msra.mxu1 %v2191_v20 }
  0x21   : > { %2035 = vmatprep.subr.bf16.mxu0 %v2192_v21  ;;  %2057 = vmatprep.subr.bf16.mxu1 %v2193_v22  ;;  %v2222_v21 = vld [vmem:[%s2761_s7 + $0x8] sm:$0xff]  }
  0x24   : > { %2036 = vmatpush3.bf16.msra.mxu0 %v2194_v23  ;;  %2058 = vmatpush3.bf16.msra.mxu1 %v2195_v24 }
  0x25   : > { %2037 = vmatprep.subr.bf16.mxu0 %v2196_v25  ;;  %2059 = vmatprep.subr.bf16.mxu1 %v2197_v26  ;;  %v2223_v26 = vld [vmem:[%s2761_s7 + $0x88] sm:$0xff]  }
  0x28   : > { %2038 = vmatpush3.bf16.msra.mxu0 %v2198_v27  ;;  %2060 = vmatpush3.bf16.msra.mxu1 %v2199_v28  ;;  %v2224_v27 = vld [vmem:[%s2761_s7 + $0x50] sm:$0xff]  }
  0x29   : > { %2039 = vmatprep.subr.bf16.mxu0 %v2200_v29  ;;  %2061 = vmatprep.subr.bf16.mxu1 %v2201_v30  ;;  %v2225_v30 = vld [vmem:[%s2761_s7 + $0xd0] sm:$0xff]  }
  0x2c   : > { %2040 = vmatpush3.bf16.msra.mxu0 %v2202_v31  ;;  %2062 = vmatpush3.bf16.msra.mxu1 %v2203_v32 }
  0x2d   : > { %2041 = vmatprep.subr.bf16.mxu0 %v2204_v33  ;;  %2063 = vmatprep.subr.bf16.mxu1 %v2205_v34 }
  0x30   : > { %2042 = vmatpush3.bf16.msra.mxu0 %v2206_v35  ;;  %2064 = vmatpush3.bf16.msra.mxu1 %v2207_v36 }
  0x31   : > { %2043 = vmatprep.subr.bf16.mxu0 %v2208_v37  ;;  %2065 = vmatprep.subr.bf16.mxu1 %v2209_v38 }
  0x34   : > { %2044 = vmatpush3.bf16.msra.mxu0 %v2210_v39  ;;  %2066 = vmatpush3.bf16.msra.mxu1 %v2211_v40 }
  0x35   : > { %2045 = vmatprep.subr.bf16.mxu0 %v2212_v41  ;;  %2067 = vmatprep.subr.bf16.mxu1 %v2213_v42  ;;  %v2226_v41 = vld [vmem:[%s2761_s7 + $0x10] sm:$0xff]  }
  0x36   : > { %v2227_v42 = vld [vmem:[%s2761_s7 + $0x90] sm:$0xff]  }
  0x38   : > { %2046 = vmatpush3.bf16.msra.mxu0 %v2214_v43  ;;  %2068 = vmatpush3.bf16.msra.mxu1 %v2215_v44  ;;  %v2228_v43 = vld [vmem:[%s2761_s7 + $0x58] sm:$0xff]  }
  0x39   : > { %2075 = vmatprep.subr.bf16.mxu0 %v2216_v45  ;;  %2097 = vmatprep.subr.bf16.mxu1 %v2217_v46  ;;  %v2229_v44 = vld [vmem:[%s2761_s7 + $0xd8] sm:$0xff]  }
  0x3a   : > { %v2230_v45 = vld [vmem:[%s2761_s7 + $0x18] sm:$0xff]  }
  0x3b   : > { %v2231_v46 = vld [vmem:[%s2761_s7 + $0x98] sm:$0xff]  }
  0xe6   : > { %v568_v58 = vpop.f32.mrb[0].mxu0  ;;  %v609_v59 = vpop.f32.mrb[0].mxu1 }
  0xe7   : > { %v569_v60 = vadd.f32 %v568_v58, %v493_v54  ;;  %v610_v61 = vadd.f32 %v609_v59, %v501_v55  ;;  %v570_v62 = vpop.f32.mrb[1].mxu0  ;;  %v611_v63 = vpop.f32.mrb[1].mxu1  ;;  %v2238_v54 = vld [vmem:[%s2761_s7 + $0x28] sm:$0xff]   ;;  %v2242_v58 = vld [vmem:[%s2761_s7 + $0x30] sm:$0xff]  }
  0xe8   : > { %v571_v0 = vadd.f32 %v570_v62, %v497_v56  ;;  %v612_v1 = vadd.f32 %v611_v63, %v505_v57  ;;  %v572_v2 = vpop.f32.mrb[2].mxu0  ;;  %v613_v3 = vpop.f32.mrb[2].mxu1  ;;  %v2239_v55 = vld [vmem:[%s2761_s7 + $0xa8] sm:$0xff]   ;;  %v2240_v56 = vld [vmem:[%s2761_s7 + $0x70] sm:$0xff]   ;;  %v2246_v62 = vld [vmem:[%s2761_s7 + $0x38] sm:$0xff]  }
  0xe9   : > { %v573_v5 = vpop.f32.mrb[3].mxu0  ;;  %v614_v6 = vpop.f32.mrb[3].mxu1  ;;  %v943_v11 = vpack.c.bf16 %v569_v60, %v569_v60  ;;  %v945_v12 = vpack.c.bf16 %v610_v61, %v610_v61  ;;  %v2241_v57 = vld [vmem:[%s2761_s7 + $0xf0] sm:$0xff]   ;;  %v2247_v63 = vld [vmem:[%s2761_s7 + $0xb8] sm:$0xff]  }
  0xea   : > { %v944_v7 = vpack.c.bf16 %v571_v0, %v571_v0  ;;  %v946_v8 = vpack.c.bf16 %v612_v1, %v612_v1  ;;  %v2243_v59 = vld [vmem:[%s2761_s7 + $0xb0] sm:$0xff]   ;;  %v2251_v5 = vld [vmem:[%s2762_s8 + $0x80] sm:$0xff]   ;;  %v2252_v6 = vld [vmem:[%s2762_s8 + $0x48] sm:$0xff]  }
  0xec   : > { %1171 = vmatprep.mubr.bf16.mxu0 %v944_v7  ;;  %1211 = vmatprep.mubr.bf16.mxu1 %v946_v8  ;;  %v2253_v8 = vld [vmem:[%s2762_s8 + $0xc8] sm:$0xff]  }
  0xed   : > { %1172 = vmatmul.mubr.bf16.vlgmr.msra.gmra.mrb[8].mxu0 %v943_v11  ;;  %1212 = vmatmul.mubr.bf16.vlgmr.msra.gmra.mrb[8].mxu1 %v945_v12  ;;  %v2255_v11 = vld [vmem:[%s2762_s8 + $0x88] sm:$0xff]   ;;  %v2256_v12 = vld [vmem:[%s2762_s8 + $0x50] sm:$0xff]  }
  0xee   : > { %2076 = vmatpush3.bf16.msra.mxu0 %v2218_v9  ;;  %2098 = vmatpush3.bf16.msra.mxu1 %v2219_v10  ;;  %v701_v19 = vpop.f32.mrb[4].mxu0  ;;  %v742_v20 = vpop.f32.mrb[4].mxu1  ;;  %v2254_v10 = vld [vmem:[%s2762_s8 + $0x8] sm:$0xff]  }
  0xef   : > { %v2532_v22 = vadd.f32 %v701_v19, %v627_v13  ;;  %v2534_v23 = vadd.f32 %v742_v20, %v635_v14  ;;  %v703_v24 = vpop.f32.mrb[5].mxu0  ;;  %v744_v25 = vpop.f32.mrb[5].mxu1  ;;  %2077 = vmatprep.subr.bf16.mxu0 %v2220_v15  ;;  %2099 = vmatprep.subr.bf16.mxu1 %v2221_v16  ;;  %v2257_v13 = vld [vmem:[%s2762_s8 + $0xd0] sm:$0xff]   ;;  %v2260_v16 = vld [vmem:[%s2762_s8 + $0x58] sm:$0xff]   ;;  %v2264_v20 = vld [vmem:[%s2762_s8 + $0x60] sm:$0xff]  }
  0xf0   : > { %v704_v28 = vadd.f32 %v703_v24, %v631_v17  ;;  %v745_v29 = vadd.f32 %v744_v25, %v639_v18  ;;  %v705_v31 = vpop.f32.mrb[6].mxu0  ;;  %v746_v32 = vpop.f32.mrb[6].mxu1  ;;  %v2258_v14 = vld [vmem:[%s2762_s8 + $0x10] sm:$0xff]   ;;  %v2261_v17 = vld [vmem:[%s2762_s8 + $0xd8] sm:$0xff]   ;;  %v2268_v24 = vld [vmem:[%s2762_s8 + $0x68] sm:$0xff]  }
  0xf1   : > { %v2546_v33 = vadd.f32 %v2532_v22, %v569_v60  ;;  %v2549_v34 = vadd.f32 %v2534_v23, %v610_v61  ;;  %v706_v35 = vpop.f32.mrb[7].mxu0  ;;  %v747_v36 = vpop.f32.mrb[7].mxu1  ;;  %v2244_v60 = vld [vmem:[%s2761_s7 + $0x78] sm:$0xff]   ;;  %v1219_v2 = vpack.c.bf16 %v2532_v22, %v2532_v22  ;;  %v1221_v3 = vpack.c.bf16 %v2534_v23, %v2534_v23  ;;  %v2259_v15 = vld [vmem:[%s2762_s8 + $0x90] sm:$0xff]   ;;  %v2266_v22 = vld [vmem:[%s2762_s8 + $0x20] sm:$0xff]  }
  0xf2   : > { %v1220_v37 = vpack.c.bf16 %v704_v28, %v704_v28  ;;  %v2551_v38 = vadd.f32 %v704_v28, %v571_v0  ;;  %v1222_v39 = vpack.c.bf16 %v745_v29, %v745_v29  ;;  %v2553_v40 = vadd.f32 %v745_v29, %v612_v1  ;;  %2078 = vmatpush3.bf16.msra.mxu0 %v2222_v21  ;;  %v2245_v61 = vld [vmem:[%s2761_s7 + $0xf8] sm:$0xff]   ;;  %v2248_v0 = vld [vmem:[%s2762_s8 + $0x40] sm:$0xff]   ;;  %v2269_v25 = vld [vmem:[%s2762_s8 + $0xe8] sm:$0xff]  }
  0xf3   : > { %2100 = vmatpush3.bf16.msra.mxu1 %v2223_v26  ;;  %2079 = vmatprep.subr.bf16.mxu0 %v2224_v27  ;;  %v2249_v1 = vld [vmem:[%s2762_s8 + $0xc0] sm:$0xff]   ;;  %v2262_v18 = vld [vmem:[%s2762_s8 + $0x18] sm:$0xff]   ;;  %v2270_v26 = vld [vmem:[%s2762_s8 + $0x28] sm:$0xff]  }
  0xf4   : > { %2101 = vmatprep.subr.bf16.mxu1 %v2225_v30  ;;  %1447 = vmatprep.mubr.bf16.mxu0 %v1220_v37  ;;  %v1500_v7 = vpack.c.bf16 %v2551_v38, %v2551_v38  ;;  %v1502_v9 = vpack.c.bf16 %v2553_v40, %v2553_v40  ;;  %v2263_v19 = vld [vmem:[%s2762_s8 + $0x98] sm:$0xff]   ;;  %v2265_v21 = vld [vmem:[%s2762_s8 + $0xe0] sm:$0xff]   ;;  %v2271_v27 = vld [vmem:[%s2762_s8 + $0xa8] sm:$0xff]   ;;  %v1499_v38 = vpack.c.bf16 %v2546_v33, %v2546_v33 }
  0xf5   : > { %1487 = vmatprep.mubr.bf16.mxu1 %v1222_v39  ;;  %v2267_v23 = vld [vmem:[%s2762_s8 + $0xa0] sm:$0xff]   ;;  %v2272_v28 = vld [vmem:[%s2762_s8 + $0x70] sm:$0xff]   ;;  %v2276_v32 = vld [vmem:[%s2762_s8 + $0x78] sm:$0xff]   ;;  %v1501_v39 = vpack.c.bf16 %v2549_v34, %v2549_v34 }
  0xf6   : > { %2080 = vmatpush3.bf16.msra.mxu0 %v2226_v41  ;;  %v2273_v29 = vld [vmem:[%s2762_s8 + $0xf0] sm:$0xff]   ;;  %v2277_v35 = vld [vmem:[%s2762_s8 + $0xf8] sm:$0xff]   ;;  %v941_v33 = vld [vmem:[%s2763_s9] sm:$0x1] }
  0xf7   : > { %2102 = vmatpush3.bf16.msra.mxu1 %v2227_v42  ;;  %2081 = vmatprep.subr.bf16.mxu0 %v2228_v43  ;;  %v2274_v30 = vld [vmem:[%s2762_s8 + $0x30] sm:$0xff]   ;;  %v2278_v36 = vld [vmem:[%s2762_s8 + $0x38] sm:$0xff]   ;;  %v942_v34 = vld [vmem:[%s2764_s10] sm:$0x1] }
  0xf8   : > { %2103 = vmatprep.subr.bf16.mxu1 %v2229_v44  ;;  %v2275_v31 = vld [vmem:[%s2762_s8 + $0xb0] sm:$0xff]   ;;  %v2279_v37 = vld [vmem:[%s2762_s8 + $0xb8] sm:$0xff]  }
  0xfa   : > { %2082 = vmatpush3.bf16.msra.mxu0 %v2230_v45 }
  0xfb   : > { %2104 = vmatpush3.bf16.msra.mxu1 %v2231_v46  ;;  %2083 = vmatprep.subr.bf16.mxu0 %v2232_v47 }
  0xfc   : > { %2105 = vmatprep.subr.bf16.mxu1 %v2233_v48 }
  0xfe   : > { %2084 = vmatpush3.bf16.msra.mxu0 %v2234_v50 }
  0xff   : > { %2106 = vmatpush3.bf16.msra.mxu1 %v2235_v51  ;;  %2085 = vmatprep.subr.bf16.mxu0 %v2236_v52 }
 0x100   : > { %2107 = vmatprep.subr.bf16.mxu1 %v2237_v53 }
 0x102   : > { %2086 = vmatpush3.bf16.msra.mxu0 %v2238_v54 }
 0x103   : > { %2108 = vmatpush3.bf16.msra.mxu1 %v2239_v55  ;;  %2087 = vmatprep.subr.bf16.mxu0 %v2240_v56  ;;  %v1776_v55 = vsub.f32 %v941_v33, %v942_v34 }
 0x104   : > { %2109 = vmatprep.subr.bf16.mxu1 %v2241_v57 }
 0x106   : > { %2088 = vmatpush3.bf16.msra.mxu0 %v2242_v58 }
 0x107   : > { %2110 = vmatpush3.bf16.msra.mxu1 %v2243_v59  ;;  %2089 = vmatprep.subr.bf16.mxu0 %v2244_v60 }
 0x108   : > { %2111 = vmatprep.subr.bf16.mxu1 %v2245_v61 }
 0x10a   : > { %2090 = vmatpush3.bf16.msra.mxu0 %v2246_v62 }
 0x10b   : > { %2112 = vmatpush3.bf16.msra.mxu1 %v2247_v63  ;;  %2119 = vmatprep.subr.bf16.mxu0 %v2248_v0  ;;  %v1781_v0 = vrot.slane %v1776_v55, %v2507_v49 }
 0x10c   : > { %2141 = vmatprep.subr.bf16.mxu1 %v2249_v1 }
 0x10d   : > { %1448 = vmatmul.mubr.bf16.vlgmr.msra.gmra.mrb[12].mxu0 %v1219_v2 }
 0x10e   : > { %1488 = vmatmul.mubr.bf16.vlgmr.msra.gmra.mrb[12].mxu1 %v1221_v3  ;;  %2120 = vmatpush3.bf16.msra.mxu0 %v2250_v4  ;;  %v1795_v3 = vld [vmem:[%s472_s27] sm:$0xff] }
 0x10f   : > { %1727 = vmatprep.mubr.bf16.mxu0 %v1500_v7  ;;  %2142 = vmatpush3.bf16.msra.mxu1 %v2251_v5 }
 0x110   : > { %1767 = vmatprep.mubr.bf16.mxu1 %v1502_v9  ;;  %2121 = vmatprep.subr.bf16.mxu0 %v2252_v6 }
 0x111   : > { %2143 = vmatprep.subr.bf16.mxu1 %v2253_v8 }
 0x112   : > { %2122 = vmatpush3.bf16.msra.mxu0 %v2254_v10 }
 0x113   : > { %2144 = vmatpush3.bf16.msra.mxu1 %v2255_v11  ;;  %2123 = vmatprep.subr.bf16.mxu0 %v2256_v12 }
 0x114   : > { %2145 = vmatprep.subr.bf16.mxu1 %v2257_v13  ;;  %v1786_v13 = vadd.f32 %v942_v34, %v941_v33 }
 0x116   : > { %2124 = vmatpush3.bf16.msra.mxu0 %v2258_v14 }
 0x117   : > { %2146 = vmatpush3.bf16.msra.mxu1 %v2259_v15  ;;  %2125 = vmatprep.subr.bf16.mxu0 %v2260_v16 }
 0x118   : > { %2147 = vmatprep.subr.bf16.mxu1 %v2261_v17 }
 0x11a   : > { %2126 = vmatpush3.bf16.msra.mxu0 %v2262_v18 }
 0x11b   : > { %2148 = vmatpush3.bf16.msra.mxu1 %v2263_v19  ;;  %2127 = vmatprep.subr.bf16.mxu0 %v2264_v20  ;;  %v1791_v19 = vrot.slane %v1786_v13, %v2507_v49 }
 0x11c   : > { %2149 = vmatprep.subr.bf16.mxu1 %v2265_v21 }
 0x11e   : > { %2128 = vmatpush3.bf16.msra.mxu0 %v2266_v22 }
 0x11f   : > { %2150 = vmatpush3.bf16.msra.mxu1 %v2267_v23  ;;  %2129 = vmatprep.subr.bf16.mxu0 %v2268_v24 }
 0x120   : > { %2151 = vmatprep.subr.bf16.mxu1 %v2269_v25 }
 0x122   : > { %2130 = vmatpush3.bf16.msra.mxu0 %v2270_v26 }
 0x123   : > { %2152 = vmatpush3.bf16.msra.mxu1 %v2271_v27  ;;  %2131 = vmatprep.subr.bf16.mxu0 %v2272_v28 }
 0x124   : > { %2153 = vmatprep.subr.bf16.mxu1 %v2273_v29 }
 0x126   : > { %2132 = vmatpush3.bf16.msra.mxu0 %v2274_v30 }
 0x127   : > { %2154 = vmatpush3.bf16.msra.mxu1 %v2275_v31  ;;  %2133 = vmatprep.subr.bf16.mxu0 %v2276_v32 }
 0x128   : > { %2155 = vmatprep.subr.bf16.mxu1 %v2277_v35 }
 0x12a   : > { %2134 = vmatpush3.bf16.msra.mxu0 %v2278_v36 }
 0x12b   : > { %2156 = vmatpush3.bf16.msra.mxu1 %v2279_v37 }
 0x12d   : > { %1728 = vmatmul.mubr.bf16.vlgmr.msra.gmra.mrb[16].mxu0 %v1499_v38 }
 0x12e   : > { %1768 = vmatmul.mubr.bf16.vlgmr.msra.gmra.mrb[16].mxu1 %v1501_v39 }
 0x1c0   : > { %v2047_v40 = vpop.f32.mrb[8].mxu0  ;;  %v2069_v41 = vpop.f32.mrb[8].mxu1 }
 0x1c1   : > { %v2048_v42 = vpop.f32.mrb[9].mxu0  ;;  %v2070_v43 = vpop.f32.mrb[9].mxu1 }
 0x1c2   : > { %v2049_v44 = vadd.f32 %v2048_v42, %v2047_v40  ;;  %v2071_v45 = vadd.f32 %v2070_v43, %v2069_v41  ;;  %v2050_v46 = vpop.f32.mrb[10].mxu0  ;;  %v2072_v47 = vpop.f32.mrb[10].mxu1 }
 0x1c3   : > { %v2051_v48 = vpop.f32.mrb[11].mxu0  ;;  %v2073_v50 = vpop.f32.mrb[11].mxu1 }
 0x1c4   : > { %v1214_v51 = vadd.f32 %v2071_v45, %v2049_v44 }
 0x1e0   : > { %v2091_v52 = vpop.f32.mrb[12].mxu0 }
 0x1e1   : > { %v2113_v53 = vpop.f32.mrb[12].mxu1  ;;  %v2092_v54 = vpop.f32.mrb[13].mxu0 }
 0x1e2   : > { %v2093_v56 = vadd.f32 %v2092_v54, %v2091_v52  ;;  %v2114_v57 = vpop.f32.mrb[13].mxu1  ;;  %v2094_v58 = vpop.f32.mrb[14].mxu0 }
 0x1e3   : > { %v2115_v59 = vadd.f32 %v2114_v57, %v2113_v53  ;;  %v2116_v60 = vpop.f32.mrb[14].mxu1  ;;  %v2095_v61 = vpop.f32.mrb[15].mxu0 }
 0x1e4   : > { %v2117_v62 = vpop.f32.mrb[15].mxu1 }
 0x1e5   : > { %v1490_v63 = vadd.f32 %v2115_v59, %v2093_v56 }
 0x1e7   : > { %v1775_v1 = vsub.f32 %v1214_v51, %v1490_v63 }
 0x1e9   : > { %v1783_v2 = vadd.f32 %v1781_v0, %v1775_v1 }
 0x1eb   : > { %v1794_v4 = vmul.f32 5.656854, %v1783_v2 }
 0x1ed   : > { %v1796_v5 = vadd.f32 %v1795_v3, %v1794_v4 }
 0x1ef   : > { %1798 = vst.msk [vmem:[%s476_s30] sm:$0xff] %vm1797_vm1, %v1796_v5 }
 0x200   : > { %v2135_v6 = vpop.f32.mrb[16].mxu0 }
 0x201   : > { %v2157_v7 = vpop.f32.mrb[16].mxu1  ;;  %v2136_v8 = vpop.f32.mrb[17].mxu0 }
 0x202   : > { %v2137_v9 = vadd.f32 %v2136_v8, %v2135_v6  ;;  %v2158_v10 = vpop.f32.mrb[17].mxu1  ;;  %v2138_v11 = vpop.f32.mrb[18].mxu0 }
 0x203   : > { %v2159_v12 = vadd.f32 %v2158_v10, %v2157_v7  ;;  %v2160_v14 = vpop.f32.mrb[18].mxu1  ;;  %v2139_v15 = vpop.f32.mrb[19].mxu0 }
 0x204   : > { %v2161_v16 = vpop.f32.mrb[19].mxu1 }
 0x205   : > { %v1770_v17 = vadd.f32 %v2159_v12, %v2137_v9 }
 0x207   : > { %v1784_v18 = vsub.f32 %v1770_v17, %v1214_v51 }
 0x209   : > { %v1785_v20 = vsub.f32 %v1784_v18, %v1490_v63 }
 0x20b   : > { %v1793_v21 = vadd.f32 %v1791_v19, %v1785_v20 }
 0x20d   : > { %v1799_v22 = vmul.f32 5.656854, %v1793_v21 }
 0x20f   : > { %v1801_v23 = vadd.f32 %v1799_v22, %v1795_v3 }
 0x211   : > { %1802 = vst.msk [vmem:[%s480_s15] sm:$0xff] %vm1797_vm1, %v1801_v23 }
 0x212 PF: > { %s24_s25 = sadd.s32 1, %s2286_s25  }
 0x213   : > { %p21_p4 = scmp.ge.s32.totalorder %s24_s25, 4  }
 0x215   :  { %23 = sbr.rel (!%p21_p4) target bundleno = 1 (0x1), region = 116 }

// kernel: transformer_forward.10
= control target key start
LH: loop header
LB: loop body
LE: loop exit
PB: predicated region body
PF: predicated region fallthrough
CT: control target
= control target key end

     0   :  { %s1797_s13 = smov 0   ;;  %s2102_s0 = inlined_call_operand.vmem [shape: f32[2,8,96], index: 0, kind: input, shape index: {}]   ;;  %s2103_s1 = inlined_call_operand.vmem [shape: f32[2,8,96], index: 1, kind: input, shape index: {}]   ;;  %s2104_s2 = inlined_call_operand.vmem [shape: f32[2,8,32], index: 2, kind: input, shape index: {}]   ;;  %s2105_s3 = inlined_call_operand.vmem [shape: f32[2,8,32], index: 3, kind: input, shape index: {}]   ;;  %s2106_s4 = inlined_call_operand.vmem [shape: bf16[32,32], index: 4, kind: input, shape index: {}]   ;;  %s2107_s5 = inlined_call_operand.vmem [shape: bf16[32,32], index: 5, kind: input, shape index: {}]   ;;  %s2108_s6 = inlined_call_operand.vmem [shape: bf16[32,32], index: 6, kind: input, shape index: {}]   ;;  %s2109_s7 = inlined_call_operand.vmem [shape: f32[1,32], index: 7, kind: input, shape index: {}]   ;;  %s2110_s8 = inlined_call_operand.vmem [shape: f32[1,32], index: 8, kind: input, shape index: {}]   ;;  %s2111_s9 = inlined_call_operand.vmem [shape: f32[2,8,32], index: 9, kind: output, shape index: {0}]   ;;  %s2112_s10 = inlined_call_operand.vmem [shape: f32[2,8,32], index: 10, kind: output, shape index: {1}]  }
   0x1 LB: > { %s1472_s14 = sadd.s32 4294967295, %s1724_s13   ;;  %p1476_p0 = scmp.ge.s32.totalorder %s1724_s13, 1  ;;  %s1724_s13 = sphi %s1797_s13, %s21_s13  }
   0x2   : > { %p341_p1 = scmp.lt.s32.totalorder %s1724_s13, 3 }
   0x4   : > { %p342_p2 = pnand %p1476_p0, %p341_p1 }
   0x5   : > { %p393_p3 = scmp.lt.s32.totalorder (!%p342_p2), %s1472_s14, 1  ;;  %v1726_v0 = vmov (!%p342_p2), 0.0   ;;  %vm1727_vm0 = vmmov (!%p342_p2), 0   ;;  %s1728_s22 = smov (!%p342_p2), 96   ;;  %vm427_vm1 = vcmask (!%p342_p2), 64512   ;;  %vm486_vm2 = vcmask (!%p342_p2), 130112  }
   0x6   : > { %345 = sbr.rel (%p342_p2) target bundleno = 2301 (0x8fd), region = 56  ;;  %1527 = vmatprep.subr.bf16.mxu0 (!%p342_p2), %v1726_v0  ;;  %1529 = vmatprep.mubr.msk.bf16.mxu0 (!%p342_p2), %vm1727_vm0, %v1726_v0  ;;  %s1729_s23 = smov (!%p342_p2), 120   ;;  %vm559_vm3 = vcmask (!%p342_p2), 130048   ;;  %vm1128_vm4 = vcmask (!%p342_p2), 195584   ;;  %vm1170_vm5 = vcmask (!%p342_p2), 261120  }
   0x7   : > { %1533 = vmatprep.subr.bf16.mxu1 (!%p342_p2), %v1726_v0  ;;  %1535 = vmatprep.mubr.msk.bf16.mxu1 (!%p342_p2), %vm1727_vm0, %v1726_v0  ;;  %s1730_s24 = smov (!%p342_p2), 72   ;;  %s1731_s25 = smov (!%p342_p2), 112  }
   0x8   : > { %s1732_s26 = smov (!%p342_p2), 104   ;;  %s1733_s27 = smov (!%p342_p2), 64  }
   0x9   : > { %s1734_s28 = smov (!%p342_p2), 8   ;;  %s1735_s29 = smov (!%p342_p2), 88  }
   0xa   : > { %s1736_s30 = smov (!%p342_p2), 80   ;;  %s1737_s11 = smov (!%p342_p2), 56  }
   0xb   : > { %s1738_s12 = smov (!%p342_p2), 48  }
   0xd   : > { %s2114_s14 = smov (!%p393_p3, %s1472_s14), 1 }
   0xe   : > { %s1811_s15 = sshll.u32 %s2114_s14, 3  ;;  %s1739_s14 = smov 40  }
   0xf   : > { %s396_s18 = scalar_lea.vmem %s2102_s0, %s1811_s15  ;;  %s400_s21 = scalar_lea.vmem %s2103_s1, %s1811_s15 }
  0x10   : > { %v1821_v1 = vld [vmem:[%s396_s18] sm:$0xff]  ;;  %s404_s18 = scalar_lea.vmem %s2104_s2, %s1811_s15 }
  0x11   : > { %v1823_v2 = vld [vmem:[%s400_s21] sm:$0xff]  ;;  %v420_v6 = vmul.f32 0.35355338, %v1821_v1  ;;  %s412_s21 = scalar_lea.vmem %s2111_s9, %s1811_s15 }
  0x12   : > { %v1827_v3 = vpack.c.bf16 %v1823_v2, %v1821_v1  ;;  %v421_v7 = vmul.f32 0.35355338, %v1823_v2  ;;  %v1628_v32 = vpack.i.bf16 %v1821_v1, %v1823_v2  ;;  %v539_v40 = vsub.f32 0.0, %v1823_v2 }
  0x14   : > { %425 = vrot.lane.b32.xlu0 %v1827_v3, %s1728_s22  ;;  %v1834_v8 = vpack.c.bf16 %v421_v7, %v420_v6  ;;  %v1860_v41 = vpack.i.bf16 %v539_v40, %v1821_v1  ;;  %s1740_s22 = smov 16  }
  0x86   : > { %v426_v4 = vpop.permute.xlu0 %425 }
  0x87   : > { %v432_v5 = vsel %vm427_vm1, %v426_v4, 0 }
  0x88   : > { %1528 = vmatpush3.bf16.xpose.msra.mxu0 %v432_v5 }
  0x89   : > { %1545 = vmatprep.subr.bf16.mxu0 %v1726_v0 }
  0x8f   : > { %1530 = vmatmul.mubr.msk.bf16.vlgmr.msra.gmra.mrb[0].mxu0 %vm427_vm1, %v1834_v8 }
  0x90   : > { %1547 = vmatprep.mubr.msk.bf16.mxu0 %vm1727_vm0, %v1726_v0 }
 0x162   : > { %v468_v9 = vpop.f32.mrb[0].mxu0 }
 0x163   : > { %v1531_v10 = vpop.f32.mrb[1].mxu0  ;;  %v487_v11 = vsel %vm486_vm2, %v468_v9, -inf  ;;  %v475_v29 = vsel %vm427_vm1, %v468_v9, -inf }
 0x164   : > { %488 = vmax.xlane.f32.xlu1 %v487_v11  ;;  %v471_v12 = vpop.f32.mrb[2].mxu0 }
 0x165   : > { %v1532_v13 = vpop.f32.mrb[3].mxu0  ;;  %v513_v14 = vsel %vm486_vm2, %v471_v12, -inf  ;;  %v502_v15 = vsel %vm427_vm1, %v471_v12, -inf }
 0x166   : > { %514 = vmax.xlane.f32.xlu0 %v513_v14 }
 0x168   : > { %503 = vmax.xlane.f32.xlu1 %v502_v15 }
 0x1f1   : > { %v489_v16 = vpop.xlane.xlu1 %488 }
 0x1f2   : > { %v490_v17 = vsub.f32 %v468_v9, %v489_v16 }
 0x1f3   : > { %v515_v18 = vpop.xlane.xlu0 %514 }
 0x1f4   : > { %v491_v19 = vmul.f32 1.442695, %v490_v17  ;;  %v516_v20 = vsub.f32 %v471_v12, %v515_v18 }
 0x1f5   : > { %v504_v24 = vpop.xlane.xlu1 %503 }
 0x1f6   : > { %1654 = vpow2.f32 %v491_v19  ;;  %v517_v21 = vmul.f32 1.442695, %v516_v20  ;;  %v505_v25 = vsub.f32 %v471_v12, %v504_v24 }
 0x1f8   : > { %1656 = vpow2.f32 %v517_v21  ;;  %v506_v26 = vmul.f32 1.442695, %v505_v25 }
 0x1fa   : > { %1658 = vpow2.f32 %v506_v26 }
 0x200   : > { %v1843_v22 = vpop.eup %1654 }
 0x201   : > { %494 = vrot.lane.b32.xlu0 %v1843_v22, %s1729_s23 }
 0x202   : > { %v1657_v23 = vpop.eup %1656 }
 0x203   : > { %520 = vrot.lane.b32.xlu1 %v1657_v23, %s1729_s23 }
 0x204   : > { %v1659_v27 = vpop.eup %1658 }
 0x205   : > { %v508_v28 = vsel %vm427_vm1, %v1659_v27, 0.0 }
 0x220   : > { %509 = vadd.xlane.f32.xlu0 %v508_v28 }
 0x227   : > { %476 = vmax.xlane.f32.xlu1 %v475_v29 }
 0x236   : > { %1629 = vrot.lane.b32.xlu0 %v1628_v32, %s1730_s24 }
 0x23a   : > { %774 = vrot.lane.b32.xlu0 %v1834_v8, %s1731_s25  ;;  %s408_s25 = scalar_lea.vmem %s2105_s3, %s1811_s15 }
 0x23e   : > { %944 = vrot.lane.b32.xlu0 %v1834_v8, %s1732_s26  ;;  %s1741_s26 = smov 24  }
 0x273   : > { %v495_v38 = vpop.permute.xlu0 %494 }
 0x274   : > { %v497_v39 = vsel %vm427_vm1, %v495_v38, 0.0 }
 0x275   : > { %v521_v30 = vpop.permute.xlu1 %520 }
 0x276   : > { %v523_v31 = vsel %vm427_vm1, %v521_v30, 0.0 }
 0x277   : > { %524 = vadd.xlane.f32.xlu1 %v523_v31 }
 0x2ad   : > { %v510_v42 = vpop.xlane.xlu0 %509 }
 0x2b1   : > { %v1630_v50 = vpop.permute.xlu0 %1629 }
 0x2b2   : > { %v1632_v51 = vunpack.i.h.bf16 %v1630_v50  ;;  %v1631_v52 = vunpack.i.l.bf16 %v1630_v50 }
 0x2b4   : > { %v477_v33 = vpop.xlane.xlu1 %476 }
 0x2b5   : > { %v478_v34 = vsub.f32 %v468_v9, %v477_v33  ;;  %v775_v13 = vpop.permute.xlu0 %774 }
 0x2b7   : > { %v479_v35 = vmul.f32 1.442695, %v478_v34 }
 0x2b9   : > { %1660 = vpow2.f32 %v479_v35  ;;  %v945_v15 = vpop.permute.xlu0 %944 }
 0x2c3   : > { %v1661_v36 = vpop.eup %1660 }
 0x2c4   : > { %v481_v37 = vsel %vm427_vm1, %v1661_v36, 0.0 }
 0x2c5   : > { %482 = vadd.xlane.f32.xlu1 %v481_v37 }
 0x2c9   : > { %498 = vadd.xlane.f32.xlu1 %v497_v39 }
 0x2da   : > { %1624 = vrot.lane.b32.xlu1 %v1860_v41, %s1733_s27 }
 0x304   : > { %v525_v43 = vpop.xlane.xlu1 %524 }
 0x305   : > { %1662 = vrcp.f32 %v525_v43 }
 0x306   : > { %1664 = vrcp.f32 %v510_v42 }
 0x30f   : > { %v1663_v44 = vpop.eup %1662 }
 0x310   : > { %v527_v45 = vmul.f32 %v1663_v44, %v1657_v23  ;;  %v1665_v46 = vpop.eup %1664 }
 0x311   : > { %v512_v47 = vmul.f32 %v1665_v46, %v1659_v27 }
 0x312   : > { %529 = vrot.lane.b32.xlu1 %v527_v45, %s1729_s23 }
 0x316   : > { %534 = vrot.lane.b32.xlu1 %v512_v47, %s1734_s28 }
 0x31a   : > { %606 = vrot.lane.b32.xlu1 %v1827_v3, %s1735_s29 }
 0x31e   : > { %604 = vrot.lane.b32.xlu1 %v1834_v8, %s1729_s23 }
 0x322   : > { %776 = vrot.lane.b32.xlu1 %v1827_v3, %s1736_s30 }
 0x326   : > { %946 = vrot.lane.b32.xlu1 %v1827_v3, %s1730_s24 }
 0x352   : > { %v483_v48 = vpop.xlane.xlu1 %482 }
 0x353   : > { %1666 = vrcp.f32 %v483_v48 }
 0x356   : > { %v499_v49 = vpop.xlane.xlu1 %498 }
 0x357   : > { %1668 = vrcp.f32 %v499_v49 }
 0x35a   : > { %v1872_v53 = vpop.permute.xlu1 %1624 }
 0x35b   : > { %v1627_v54 = vunpack.i.h.bf16 %v1872_v53  ;;  %v1626_v55 = vunpack.i.l.bf16 %v1872_v53 }
 0x35d   : > { %v555_v56 = vsel %vm427_vm1, %v1626_v55, %v1631_v52  ;;  %v556_v57 = vsel %vm427_vm1, %v1627_v54, %v1632_v51  ;;  %v1667_v59 = vpop.eup %1666 }
 0x35e   : > { %v558_v58 = vpack.c.bf16 %v556_v57, %v555_v56  ;;  %v485_v62 = vmul.f32 %v1667_v59, %v1661_v36 }
 0x360   : > { %1534 = vmatpush3.bf16.msra.mxu1 %v558_v58 }
 0x361   : > { %1539 = vmatprep.subr.bf16.mxu1 %v1726_v0  ;;  %v1669_v60 = vpop.eup %1668 }
 0x362   : > { %v501_v63 = vmul.f32 %v1669_v60, %v1843_v22 }
 0x384   : > { %v530_v61 = vpop.permute.xlu1 %529 }
 0x385   : > { %v532_v3 = vsub.f32 %v485_v62, %v530_v61 }
 0x388   : > { %v535_v1 = vpop.permute.xlu1 %534 }
 0x389   : > { %v537_v4 = vadd.f32 %v535_v1, %v501_v63 }
 0x38b   : > { %v538_v5 = vsel %vm427_vm1, %v532_v3, %v537_v4 }
 0x38c   : > { %v557_v6 = vpack.c.bf16 %v538_v5, %v538_v5  ;;  %v607_v7 = vpop.permute.xlu1 %606 }
 0x38d   : > { %v612_v8 = vsel %vm427_vm1, %v607_v7, 0 }
 0x38e   : > { %1536 = vmatmul.mubr.msk.bf16.vlgmr.msra.gmra.mrb[0].mxu1 %vm559_vm3, %v557_v6 }
 0x38f   : > { %1540 = vmatpush3.bf16.xpose.msra.mxu1 %v612_v8  ;;  %1541 = vmatprep.mubr.msk.bf16.mxu1 %vm1727_vm0, %v1726_v0 }
 0x390   : > { %v605_v9 = vpop.permute.xlu1 %604  ;;  %1551 = vmatprep.subr.bf16.mxu1 %v1726_v0 }
 0x394   : > { %v777_v10 = vpop.permute.xlu1 %776 }
 0x395   : > { %v782_v11 = vsel %vm427_vm1, %v777_v10, 0 }
 0x396   : > { %1542 = vmatmul.mubr.msk.bf16.vlgmr.msra.gmra.mrb[4].mxu1 %vm427_vm1, %v605_v9 }
 0x397   : > { %1552 = vmatpush3.bf16.xpose.msra.mxu1 %v782_v11  ;;  %1553 = vmatprep.mubr.msk.bf16.mxu1 %vm1727_vm0, %v1726_v0 }
 0x398   : > { %1563 = vmatprep.subr.bf16.mxu1 %v1726_v0  ;;  %v947_v12 = vpop.permute.xlu1 %946 }
 0x399   : > { %v952_v14 = vsel %vm427_vm1, %v947_v12, 0 }
 0x39e   : > { %1554 = vmatmul.mubr.msk.bf16.vlgmr.msra.gmra.mrb[8].mxu1 %vm427_vm1, %v775_v13 }
 0x39f   : > { %1564 = vmatpush3.bf16.xpose.msra.mxu1 %v952_v14  ;;  %1565 = vmatprep.mubr.msk.bf16.mxu1 %vm1727_vm0, %v1726_v0 }
 0x3a0   : > { %1575 = vmatprep.subr.bf16.mxu1 %v1726_v0 }
 0x3a6   : > { %1566 = vmatmul.mubr.msk.bf16.vlgmr.msra.gmra.mrb[12].mxu1 %vm427_vm1, %v945_v15 }
 0x3a7   : > { %1579 = vmatprep.mubr.msk.bf16.mxu1 %vm1727_vm0, %v1726_v0 }
 0x461   : > { %v1901_v16 = vpop.f32.mrb[0].mxu1 }
 0x462   : > { %v1537_v17 = vpop.f32.mrb[1].mxu1 }
 0x463   : > { %v600_v18 = vpop.f32.mrb[2].mxu1 }
 0x464   : > { %v1538_v19 = vpop.f32.mrb[3].mxu1 }
 0x469   : > { %v1903_v20 = vpop.f32.mrb[4].mxu1 }
 0x46a   : > { %v1543_v21 = vpop.f32.mrb[5].mxu1  ;;  %v666_v25 = vsel %vm486_vm2, %v1903_v20, -inf  ;;  %v655_v3 = vsel %vm427_vm1, %v1903_v20, -inf }
 0x46b   : > { %v651_v22 = vpop.f32.mrb[6].mxu1 }
 0x46c   : > { %v1544_v23 = vpop.f32.mrb[7].mxu1  ;;  %v692_v24 = vsel %vm486_vm2, %v651_v22, -inf  ;;  %v681_v38 = vsel %vm427_vm1, %v651_v22, -inf }
 0x46d   : > { %693 = vmax.xlane.f32.xlu1 %v692_v24 }
 0x471   : > { %667 = vmax.xlane.f32.xlu1 %v666_v25  ;;  %v1908_v26 = vpop.f32.mrb[8].mxu1 }
 0x472   : > { %v1555_v27 = vpop.f32.mrb[9].mxu1  ;;  %v836_v28 = vsel %vm486_vm2, %v1908_v26, -inf  ;;  %v825_v59 = vsel %vm427_vm1, %v1908_v26, -inf }
 0x473   : > { %v821_v29 = vpop.f32.mrb[10].mxu1 }
 0x474   : > { %v862_v30 = vsel %vm486_vm2, %v821_v29, -inf  ;;  %v1556_v31 = vpop.f32.mrb[11].mxu1  ;;  %v851_v39 = vsel %vm427_vm1, %v821_v29, -inf }
 0x475   : > { %837 = vmax.xlane.f32.xlu1 %v836_v28  ;;  %863 = vmax.xlane.f32.xlu0 %v862_v30 }
 0x479   : > { %v1913_v32 = vpop.f32.mrb[12].mxu1 }
 0x47a   : > { %v1567_v33 = vpop.f32.mrb[13].mxu1  ;;  %v1006_v34 = vsel %vm486_vm2, %v1913_v32, -inf  ;;  %v995_v60 = vsel %vm427_vm1, %v1913_v32, -inf }
 0x47b   : > { %1007 = vmax.xlane.f32.xlu1 %v1006_v34  ;;  %v1917_v35 = vpop.f32.mrb[14].mxu1 }
 0x47c   : > { %v1032_v36 = vsel %vm486_vm2, %v1917_v35, -inf  ;;  %v1568_v37 = vpop.f32.mrb[15].mxu1  ;;  %v1021_v40 = vsel %vm427_vm1, %v1917_v35, -inf }
 0x47d   : > { %1033 = vmax.xlane.f32.xlu0 %v1032_v36 }
 0x481   : > { %682 = vmax.xlane.f32.xlu0 %v681_v38 }
 0x485   : > { %852 = vmax.xlane.f32.xlu0 %v851_v39 }
 0x489   : > { %1022 = vmax.xlane.f32.xlu0 %v1021_v40 }
 0x4fa   : > { %v694_v42 = vpop.xlane.xlu1 %693 }
 0x4fb   : > { %v695_v43 = vsub.f32 %v651_v22, %v694_v42 }
 0x4fd   : > { %v696_v44 = vmul.f32 1.442695, %v695_v43 }
 0x4fe   : > { %v668_v62 = vpop.xlane.xlu1 %667 }
 0x4ff   : > { %1670 = vpow2.f32 %v696_v44  ;;  %v669_v1 = vsub.f32 %v1903_v20, %v668_v62 }
 0x501   : > { %v670_v4 = vmul.f32 1.442695, %v669_v1 }
 0x502   : > { %v864_v45 = vpop.xlane.xlu0 %863  ;;  %v838_v9 = vpop.xlane.xlu1 %837 }
 0x503   : > { %v865_v46 = vsub.f32 %v821_v29, %v864_v45  ;;  %v839_v18 = vsub.f32 %v1908_v26, %v838_v9 }
 0x505   : > { %v866_v47 = vmul.f32 1.442695, %v865_v46  ;;  %v840_v21 = vmul.f32 1.442695, %v839_v18 }
 0x507   : > { %1672 = vpow2.f32 %v866_v47 }
 0x508   : > { %v1008_v10 = vpop.xlane.xlu1 %1007 }
 0x509   : > { %v1925_v48 = vpop.eup %1670  ;;  %v1009_v12 = vsub.f32 %v1913_v32, %v1008_v10 }
 0x50a   : > { %699 = vrot.lane.b32.xlu1 %v1925_v48, %s1729_s23  ;;  %v1034_v49 = vpop.xlane.xlu0 %1033 }
 0x50b   : > { %v1035_v50 = vsub.f32 %v1917_v35, %v1034_v49  ;;  %v1010_v14 = vmul.f32 1.442695, %v1009_v12 }
 0x50d   : > { %v1036_v51 = vmul.f32 1.442695, %v1035_v50 }
 0x50e   : > { %v683_v56 = vpop.xlane.xlu0 %682 }
 0x50f   : > { %1674 = vpow2.f32 %v1036_v51  ;;  %v684_v57 = vsub.f32 %v651_v22, %v683_v56 }
 0x511   : > { %v1930_v52 = vpop.eup %1672  ;;  %v685_v58 = vmul.f32 1.442695, %v684_v57 }
 0x512   : > { %869 = vrot.lane.b32.xlu0 %v1930_v52, %s1729_s23  ;;  %v853_v6 = vpop.xlane.xlu0 %852 }
 0x513   : > { %1676 = vpow2.f32 %v685_v58  ;;  %v854_v7 = vsub.f32 %v821_v29, %v853_v6 }
 0x514   : > { %1678 = vpow2.f32 %v670_v4 }
 0x515   : > { %v855_v8 = vmul.f32 1.442695, %v854_v7 }
 0x516   : > { %v1023_v23 = vpop.xlane.xlu0 %1022 }
 0x517   : > { %1680 = vpow2.f32 %v855_v8  ;;  %v1024_v24 = vsub.f32 %v1917_v35, %v1023_v23 }
 0x518   : > { %1682 = vpow2.f32 %v1010_v14 }
 0x519   : > { %v1934_v54 = vpop.eup %1674  ;;  %1684 = vpow2.f32 %v840_v21  ;;  %v1025_v25 = vmul.f32 1.442695, %v1024_v24 }
 0x51a   : > { %1039 = vrot.lane.b32.xlu1 %v1934_v54, %s1729_s23 }
 0x51b   : > { %1686 = vpow2.f32 %v1025_v25 }
 0x51d   : > { %v1942_v61 = vpop.eup %1676 }
 0x51e   : > { %v687_v63 = vsel %vm427_vm1, %v1942_v61, 0.0  ;;  %v1949_v5 = vpop.eup %1678 }
 0x521   : > { %v1681_v11 = vpop.eup %1680 }
 0x522   : > { %v857_v13 = vsel %vm427_vm1, %v1681_v11, 0.0  ;;  %v1957_v19 = vpop.eup %1682 }
 0x523   : > { %v1961_v22 = vpop.eup %1684 }
 0x525   : > { %v1967_v29 = vpop.eup %1686 }
 0x526   : > { %v1027_v30 = vsel %vm427_vm1, %v1967_v29, 0.0 }
 0x531   : > { %826 = vmax.xlane.f32.xlu0 %v825_v59 }
 0x535   : > { %996 = vmax.xlane.f32.xlu0 %v995_v60 }
 0x539   : > { %688 = vadd.xlane.f32.xlu0 %v687_v63 }
 0x53e   : > { %656 = vmax.xlane.f32.xlu1 %v655_v3 }
 0x54f   : > { %673 = vrot.lane.b32.xlu1 %v1949_v5, %s1729_s23 }
 0x573   : > { %858 = vadd.xlane.f32.xlu1 %v857_v13 }
 0x57c   : > { %v700_v15 = vpop.permute.xlu1 %699 }
 0x57d   : > { %v702_v17 = vsel %vm427_vm1, %v700_v15, 0.0 }
 0x57e   : > { %703 = vadd.xlane.f32.xlu0 %v702_v17 }
 0x584   : > { %1013 = vrot.lane.b32.xlu1 %v1957_v19, %s1729_s23  ;;  %v870_v27 = vpop.permute.xlu0 %869 }
 0x585   : > { %v872_v28 = vsel %vm427_vm1, %v870_v27, 0.0 }
 0x58c   : > { %v1040_v31 = vpop.permute.xlu1 %1039 }
 0x58d   : > { %v1042_v33 = vsel %vm427_vm1, %v1040_v31, 0.0 }
 0x594   : > { %843 = vrot.lane.b32.xlu0 %v1961_v22, %s1729_s23 }
 0x5b3   : > { %873 = vadd.xlane.f32.xlu0 %v872_v28 }
 0x5b7   : > { %1028 = vadd.xlane.f32.xlu0 %v1027_v30 }
 0x5bb   : > { %1043 = vadd.xlane.f32.xlu0 %v1042_v33 }
 0x5be   : > { %v827_v34 = vpop.xlane.xlu0 %826 }
 0x5bf   : > { %v828_v36 = vsub.f32 %v1908_v26, %v827_v34 }
 0x5c1   : > { %v829_v35 = vmul.f32 1.442695, %v828_v36 }
 0x5c3   : > { %1688 = vpow2.f32 %v829_v35 }
 0x5cb   : > { %v657_v37 = vpop.xlane.xlu1 %656 }
 0x5cc   : > { %v658_v38 = vsub.f32 %v1903_v20, %v657_v37  ;;  %v997_v20 = vpop.xlane.xlu0 %996 }
 0x5cd   : > { %v1975_v43 = vpop.eup %1688  ;;  %v998_v46 = vsub.f32 %v1913_v32, %v997_v20 }
 0x5ce   : > { %v659_v39 = vmul.f32 1.442695, %v658_v38  ;;  %v831_v44 = vsel %vm427_vm1, %v1975_v43, 0.0 }
 0x5cf   : > { %v674_v40 = vpop.permute.xlu1 %673  ;;  %v999_v49 = vmul.f32 1.442695, %v998_v46 }
 0x5d0   : > { %1690 = vpow2.f32 %v659_v39  ;;  %v676_v42 = vsel %vm427_vm1, %v674_v40, 0.0  ;;  %v689_v50 = vpop.xlane.xlu0 %688 }
 0x5d1   : > { %677 = vadd.xlane.f32.xlu0 %v676_v42 }
 0x5d5   : > { %832 = vadd.xlane.f32.xlu0 %v831_v44 }
 0x5da   : > { %v1979_v45 = vpop.eup %1690 }
 0x5db   : > { %v661_v26 = vsel %vm427_vm1, %v1979_v45, 0.0 }
 0x5dc   : > { %662 = vadd.xlane.f32.xlu1 %v661_v26 }
 0x5ed   : > { %724 = vrot.lane.b32.xlu1 %v1823_v2, %s1733_s27  ;;  %s416_s27 = scalar_lea.vmem %s2112_s10, %s1811_s15 }
 0x5f1   : > { %894 = vrot.lane.b32.xlu1 %v1823_v2, %s1737_s11 }
 0x600   : > { %v859_v47 = vpop.xlane.xlu1 %858 }
 0x601   : > { %1692 = vrcp.f32 %v859_v47 }
 0x602   : > { %1694 = vpow2.f32 %v999_v49 }
 0x603   : > { %1696 = vrcp.f32 %v689_v50 }
 0x604   : > { %v1014_v62 = vpop.permute.xlu1 %1013 }
 0x605   : > { %v1016_v63 = vsel %vm427_vm1, %v1014_v62, 0.0 }
 0x60b   : > { %v1693_v51 = vpop.eup %1692  ;;  %v704_v56 = vpop.xlane.xlu0 %703 }
 0x60c   : > { %v861_v57 = vmul.f32 %v1693_v51, %v1681_v11  ;;  %v1989_v60 = vpop.eup %1694  ;;  %1698 = vrcp.f32 %v704_v56 }
 0x60d   : > { %v1001_v32 = vsel %vm427_vm1, %v1989_v60, 0.0  ;;  %v1697_v1 = vpop.eup %1696 }
 0x60e   : > { %883 = vrot.lane.b32.xlu1 %v861_v57, %s1734_s28  ;;  %v691_v3 = vmul.f32 %v1697_v1, %v1942_v61 }
 0x60f   : > { %v844_v58 = vpop.permute.xlu0 %843 }
 0x610   : > { %v846_v59 = vsel %vm427_vm1, %v844_v58, 0.0 }
 0x611   : > { %847 = vadd.xlane.f32.xlu0 %v846_v59 }
 0x612   : > { %1064 = vrot.lane.b32.xlu1 %v1823_v2, %s1738_s12 }
 0x615   : > { %1002 = vadd.xlane.f32.xlu0 %v1001_v32 }
 0x616   : > { %v1699_v4 = vpop.eup %1698 }
 0x617   : > { %v706_v2 = vmul.f32 %v1699_v4, %v1925_v48 }
 0x619   : > { %1017 = vadd.xlane.f32.xlu0 %v1016_v63 }
 0x62f   : > { %1634 = vrot.lane.b32.xlu0 %v1860_v41, %s1737_s11 }
 0x633   : > { %713 = vrot.lane.b32.xlu0 %v691_v3, %s1734_s28 }
 0x637   : > { %708 = vrot.lane.b32.xlu0 %v706_v2, %s1729_s23 }
 0x63b   : > { %1639 = vrot.lane.b32.xlu0 %v1860_v41, %s1738_s12 }
 0x640   : > { %v874_v6 = vpop.xlane.xlu0 %873 }
 0x641   : > { %1700 = vrcp.f32 %v874_v6 }
 0x644   : > { %v1029_v7 = vpop.xlane.xlu0 %1028 }
 0x645   : > { %1702 = vrcp.f32 %v1029_v7 }
 0x648   : > { %v1044_v8 = vpop.xlane.xlu0 %1043 }
 0x649   : > { %1704 = vrcp.f32 %v1044_v8 }
 0x64b   : > { %v1701_v9 = vpop.eup %1700 }
 0x64c   : > { %v876_v10 = vmul.f32 %v1701_v9, %v1930_v52 }
 0x64e   : > { %878 = vrot.lane.b32.xlu0 %v876_v10, %s1729_s23 }
 0x64f   : > { %v1703_v61 = vpop.eup %1702 }
 0x650   : > { %v1031_v11 = vmul.f32 %v1703_v61, %v1967_v29 }
 0x652   : > { %1644 = vrot.lane.b32.xlu0 %v1860_v41, %s1739_s14  ;;  %1053 = vrot.lane.b32.xlu1 %v1031_v11, %s1734_s28 }
 0x653   : > { %v1705_v48 = vpop.eup %1704 }
 0x654   : > { %v1046_v12 = vmul.f32 %v1705_v48, %v1934_v54 }
 0x656   : > { %1048 = vrot.lane.b32.xlu0 %v1046_v12, %s1729_s23  ;;  %v1648_v12 = vld [vmem:[%s2106_s4] sm:$0xff]  }
 0x657   : > { %1576 = vmatpush3.bf16.msra.mxu1 %v1648_v12 }
 0x658   : > { %1577 = vmatprep.subr.bf16.mxu1 %v1726_v0 }
 0x65e   : > { %v678_v13 = vpop.xlane.xlu0 %677 }
 0x65f   : > { %1706 = vrcp.f32 %v678_v13  ;;  %v1649_v13 = vld [vmem:[%s2106_s4 + $0x8] sm:$0xff]  }
 0x660   : > { %1578 = vmatpush3.bf16.msra.mxu1 %v1649_v13 }
 0x661   : > { %1591 = vmatprep.subr.bf16.mxu1 %v1726_v0 }
 0x662   : > { %v833_v14 = vpop.xlane.xlu0 %832 }
 0x669   : > { %v663_v17 = vpop.xlane.xlu1 %662  ;;  %v1707_v41 = vpop.eup %1706 }
 0x66a   : > { %1708 = vrcp.f32 %v663_v17  ;;  %v680_v31 = vmul.f32 %v1707_v41, %v1949_v5 }
 0x66d   : > { %v725_v25 = vpop.permute.xlu1 %724 }
 0x674   : > { %v1709_v28 = vpop.eup %1708 }
 0x675   : > { %v665_v33 = vmul.f32 %v1709_v28, %v1979_v45 }
 0x69e   : > { %v848_v15 = vpop.xlane.xlu0 %847 }
 0x69f   : > { %1710 = vrcp.f32 %v848_v15 }
 0x6a0   : > { %1712 = vrcp.f32 %v833_v14  ;;  %v1650_v14 = vld [vmem:[%s2107_s5] sm:$0xff]  }
 0x6a2   : > { %v1003_v52 = vpop.xlane.xlu0 %1002 }
 0x6a3   : > { %1714 = vrcp.f32 %v1003_v52  ;;  %v1652_v52 = vld [vmem:[%s2107_s5 + $0x8] sm:$0xff]  }
 0x6a6   : > { %v1018_v18 = vpop.xlane.xlu0 %1017 }
 0x6a7   : > { %1716 = vrcp.f32 %v1018_v18 }
 0x6a9   : > { %v1711_v44 = vpop.eup %1710 }
 0x6aa   : > { %v1635_v21 = vpop.permute.xlu0 %1634  ;;  %v1713_v26 = vpop.eup %1712  ;;  %v850_v46 = vmul.f32 %v1711_v44, %v1961_v22 }
 0x6ab   : > { %v1637_v23 = vunpack.i.h.bf16 %v1635_v21  ;;  %v1636_v24 = vunpack.i.l.bf16 %v1635_v21  ;;  %v835_v47 = vmul.f32 %v1713_v26, %v1975_v43  ;;  %v1156_v26 = vld [vmem:[%s2110_s8] sm:$0x1] }
 0x6ad   : > { %v728_v27 = vsel %vm427_vm1, %v1637_v23, %v1626_v55  ;;  %v727_v54 = vsel %vm427_vm1, %v1636_v24, %v725_v25  ;;  %v895_v55 = vpop.permute.xlu1 %894  ;;  %v1715_v57 = vpop.eup %1714 }
 0x6ae   : > { %v730_v29 = vpack.c.bf16 %v728_v27, %v727_v54  ;;  %v714_v30 = vpop.permute.xlu0 %713  ;;  %v1005_v2 = vmul.f32 %v1715_v57, %v1989_v60 }
 0x6af   : > { %v716_v36 = vadd.f32 %v714_v30, %v680_v31 }
 0x6b0   : > { %1546 = vmatpush3.bf16.msra.mxu0 %v730_v29 }
 0x6b1   : > { %1557 = vmatprep.subr.bf16.mxu0 %v1726_v0  ;;  %v884_v20 = vpop.permute.xlu1 %883  ;;  %v1717_v59 = vpop.eup %1716 }
 0x6b2   : > { %v709_v34 = vpop.permute.xlu0 %708  ;;  %v886_v51 = vadd.f32 %v884_v20, %v850_v46  ;;  %v1020_v22 = vmul.f32 %v1717_v59, %v1957_v19 }
 0x6b3   : > { %v711_v35 = vsub.f32 %v665_v33, %v709_v34  ;;  %v1651_v34 = vld [vmem:[%s2108_s6] sm:$0xff]  }
 0x6b5   : > { %v717_v53 = vsel %vm427_vm1, %v711_v35, %v716_v36  ;;  %v1065_v49 = vpop.permute.xlu1 %1064 }
 0x6b6   : > { %v729_v37 = vpack.c.bf16 %v717_v53, %v717_v53  ;;  %v1640_v38 = vpop.permute.xlu0 %1639 }
 0x6b7   : > { %v1642_v39 = vunpack.i.h.bf16 %v1640_v38  ;;  %v1641_v40 = vunpack.i.l.bf16 %v1640_v38 }
 0x6b8   : > { %1548 = vmatmul.mubr.msk.bf16.vlgmr.msra.gmra.mrb[4].mxu0 %vm559_vm3, %v729_v37  ;;  %v1653_v37 = vld [vmem:[%s2108_s6 + $0x8] sm:$0xff]  }
 0x6b9   : > { %v897_v5 = vsel %vm427_vm1, %v1641_v40, %v895_v55  ;;  %v898_v42 = vsel %vm427_vm1, %v1642_v39, %v1636_v24  ;;  %1559 = vmatprep.mubr.msk.bf16.mxu0 %vm1727_vm0, %v1726_v0 }
 0x6ba   : > { %v900_v45 = vpack.c.bf16 %v898_v42, %v897_v5  ;;  %v1330_v42 = vlaneseq }
 0x6bc   : > { %1558 = vmatpush3.bf16.msra.mxu0 %v900_v45  ;;  %v1331_v44 = vshrl.u32 %v1330_v42, 7  ;;  %v1155_v45 = vld [vmem:[%s2109_s7] sm:$0x1] }
 0x6bd   : > { %1569 = vmatprep.subr.bf16.mxu0 %v1726_v0  ;;  %v1328_v20 = vsub.f32 %v1155_v45, %v1156_v26  ;;  %v1338_v57 = vadd.f32 %v1156_v26, %v1155_v45 }
 0x6be   : > { %v1332_v46 = vsub.s32 0, %v1331_v44 }
 0x6c0   : > { %v879_v50 = vpop.permute.xlu0 %878 }
 0x6c1   : > { %v881_v56 = vsub.f32 %v835_v47, %v879_v50 }
 0x6c3   : > { %v887_v58 = vsel %vm427_vm1, %v881_v56, %v886_v51  ;;  %v1333_v51 = vrot.slane %v1328_v20, %v1332_v46 }
 0x6c4   : > { %v899_v32 = vpack.c.bf16 %v887_v58, %v887_v58  ;;  %v1645_v62 = vpop.permute.xlu0 %1644  ;;  %v1054_v3 = vpop.permute.xlu1 %1053 }
 0x6c5   : > { %v1647_v63 = vunpack.i.h.bf16 %v1645_v62  ;;  %v1646_v1 = vunpack.i.l.bf16 %v1645_v62  ;;  %v1056_v8 = vadd.f32 %v1054_v3, %v1020_v22 }
 0x6c6   : > { %1560 = vmatmul.mubr.msk.bf16.vlgmr.msra.gmra.mrb[8].mxu0 %vm559_vm3, %v899_v32  ;;  %v1346_v32 = vld [vmem:[%s404_s18] sm:$0xff] }
 0x6c7   : > { %v1067_v4 = vsel %vm427_vm1, %v1646_v1, %v1065_v49  ;;  %v1068_v43 = vsel %vm427_vm1, %v1647_v63, %v1641_v40  ;;  %1571 = vmatprep.mubr.msk.bf16.mxu0 %vm1727_vm0, %v1726_v0 }
 0x6c8   : > { %v1070_v6 = vpack.c.bf16 %v1068_v43, %v1067_v4  ;;  %v1049_v7 = vpop.permute.xlu0 %1048  ;;  %v1343_v4 = vrot.slane %v1338_v57, %v1332_v46 }
 0x6c9   : > { %v1051_v9 = vsub.f32 %v1005_v2, %v1049_v7 }
 0x6ca   : > { %1570 = vmatpush3.bf16.msra.mxu0 %v1070_v6 }
 0x6cb   : > { %v1057_v10 = vsel %vm427_vm1, %v1051_v9, %v1056_v8  ;;  %1583 = vmatprep.subr.bf16.mxu0 %v1726_v0  ;;  %v1349_v9 = vld [vmem:[%s408_s25] sm:$0xff] }
 0x6cc   : > { %v1069_v61 = vpack.c.bf16 %v1057_v10, %v1057_v10 }
 0x6ce   : > { %1572 = vmatmul.mubr.msk.bf16.vlgmr.msra.gmra.mrb[12].mxu0 %vm559_vm3, %v1069_v61 }
 0x6cf   : > { %1587 = vmatprep.mubr.msk.bf16.mxu0 %vm1727_vm0, %v1726_v0  ;;  %1584 = vmatpush3.bf16.msra.mxu0 %v1650_v14 }
 0x6d0   : > { %1585 = vmatprep.subr.bf16.mxu0 %v1726_v0 }
 0x6d3   : > { %1586 = vmatpush3.bf16.msra.mxu0 %v1652_v52 }
 0x78b   : > { %v768_v19 = vpop.f32.mrb[4].mxu0 }
 0x78c   : > { %1115 = vrot.lane.b32.xlu0 %v768_v19, %s1734_s28  ;;  %v1549_v60 = vpop.f32.mrb[5].mxu0 }
 0x78d   : > { %v771_v11 = vpop.f32.mrb[6].mxu0 }
 0x78e   : > { %v1550_v48 = vpop.f32.mrb[7].mxu0 }
 0x799   : > { %v938_v15 = vpop.f32.mrb[8].mxu0 }
 0x79a   : > { %1119 = vrot.lane.b32.xlu1 %v938_v15, %s1740_s22  ;;  %v1561_v17 = vpop.f32.mrb[9].mxu0 }
 0x79b   : > { %v941_v18 = vpop.f32.mrb[10].mxu0 }
 0x79c   : > { %v1562_v21 = vpop.f32.mrb[11].mxu0 }
 0x79e   : > { %1131 = vrot.lane.b32.xlu1 %v1901_v16, %s1729_s23 }
 0x7a1   : > { %v1108_v23 = vpop.f32.mrb[12].mxu0 }
 0x7a2   : > { %1137 = vrot.lane.b32.xlu1 %v1108_v23, %s1740_s22  ;;  %1123 = vrot.lane.b32.xlu0 %v1108_v23, %s1741_s26  ;;  %v1573_v24 = vpop.f32.mrb[13].mxu0 }
 0x7a3   : > { %v1111_v25 = vpop.f32.mrb[14].mxu0 }
 0x7a4   : > { %v1574_v41 = vpop.f32.mrb[15].mxu0 }
 0x7a6   : > { %1134 = vrot.lane.b32.xlu0 %v938_v15, %s1734_s28 }
 0x7fe   : > { %v1116_v54 = vpop.permute.xlu0 %1115 }
 0x7ff   : > { %v1126_v28 = vsel %vm427_vm1, %v1901_v16, %v1116_v54 }
 0x80c   : > { %v1120_v27 = vpop.permute.xlu1 %1119 }
 0x80d   : > { %v1127_v30 = vsel %vm559_vm3, %v1126_v28, %v1120_v27 }
 0x810   : > { %v1132_v29 = vpop.permute.xlu1 %1131 }
 0x811   : > { %v1140_v35 = vsel %vm427_vm1, %v1132_v29, %v768_v19 }
 0x814   : > { %v1124_v31 = vpop.permute.xlu0 %1123  ;;  %v1138_v55 = vpop.permute.xlu1 %1137 }
 0x815   : > { %v1129_v33 = vsel %vm1128_vm4, %v1127_v30, %v1124_v31 }
 0x816   : > { %v1157_v36 = vpack.c.bf16 %v1129_v33, %v1129_v33 }
 0x818   : > { %1580 = vmatmul.mubr.msk.bf16.vlgmr.msra.gmra.mrb[16].mxu1 %vm1170_vm5, %v1157_v36  ;;  %v1135_v53 = vpop.permute.xlu0 %1134 }
 0x819   : > { %v1141_v16 = vsel %vm559_vm3, %v1140_v35, %v1135_v53  ;;  %1592 = vmatpush3.bf16.msra.mxu1 %v1651_v34  ;;  %1595 = vmatprep.mubr.msk.bf16.mxu1 %vm1727_vm0, %v1726_v0 }
 0x81a   : > { %v1142_v38 = vsel %vm1128_vm4, %v1141_v16, %v1138_v55  ;;  %1593 = vmatprep.subr.bf16.mxu1 %v1726_v0 }
 0x81b   : > { %v1214_v39 = vpack.c.bf16 %v1142_v38, %v1142_v38  ;;  %v1270_v40 = vadd.f32 %v1142_v38, %v1129_v33 }
 0x81d   : > { %v1271_v5 = vpack.c.bf16 %v1270_v40, %v1270_v40  ;;  %1588 = vmatmul.mubr.msk.bf16.vlgmr.msra.gmra.mrb[16].mxu0 %vm1170_vm5, %v1214_v39  ;;  %1594 = vmatpush3.bf16.msra.mxu1 %v1653_v37 }
 0x820   : > { %1596 = vmatmul.mubr.msk.bf16.vlgmr.msra.gmra.mrb[20].mxu1 %vm1170_vm5, %v1271_v5 }
 0x8eb   : > { %v1208_v0 = vpop.f32.mrb[16].mxu1 }
 0x8ec   : > { %v1581_v47 = vpop.f32.mrb[17].mxu1 }
 0x8ed   : > { %v1211_v49 = vpop.f32.mrb[18].mxu1 }
 0x8ee   : > { %v1582_v50 = vpop.f32.mrb[19].mxu1 }
 0x8f0   : > { %v1264_v56 = vpop.f32.mrb[16].mxu0 }
 0x8f1   : > { %v1327_v58 = vsub.f32 %v1208_v0, %v1264_v56  ;;  %v1589_v59 = vpop.f32.mrb[17].mxu0 }
 0x8f2   : > { %v1267_v62 = vpop.f32.mrb[18].mxu0 }
 0x8f3   : > { %v1335_v63 = vadd.f32 %v1333_v51, %v1327_v58  ;;  %v1590_v1 = vpop.f32.mrb[19].mxu0  ;;  %v1321_v3 = vpop.f32.mrb[20].mxu1 }
 0x8f4   : > { %v1336_v22 = vsub.f32 %v1321_v3, %v1208_v0  ;;  %v1597_v43 = vpop.f32.mrb[21].mxu1 }
 0x8f5   : > { %v1347_v2 = vadd.f32 %v1346_v32, %v1335_v63  ;;  %v1324_v6 = vpop.f32.mrb[22].mxu1 }
 0x8f6   : > { %v1337_v7 = vsub.f32 %v1336_v22, %v1264_v56  ;;  %v1598_v8 = vpop.f32.mrb[23].mxu1 }
 0x8f7   : > { %1348 = vst.msk [vmem:[%s412_s21] sm:$0xff] %vm1170_vm5, %v1347_v2 }
 0x8f8   : > { %v1345_v10 = vadd.f32 %v1343_v4, %v1337_v7 }
 0x8fa   : > { %v1350_v61 = vadd.f32 %v1349_v9, %v1345_v10 }
 0x8fc   : > { %1351 = vst.msk [vmem:[%s416_s27] sm:$0xff] %vm1170_vm5, %v1350_v61 }
 0x8fd PF: > { %s21_s13 = sadd.s32 1, %s1724_s13  }
 0x8fe   : > { %p18_p4 = scmp.ge.s32.totalorder %s21_s13, 4  }
 0x900   :  { %20 = sbr.rel (!%p18_p4) target bundleno = 1 (0x1), region = 107 }

// kernel: transformer_forward.15
= control target key start
LH: loop header
LB: loop body
LE: loop exit
PB: predicated region body
PF: predicated region fallthrough
CT: control target
= control target key end

     0   :  { %vm43_vm0 = vcmask 254976   ;;  %s876_s0 = inlined_call_operand.vmem [shape: f32[2,32], index: 0, kind: input, shape index: {}]   ;;  %s877_s1 = inlined_call_operand.vmem [shape: f32[2,32], index: 1, kind: input, shape index: {}]   ;;  %s878_s2 = inlined_call_operand.vmem [shape: f32[1,32], index: 2, kind: input, shape index: {}]   ;;  %s879_s3 = inlined_call_operand.vmem [shape: f32[1,32], index: 3, kind: input, shape index: {}]   ;;  %s880_s4 = inlined_call_operand.vmem [shape: bf16[32,32], index: 4, kind: input, shape index: {}]   ;;  %s881_s5 = inlined_call_operand.vmem [shape: bf16[32,32], index: 5, kind: input, shape index: {}]   ;;  %s882_s6 = inlined_call_operand.vmem [shape: f32[1,32], index: 6, kind: input, shape index: {}]   ;;  %s883_s7 = inlined_call_operand.vmem [shape: bf16[32,8], index: 7, kind: input, shape index: {}]   ;;  %s884_s8 = inlined_call_operand.vmem [shape: f32[1,8], index: 8, kind: input, shape index: {}]   ;;  %s885_s9 = inlined_call_operand.vmem [shape: bf16[8,1000], index: 9, kind: input, shape index: {}]   ;;  %s886_s10 = inlined_call_operand.vmem [shape: f32[1,1000], index: 10, kind: input, shape index: {}]   ;;  %s887_s11 = inlined_call_operand.hbm [shape: f32[2,1000], index: 11, kind: output, shape index: {}]  }
   0x1   :  { %v40_v0 = vld [vmem:[%s876_s0] sm:$0x3] }
   0x2   :  { %v72_v1 = vld [vmem:[%s877_s1] sm:$0x3]  ;;  %v44_v2 = vsel %vm43_vm0, %v40_v0, 0.0 }
   0x3   :  { %v73_v3 = vsel %vm43_vm0, %v72_v1, 0.0  ;;  %45 = vadd.xlane.f32.xlu0 %v44_v2 }
   0x4   :  { %16 = vsyncpa [#allocation3], 0  ;;  %v687_v14 = vld [vmem:[%s880_s4] sm:$0xff]   ;;  %v729_v15 = vmov 0.0   ;;  %v689_v17 = vld [vmem:[%s880_s4 + $0x8] sm:$0xff]   ;;  %vm730_vm1 = vmmov 0  }
   0x5   :  { %666 = vmatprep.subr.bf16.mxu1 %v729_v15  ;;  %658 = vmatprep.subr.bf16.mxu0 %v729_v15  ;;  %v688_v16 = vld [vmem:[%s881_s5] sm:$0xff]   ;;  %v690_v18 = vld [vmem:[%s881_s5 + $0x8] sm:$0xff]   ;;  %vm110_vm2 = vcmask 261120   ;;  %vm356_vm3 = vcmask 1043456   ;;  %v287_v60 = vld [vmem:[%s885_s9 + $0x10] sm:$0xff]  ;;  %v731_v62 = vmov 0  }
   0x6   :  { %667 = vmatpush3.bf16.msra.mxu1 %v687_v14  ;;  %659 = vmatpush3.bf16.msra.mxu0 %v688_v16  ;;  %v620_v26 = vld [vmem:[%s878_s2] ss:$0 sm:$0xff]  ;;  %v692_v38 = vld [vmem:[%s883_s7 + $0x8] sm:$0xff]   ;;  %v288_v61 = vld [vmem:[%s885_s9 + $0x18] sm:$0xff]  ;;  %v638_v63 = vcombine.high %v287_v60, %v287_v60  ;;  %v637_v2 = vcombine.low %v287_v60, %v287_v60  ;;  %vm352_vm4 = vcmask 64512   ;;  %vm598_vm5 = vcmask 1041408  }
   0x7   :  { %74 = vadd.xlane.f32.xlu0 %v73_v3  ;;  %668 = vmatprep.subr.bf16.mxu1 %v729_v15  ;;  %v621_v28 = vld [vmem:[%s879_s3] ss:$0 sm:$0xff]  ;;  %v286_v40 = vld [vmem:[%s885_s9 + $0x8] sm:$0xff]  ;;  %v639_v3 = vcombine.low %v288_v61, %v288_v61  ;;  %vm599_vm6 = vcmask 1043458   ;;  %vm601_vm8 = vcmask 1045508   ;;  %vm603_vm10 = vcmask 850950  }
   0x8   :  { %670 = vmatprep.mubr.msk.bf16.mxu1 %vm730_vm1, %v729_v15  ;;  %660 = vmatprep.subr.bf16.mxu0 %v729_v15  ;;  %v691_v37 = vld [vmem:[%s883_s7] sm:$0xff]   ;;  %v636_v42 = vcombine.high %v286_v40, %v286_v40  ;;  %v635_v56 = vcombine.low %v286_v40, %v286_v40  ;;  %vm600_vm7 = vmor %vm599_vm6, %vm598_vm5 }
   0x9   :  { %662 = vmatprep.mubr.msk.bf16.mxu0 %vm730_vm1, %v729_v15  ;;  %v285_v39 = vld [vmem:[%s885_s9] sm:$0xff]  ;;  %vm602_vm9 = vmor %vm601_vm8, %vm600_vm7 }
   0xa   :  { %669 = vmatpush3.bf16.msra.mxu1 %v689_v17  ;;  %661 = vmatpush3.bf16.msra.mxu0 %v690_v18  ;;  %v634_v41 = vcombine.high %v285_v39, %v285_v39  ;;  %v633_v43 = vcombine.low %v285_v39, %v285_v39  ;;  %v628_v50 = vld [vmem:[%s882_s6] ss:$0 sm:$0xff]  ;;  %v364_v59 = vsel %vm356_vm3, %v635_v56, 0  ;;  %vm604_vm11 = vmor %vm603_vm10, %vm602_vm9 }
   0xb   :  { %674 = vmatprep.subr.bf16.mxu0 %v729_v15  ;;  %v290_v16 = vld [vmem:[%s886_s10] sm:$0xff]  ;;  %s733_s10 = smov [#allocation2]  }
   0xc   :  { %641 = vmatprep.subr.msk.bf16.mxu1 %vm356_vm3, %v634_v41  ;;  %v358_v44 = vsel %vm356_vm3, %v633_v43, 0  ;;  %s612_s1 = sshll.u32 %s733_s10, 4  ;;  %s613_s1 = int_to_ptr.vmem [resolvable:$true] %s612_s1 }
   0xd   :  { %s705_s21 = scalar_lea.vmem %s613_s1, 256  ;;  %p710_p1 = scmp.lt.s32.totalorder %s613_s1, %s613_s1 }
   0xe   :  { %p706_p0 = scmp.ne.s32.totalorder %s613_s1, %s705_s21  ;;  %p711_p2 = scmp.lt.s32.totalorder %s705_s21, %s705_s21 }
  0x10   :  { %p712_p3 = por %p711_p2, %p710_p1 }
  0x12   :  { %p713_p4 = pnand %p712_p3, %p706_p0 }
  0x90   :  { %v46_v4 = vpop.xlane.xlu0 %45 }
  0x91   :  { %v48_v5 = vmul.f32 0.03125, %v46_v4 }
  0x93   :  { %v49_v6 = vsub.f32 %v40_v0, %v48_v5  ;;  %v640_v0 = vcombine.high %v288_v61, %v288_v61 }
  0x94   :  { %v75_v7 = vpop.xlane.xlu0 %74 }
  0x95   :  { %v76_v8 = vmul.f32 0.03125, %v75_v7  ;;  %v50_v9 = vmul.f32 %v49_v6, %v49_v6 }
  0x97   :  { %v77_v10 = vsub.f32 %v72_v1, %v76_v8  ;;  %v51_v11 = vsel %vm43_vm0, %v50_v9, 0.0  ;;  %v629_v1 = vld [vmem:[%s884_s8] ss:$0 sm:$0xff] }
  0x98   :  { %52 = vadd.xlane.f32.xlu1 %v51_v11  ;;  %v376_v11 = vsel %vm356_vm3, %v639_v3, 0 }
  0x99   :  { %v78_v12 = vmul.f32 %v77_v10, %v77_v10 }
  0x9b   :  { %v79_v13 = vsel %vm43_vm0, %v78_v12, 0.0  ;;  %v292_v12 = vlaneseq }
  0x9c   :  { %80 = vadd.xlane.f32.xlu1 %v79_v13 }
  0x9d   :  { %v293_v13 = vshrl.u32 %v292_v12, 7 }
  0x9f   :  { %v294_v14 = vsub.s32 0, %v293_v13  ;;  %v298_v17 = vsub.s32 1, %v293_v13  ;;  %v306_v18 = vsub.s32 3, %v293_v13  ;;  %v322_v39 = vsub.s32 7, %v293_v13 }
 0x125   :  { %v53_v19 = vpop.xlane.xlu1 %52 }
 0x126   :  { %v54_v20 = vmul.f32 0.03125, %v53_v19  ;;  %v732_v19 = vmov 1983009808  }
 0x128   :  { %v55_v21 = vadd.f32 1e-05, %v54_v20  ;;  %v564_v20 = vunpack.c.l.s4 %v732_v19 }
 0x129   :  { %v81_v22 = vpop.xlane.xlu1 %80 }
 0x12a   :  { %701 = vrsqrt.f32 %v55_v21  ;;  %v82_v23 = vmul.f32 0.03125, %v81_v22  ;;  %v295_v21 = vrot.slane %v290_v16, %v294_v14 }
 0x12c   :  { %v83_v24 = vadd.f32 1e-05, %v82_v23  ;;  %v299_v23 = vrot.slane %v290_v16, %v298_v17 }
 0x12e   :  { %703 = vrsqrt.f32 %v83_v24  ;;  %v307_v24 = vrot.slane %v290_v16, %v306_v18 }
 0x134   :  { %v702_v25 = vpop.eup %701 }
 0x135   :  { %v57_v27 = vmul.f32 %v702_v25, %v49_v6 }
 0x137   :  { %v64_v29 = vmul.f32 %v620_v26, %v57_v27  ;;  %v565_v27 = vunpack.c.0.s8 %v564_v20 }
 0x138   :  { %v704_v30 = vpop.eup %703 }
 0x139   :  { %v85_v31 = vmul.f32 %v704_v30, %v77_v10  ;;  %v71_v32 = vadd.f32 %v621_v28, %v64_v29  ;;  %v370_v10 = vsel %vm356_vm3, %v637_v2, 0 }
 0x13b   :  { %v92_v33 = vpack.c.bf16 %v71_v32, %v71_v32  ;;  %v86_v34 = vmul.f32 %v620_v26, %v85_v31  ;;  %v310_v32 = vsub.s32 4, %v293_v13 }
 0x13d   :  { %671 = vmatmul.mubr.msk.bf16.vlgmr.msra.gmra.mrb[0].mxu1 %vm110_vm2, %v92_v33  ;;  %v87_v35 = vadd.f32 %v621_v28, %v86_v34  ;;  %v318_v33 = vsub.s32 6, %v293_v13 }
 0x13e   :  { %382 = vmatpush1.bf16.msra.mxu1 %v358_v44  ;;  %413 = vmatprep.mubr.bf16.mxu1 %v731_v62 }
 0x13f   :  { %v97_v36 = vpack.c.bf16 %v87_v35, %v87_v35  ;;  %645 = vmatprep.subr.msk.bf16.mxu1 %vm356_vm3, %v638_v63 }
 0x141   :  { %663 = vmatmul.mubr.msk.bf16.vlgmr.msra.gmra.mrb[0].mxu0 %vm110_vm2, %v97_v36 }
 0x142   :  { %678 = vmatprep.mubr.msk.bf16.mxu0 %vm730_vm1, %v729_v15  ;;  %675 = vmatpush3.bf16.msra.mxu0 %v691_v37 }
 0x143   :  { %676 = vmatprep.subr.bf16.mxu0 %v729_v15  ;;  %v302_v15 = vsub.s32 2, %v293_v13 }
 0x145   :  { %v303_v22 = vrot.slane %v290_v16, %v302_v15 }
 0x146   :  { %677 = vmatpush3.bf16.msra.mxu0 %v692_v38  ;;  %v314_v38 = vsub.s32 5, %v293_v13 }
 0x147   :  { %643 = vmatprep.subr.msk.bf16.mxu0 %vm356_vm3, %v636_v42 }
 0x210   :  { %v203_v45 = vpop.f32.mrb[0].mxu1 }
 0x211   :  { %v672_v46 = vpop.f32.mrb[1].mxu1 }
 0x212   :  { %v206_v47 = vpop.f32.mrb[2].mxu1 }
 0x213   :  { %v673_v48 = vpop.f32.mrb[3].mxu1  ;;  %v311_v47 = vrot.slane %v290_v16, %v310_v32 }
 0x214   :  { %v148_v49 = vpop.f32.mrb[0].mxu0  ;;  %v319_v48 = vrot.slane %v290_v16, %v318_v33 }
 0x215   :  { %v204_v51 = vadd.f32 %v203_v45, %v148_v49  ;;  %v664_v52 = vpop.f32.mrb[1].mxu0  ;;  %v568_v45 = vsub.s32 %v565_v27, %v293_v13 }
 0x216   :  { %v151_v53 = vpop.f32.mrb[2].mxu0  ;;  %v323_v52 = vrot.slane %v290_v16, %v322_v39 }
 0x217   :  { %v216_v54 = vadd.f32 %v628_v50, %v204_v51  ;;  %v665_v55 = vpop.f32.mrb[3].mxu0  ;;  %v315_v51 = vrot.slane %v290_v16, %v314_v38 }
 0x219   :  { %v217_v57 = vmax.f32 %v216_v54, 0.0 }
 0x21b   :  { %v222_v58 = vpack.c.bf16 %v217_v57, %v217_v57 }
 0x21d   :  { %679 = vmatmul.mubr.msk.bf16.vlgmr.msra.gmra.mrb[4].mxu0 %vm110_vm2, %v222_v58 }
 0x21e   :  { %423 = vmatpush1.bf16.msra.mxu0 %v364_v59  ;;  %454 = vmatprep.mubr.bf16.mxu0 %v731_v62 }
 0x21f   :  { %647 = vmatprep.subr.msk.bf16.mxu0 %vm356_vm3, %v640_v0 }
 0x2f0   :  { %v279_v4 = vpop.f32.mrb[4].mxu0 }
 0x2f1   :  { %v280_v5 = vadd.f32 %v629_v1, %v279_v4  ;;  %v680_v6 = vpop.f32.mrb[5].mxu0 }
 0x2f2   :  { %v282_v7 = vpop.f32.mrb[6].mxu0 }
 0x2f3   :  { %v289_v8 = vpack.c.bf16 %v280_v5, %v280_v5  ;;  %v681_v9 = vpop.f32.mrb[7].mxu0 }
 0x2f5   :  { %642 = vmatmul.mubr.msk.bf16.vlgmr.msra.gmra.mrb[4].mxu1 %vm352_vm4, %v289_v8  ;;  %644 = vmatmul.mubr.msk.bf16.vlgmr.msra.gmra.mrb[8].mxu0 %vm352_vm4, %v289_v8 }
 0x2f6   :  { %464 = vmatpush1.bf16.msra.mxu1 %v370_v10  ;;  %505 = vmatpush1.bf16.msra.mxu0 %v376_v11 }
 0x2f7   :  { %495 = vmatprep.mubr.bf16.mxu1 %v731_v62  ;;  %536 = vmatprep.mubr.bf16.mxu0 %v731_v62 }
 0x2fd   :  { %646 = vmatmul.mubr.msk.bf16.vlgmr.msra.gmra.mrb[8].mxu1 %vm352_vm4, %v289_v8  ;;  %648 = vmatmul.mubr.msk.bf16.vlgmr.msra.gmra.mrb[12].mxu0 %vm352_vm4, %v289_v8 }
 0x3c8   :  { %v415_v25 = vpop.f32.mrb[4].mxu1  ;;  %v456_v26 = vpop.f32.mrb[8].mxu0 }
 0x3c9   :  { %v416_v28 = vadd.f32 %v415_v25, %v295_v21  ;;  %v457_v29 = vadd.f32 %v456_v26, %v303_v22  ;;  %v417_v30 = vpop.f32.mrb[5].mxu1  ;;  %v458_v31 = vpop.f32.mrb[9].mxu0 }
 0x3ca   :  { %v418_v34 = vadd.f32 %v417_v30, %v299_v23  ;;  %v459_v35 = vadd.f32 %v458_v31, %v307_v24  ;;  %v419_v36 = vpop.f32.mrb[6].mxu1  ;;  %v460_v37 = vpop.f32.mrb[10].mxu0 }
 0x3cb   :  { %v545_v40 = vmax.f32 %v416_v28, 0.0  ;;  %v547_v41 = vmax.f32 %v457_v29, 0.0  ;;  %v420_v42 = vpop.f32.mrb[7].mxu1  ;;  %v461_v43 = vpop.f32.mrb[11].mxu0 }
 0x3cc   :  { %v546_v44 = vmax.f32 %v418_v34, 0.0  ;;  %v548_v46 = vmax.f32 %v459_v35, 0.0 }
 0x3ce   :  { %v561_v49 = vcombine.low %v545_v40, %v546_v44  ;;  %v562_v50 = vcombine.low %v547_v41, %v548_v46 }
 0x3d0   :  { %v569_v53 = vrot.slane %v561_v49, %v568_v45  ;;  %v576_v54 = vrot.slane %v562_v50, %v568_v45  ;;  %v497_v55 = vpop.f32.mrb[8].mxu1  ;;  %v538_v56 = vpop.f32.mrb[12].mxu0 }
 0x3d1   :  { %v498_v57 = vadd.f32 %v497_v55, %v311_v47  ;;  %v539_v58 = vadd.f32 %v538_v56, %v319_v48  ;;  %v499_v59 = vpop.f32.mrb[9].mxu1  ;;  %v540_v60 = vpop.f32.mrb[13].mxu0 }
 0x3d2   :  { %v500_v61 = vadd.f32 %v499_v59, %v315_v51  ;;  %v541_v62 = vadd.f32 %v540_v60, %v323_v52  ;;  %v501_v63 = vpop.f32.mrb[10].mxu1  ;;  %v542_v0 = vpop.f32.mrb[14].mxu0  ;;  %v577_v1 = vcombine.low %v569_v53, %v576_v54 }
 0x3d3   :  { %v549_v2 = vmax.f32 %v498_v57, 0.0  ;;  %v551_v3 = vmax.f32 %v539_v58, 0.0  ;;  %v502_v4 = vpop.f32.mrb[11].mxu1  ;;  %v543_v5 = vpop.f32.mrb[15].mxu0 }
 0x3d4   :  { %v550_v6 = vmax.f32 %v500_v61, 0.0  ;;  %v552_v7 = vmax.f32 %v541_v62, 0.0  ;;  %597 = vst [vmem:[#allocation2] sm:$0xff] %v577_v1 }
 0x3d6   :  { %v578_v8 = vcombine.low %v549_v2, %v550_v6  ;;  %v579_v9 = vcombine.low %v551_v3, %v552_v7 }
 0x3d8   :  { %v586_v10 = vrot.slane %v578_v8, %v568_v45  ;;  %v593_v11 = vrot.slane %v579_v9, %v568_v45 }
 0x3da   :  { %v594_v12 = vcombine.low %v586_v10, %v593_v11 }
 0x3dc   :  { %605 = vst.msk [vmem:[#allocation2 + $0x8] sm:$0xff] %vm604_vm11, %v594_v12 }
 0x3dd   :  { %716 = shalt.err (!%p713_p4)
}
 0x3de   :  { %s717_s24 = scalar_lea.hbm %s887_s11, 256 }
 0x3df   :  { %p718_p5 = scmp.ne.s32.totalorder %s887_s11, %s717_s24  ;;  %p721_p6 = scmp.lt.u32.totalorder %s717_s24, %s887_s11 }
 0x3e1   :  { %p723_p7 = pnand %p721_p6, %p718_p5 }
 0x3e3   :  { %726 = shalt.err (!%p723_p7)
}
 0x3e4   :  { %615 = dma.vmem_to_hbm [thread:$0]  %s613_s1, 256, %s887_s11, [#allocation3]  }
 0x3e5   :  { %727 = dma.done.wait [#allocation3], 256  }
 0x3e6   :  { %728 = vsyncadd [#allocation3], 4294967040 }
 0x3e7   :  { %619 = vsyncpa [#allocation3], 1 }

</bundles_post_ra>
